<compile_context>
chip_gen: v7x
topology: tpu7x:2x2x1
jax: 0.10.0
libtpu: 0.0.40
codegen_flags: <defaults>
</compile_context>

<pallas_src>
import functools

import jax
import jax.numpy as jnp
from jax.experimental import pallas as pl
from jax.experimental.pallas import tpu as pltpu

LANE = 128  # TPU lane width; all padded widths use this.


def _round_up(x, m):
    return (x + m - 1) // m * m


def _mlp_kernel(board_ref, params_ref, bias_ref, out_ref, *, in_pad, output_dim):
    lane = out_ref.shape[-1]

    # Static, sublane-aligned slices into the packed weight slab (VMEM-resident).
    w1 = params_ref[0:in_pad, :]                        # (in_pad, lane)
    w2 = params_ref[in_pad:in_pad + lane, :]            # (lane, lane)
    wh = params_ref[in_pad + lane:in_pad + 2 * lane, :] # (lane, lane)  [W3 | W4 | 0]

    # Biases stay f32 in their own tiny side input (no bf16 rounding / unpack).
    b1 = bias_ref[0:1, :]
    b2 = bias_ref[1:2, :]
    bh = bias_ref[2:3, :]

    cdt = w1.dtype  # MXU input dtype (bf16 default, f32 for the exact path)

    x = board_ref[...]                                   # (tile_b, in_pad)
    h = jnp.dot(x.astype(cdt), w1, preferred_element_type=jnp.float32) + b1
    h = jnp.maximum(h, 0.0)
    h = jnp.dot(h.astype(cdt), w2, preferred_element_type=jnp.float32) + b2
    h = jnp.maximum(h, 0.0)
    logits = jnp.dot(h.astype(cdt), wh, preferred_element_type=jnp.float32) + bh

    # Masked softmax over the pi lanes only (lanes >= output_dim are padding / value head).
    lane_idx = jax.lax.broadcasted_iota(jnp.int32, logits.shape, 1)
    is_pi = lane_idx < output_dim
    masked = jnp.where(is_pi, logits, -jnp.inf)
    m = jnp.max(masked, axis=-1, keepdims=True)
    e = jnp.exp(masked - m)                               # padded lanes -> exp(-inf) = 0
    denom = jnp.sum(e, axis=-1, keepdims=True)
    pi = e * pl.reciprocal(denom, approx=True)            # EUP slot, ~free

    v = jnp.tanh(logits)                                  # lane `output_dim` carries fc4

    # Single lane-dense store: pi in [0, output_dim), v at lane output_dim, 0 elsewhere.
    out_ref[...] = jnp.where(
        is_pi, pi, jnp.where(lane_idx == output_dim, v, 0.0)
    ).astype(out_ref.dtype)


def pack_params(params, dtype=jnp.bfloat16):
    """Pack the Linear weights into one (rows, 128) slab (single DMA, VMEM-resident)
    and the biases into a separate tiny f32 (8, 128) block."""
    W1, b1 = params["W1"], params["b1"]
    W2, b2 = params["W2"], params["b2"]
    W3, b3 = params["W3"], params["b3"]
    W4, b4 = params["W4"], params["b4"]
    input_dim, hidden_dim = W1.shape
    output_dim = W3.shape[1]
    assert hidden_dim <= LANE and output_dim + 1 <= LANE, "pad scheme assumes <=128 wide layers"
    in_pad = _round_up(input_dim, 16)  # sublane-aligned for bf16 and f32 slabs

    w1p = jnp.zeros((in_pad, LANE), jnp.float32).at[:input_dim, :hidden_dim].set(W1)
    w2p = jnp.zeros((LANE, LANE), jnp.float32).at[:hidden_dim, :hidden_dim].set(W2)
    whp = (jnp.zeros((LANE, LANE), jnp.float32)
           .at[:hidden_dim, :output_dim].set(W3)
           .at[:hidden_dim, output_dim].set(W4[:, 0]))
    slab = jnp.concatenate([w1p, w2p, whp], axis=0).astype(dtype)

    biases = (jnp.zeros((8, LANE), jnp.float32)
              .at[0, :hidden_dim].set(b1)
              .at[1, :hidden_dim].set(b2)
              .at[2, :output_dim].set(b3)
              .at[2, output_dim].set(b4[0]))

    meta = dict(input_dim=input_dim, hidden_dim=hidden_dim,
                output_dim=output_dim, in_pad=in_pad)
    return slab, biases, meta


def neuralnet_forward_batched(boards, slab, biases, meta, *, tile_b=512,
                              board_dtype=jnp.bfloat16, out_dtype=jnp.bfloat16):
    """boards: (B, input_dim). Returns (pi (B, output_dim), v (B, 1)) in out_dtype."""
    input_dim = meta["input_dim"]
    output_dim = meta["output_dim"]
    in_pad = meta["in_pad"]

    boards = boards.reshape(boards.shape[0], -1)
    B, width = boards.shape
    assert width == input_dim, f"expected boards of width {input_dim}, got {width}"

    # Batch tile: multiple of 16 sublanes (bf16 packing), capped at the batch size.
    tile_b = int(_round_up(min(tile_b, _round_up(B, 16)), 16))
    B_pad = _round_up(B, tile_b)

    if boards.dtype != board_dtype:
        boards = boards.astype(board_dtype)           # halve input HBM traffic (bf16)

    # Avoid the full padded re-materialization in the aligned common case.
    if B_pad != B or in_pad != input_dim:
        x = jnp.zeros((B_pad, in_pad), board_dtype).at[:B, :input_dim].set(boards)
    else:
        x = boards

    total_rows = slab.shape[0]
    grid = (B_pad // tile_b,)

    kernel = functools.partial(_mlp_kernel, in_pad=in_pad, output_dim=output_dim)

    flops = 2 * B_pad * (in_pad * LANE + 2 * LANE * LANE)
    transcendentals = B_pad * (2 * LANE + 1)              # exp + tanh lanes + reciprocal
    bytes_accessed = (x.size * x.dtype.itemsize
                      + slab.size * slab.dtype.itemsize
                      + biases.size * biases.dtype.itemsize
                      + B_pad * LANE * jnp.dtype(out_dtype).itemsize)

    out = pl.pallas_call(
        kernel,
        out_shape=jax.ShapeDtypeStruct((B_pad, LANE), out_dtype),
        grid=grid,
        in_specs=[
            # board tiles stream along the batch grid axis
            pl.BlockSpec((tile_b, in_pad), lambda i: (i, 0)),
            # weight slab: constant index_map -> VMEM-resident; single-buffered
            pl.BlockSpec((total_rows, LANE), lambda i: (0, 0),
                         pipeline_mode=pl.Buffered(1)),
            # f32 bias block: constant index_map; single-buffered
            pl.BlockSpec((8, LANE), lambda i: (0, 0),
                         pipeline_mode=pl.Buffered(1)),
        ],
        out_specs=pl.BlockSpec((tile_b, LANE), lambda i: (i, 0)),
        compiler_params=pltpu.CompilerParams(
            dimension_semantics=("parallel",)),
        cost_estimate=pl.CostEstimate(flops=flops,
                                      transcendentals=transcendentals,
                                      bytes_accessed=bytes_accessed),
    )(x, slab, biases)

    pi = out[:B, :output_dim]
    v = out[:B, output_dim:output_dim + 1]
    return pi, v


def neuralnet_forward(board, slab, biases, meta, **kw):
    """Single-board path matching the PyTorch module: board.view(-1) -> (pi, v)."""
    pi, v = neuralnet_forward_batched(board.reshape(1, -1), slab, biases, meta,
                                      tile_b=16, **kw)
    return pi[0], v[0]


def init_params(key, input_dim, hidden_dim, output_dim):
    """Deterministic init mirroring nn.Linear's U(-1/sqrt(fan_in), 1/sqrt(fan_in)).
    Weights stored as (in_features, out_features) so y = x @ W + b."""
    def linear(k, fan_in, fan_out):
        kw, kb = jax.random.split(k)
        bound = 1.0 / jnp.sqrt(fan_in)
        W = jax.random.uniform(kw, (fan_in, fan_out), jnp.float32, -bound, bound)
        b = jax.random.uniform(kb, (fan_out,), jnp.float32, -bound, bound)
        return W, b

    k1, k2, k3, k4 = jax.random.split(key, 4)
    W1, b1 = linear(k1, input_dim, hidden_dim)
    W2, b2 = linear(k2, hidden_dim, hidden_dim)
    W3, b3 = linear(k3, hidden_dim, output_dim)
    W4, b4 = linear(k4, hidden_dim, 1)
    return dict(W1=W1, b1=b1, W2=W2, b2=b2, W3=W3, b3=b3, W4=W4, b4=b4)


def reference_forward(boards, params):
    x = jnp.maximum(boards @ params["W1"] + params["b1"], 0.0)
    x = jnp.maximum(x @ params["W2"] + params["b2"], 0.0)
    pi = jax.nn.softmax(x @ params["W3"] + params["b3"], axis=-1)
    v = jnp.tanh(x @ params["W4"] + params["b4"])
    return pi, v


if __name__ == "__main__":
    # Small AlphaZero-style board: 8x8 -> input_dim=64, hidden=32, 8 moves.
    input_dim, hidden_dim, output_dim = 64, 32, 8

    key = jax.random.PRNGKey(0)
    k_params, k_board = jax.random.split(key)
    params = init_params(k_params, input_dim, hidden_dim, output_dim)

    # Batched evaluation (the MCTS use case).  B=2048 with tile_b=512 -> grid=(4,)
    # so v7x's two TensorCores each get >=2 pipelined grid steps.
    B = 2048
    boards = jax.random.normal(k_board, (B, 8, 8), jnp.float32).reshape(B, -1)
    pi_ref, v_ref = reference_forward(boards, params)

    # --- exact path (f32 weights / boards / output) for a tight correctness check.
    slab_f32, biases, meta = pack_params(params, dtype=jnp.float32)
    pi32, v32 = neuralnet_forward_batched(
        boards, slab_f32, biases, meta, tile_b=512,
        board_dtype=jnp.float32, out_dtype=jnp.float32)
    jax.block_until_ready((pi32, v32))
    assert pi32.shape == (B, output_dim) and v32.shape == (B, 1)
    assert jnp.allclose(pi32, pi_ref, atol=5e-3), "batched pi mismatch (f32)"
    assert jnp.allclose(v32, v_ref, atol=5e-3), "batched v mismatch (f32)"
    assert jnp.allclose(jnp.sum(pi32, axis=-1), 1.0, atol=5e-3)

    # --- default perf path: bf16 boards / weights / output, f32 biases + accumulation.
    slab_bf16, biases, meta = pack_params(params)            # bf16 weights by default
    boards_bf16 = boards.astype(jnp.bfloat16)                # cast once, outside the kernel
    pi_b, v_b = neuralnet_forward_batched(boards_bf16, slab_bf16, biases, meta)
    jax.block_until_ready((pi_b, v_b))
    assert pi_b.shape == (B, output_dim) and v_b.shape == (B, 1)
    assert pi_b.dtype == jnp.bfloat16 and v_b.dtype == jnp.bfloat16
    assert jnp.allclose(pi_b.astype(jnp.float32), pi_ref, atol=5e-2), "batched pi mismatch (bf16)"
    assert jnp.allclose(v_b.astype(jnp.float32), v_ref, atol=5e-2), "batched v mismatch (bf16)"

    # --- single-board path (matches the PyTorch forward signature / shapes).
    pi1, v1 = neuralnet_forward(boards[0].reshape(8, 8), slab_bf16, biases, meta)
    jax.block_until_ready((pi1, v1))
    assert pi1.shape == (output_dim,) and v1.shape == (1,)
    assert jnp.allclose(pi1.astype(jnp.float32), pi_ref[0], atol=5e-2), "single-board pi mismatch"
    assert jnp.allclose(v1.astype(jnp.float32), v_ref[0], atol=5e-2), "single-board v mismatch"

    print("KERNEL_OK")
</pallas_src>

<mosaic_0001>
module attributes {stable_mosaic.version = 11 : i64} {
  func.func @_mlp_kernel(%arg0: i32, %arg1: memref<512x64xf32, #tpu.memory_space<vmem>>, %arg2: memref<320x128xf32, #tpu.memory_space<vmem>>, %arg3: memref<8x128xf32, #tpu.memory_space<vmem>>, %arg4: memref<512x128xf32, #tpu.memory_space<vmem>>) attributes {dimension_semantics = [#tpu.dimension_semantics<parallel>], iteration_bounds = array<i64: 4>, scalar_prefetch = 0 : i64, scratch_operands = 0 : i64, tpu.core_type = #tpu.core_type<tc>, window_params = [{transform_indices = @transform_0, window_bounds = array<i64: 512, 64>}, {pipeline_mode = #tpu.pipeline_mode<synchronous>, transform_indices = @transform_1, window_bounds = array<i64: 320, 128>}, {pipeline_mode = #tpu.pipeline_mode<synchronous>, transform_indices = @transform_2, window_bounds = array<i64: 8, 128>}, {transform_indices = @transform_3, window_bounds = array<i64: 512, 128>}]} {
    %c0 = arith.constant 0 : index
    %c0_0 = arith.constant 0 : index
    %0 = vector.load %arg2[%c0, %c0_0] : memref<320x128xf32, #tpu.memory_space<vmem>>, vector<64x128xf32>
    %c64 = arith.constant 64 : index
    %c0_1 = arith.constant 0 : index
    %1 = vector.load %arg2[%c64, %c0_1] : memref<320x128xf32, #tpu.memory_space<vmem>>, vector<128x128xf32>
    %c192 = arith.constant 192 : index
    %c0_2 = arith.constant 0 : index
    %2 = vector.load %arg2[%c192, %c0_2] : memref<320x128xf32, #tpu.memory_space<vmem>>, vector<128x128xf32>
    %c0_3 = arith.constant 0 : index
    %c0_4 = arith.constant 0 : index
    %3 = vector.load %arg3[%c0_3, %c0_4] : memref<8x128xf32, #tpu.memory_space<vmem>>, vector<1x128xf32>
    %c1 = arith.constant 1 : index
    %c0_5 = arith.constant 0 : index
    %4 = vector.load %arg3[%c1, %c0_5] : memref<8x128xf32, #tpu.memory_space<vmem>>, vector<1x128xf32>
    %c2 = arith.constant 2 : index
    %c0_6 = arith.constant 0 : index
    %5 = vector.load %arg3[%c2, %c0_6] : memref<8x128xf32, #tpu.memory_space<vmem>>, vector<1x128xf32>
    %c0_7 = arith.constant 0 : index
    %c0_8 = arith.constant 0 : index
    %6 = vector.load %arg1[%c0_7, %c0_8] : memref<512x64xf32, #tpu.memory_space<vmem>>, vector<512x64xf32>
    %cst = arith.constant dense<0.000000e+00> : vector<512x128xf32>
    %7 = tpu.matmul %6, %0, %cst {dimension_numbers = #tpu.dot_dimension_numbers<[1], [0], [0], [1], [0, 0, 1, 1], [], []>} : vector<512x64xf32>, vector<64x128xf32>, vector<512x128xf32> -> vector<512x128xf32>
    %8 = vector.broadcast %3 : vector<1x128xf32> to vector<512x128xf32>
    %9 = arith.addf %7, %8 : vector<512x128xf32>
    %cst_9 = arith.constant 0.000000e+00 : f32
    %10 = vector.broadcast %cst_9 : f32 to vector<512x128xf32>
    %11 = arith.maximumf %9, %10 : vector<512x128xf32>
    %cst_10 = arith.constant dense<0.000000e+00> : vector<512x128xf32>
    %12 = tpu.matmul %11, %1, %cst_10 {dimension_numbers = #tpu.dot_dimension_numbers<[1], [0], [0], [1], [0, 0, 1, 1], [], []>} : vector<512x128xf32>, vector<128x128xf32>, vector<512x128xf32> -> vector<512x128xf32>
    %13 = vector.broadcast %4 : vector<1x128xf32> to vector<512x128xf32>
    %14 = arith.addf %12, %13 : vector<512x128xf32>
    %cst_11 = arith.constant 0.000000e+00 : f32
    %15 = vector.broadcast %cst_11 : f32 to vector<512x128xf32>
    %16 = arith.maximumf %14, %15 : vector<512x128xf32>
    %cst_12 = arith.constant dense<0.000000e+00> : vector<512x128xf32>
    %17 = tpu.matmul %16, %2, %cst_12 {dimension_numbers = #tpu.dot_dimension_numbers<[1], [0], [0], [1], [0, 0, 1, 1], [], []>} : vector<512x128xf32>, vector<128x128xf32>, vector<512x128xf32> -> vector<512x128xf32>
    %18 = vector.broadcast %5 : vector<1x128xf32> to vector<512x128xf32>
    %19 = arith.addf %17, %18 : vector<512x128xf32>
    %20 = tpu.iota {dimensions = array<i32: 1>} : vector<512x128xi32>
    %c8_i32 = arith.constant 8 : i32
    %21 = vector.broadcast %c8_i32 : i32 to vector<512x128xi32>
    %22 = arith.cmpi slt, %20, %21 : vector<512x128xi32>
    %cst_13 = arith.constant 0xFF800000 : f32
    %23 = vector.broadcast %cst_13 : f32 to vector<512x128xf32>
    %24 = arith.select %22, %19, %23 : vector<512x128xi1>, vector<512x128xf32>
    %cst_14 = arith.constant dense<0xFF800000> : vector<512xf32>
    %25 = vector.multi_reduction <maximumf>, %24, %cst_14 [1] : vector<512x128xf32> to vector<512xf32>
    %26 = vector.shape_cast %25 : vector<512xf32> to vector<512x1xf32>
    %27 = vector.broadcast %26 : vector<512x1xf32> to vector<512x128xf32>
    %28 = arith.subf %24, %27 : vector<512x128xf32>
    %29 = math.exp %28 : vector<512x128xf32>
    %cst_15 = arith.constant dense<0.000000e+00> : vector<512xf32>
    %30 = vector.multi_reduction <add>, %29, %cst_15 [1] : vector<512x128xf32> to vector<512xf32>
    %31 = vector.shape_cast %30 : vector<512xf32> to vector<512x1xf32>
    %32 = tpu.reciprocal %31 {approx = true} : vector<512x1xf32> -> vector<512x1xf32>
    %33 = vector.broadcast %32 : vector<512x1xf32> to vector<512x128xf32>
    %34 = arith.mulf %29, %33 : vector<512x128xf32>
    %35 = math.tanh %19 : vector<512x128xf32>
    %c8_i32_16 = arith.constant 8 : i32
    %36 = vector.broadcast %c8_i32_16 : i32 to vector<512x128xi32>
    %37 = arith.cmpi eq, %20, %36 : vector<512x128xi32>
    %cst_17 = arith.constant 0.000000e+00 : f32
    %38 = vector.broadcast %cst_17 : f32 to vector<512x128xf32>
    %39 = arith.select %37, %35, %38 : vector<512x128xi1>, vector<512x128xf32>
    %40 = arith.select %22, %34, %39 : vector<512x128xi1>, vector<512x128xf32>
    %c0_18 = arith.constant 0 : index
    %c0_19 = arith.constant 0 : index
    %41 = vector.load %arg4[%c0_18, %c0_19] : memref<512x128xf32, #tpu.memory_space<vmem>>, vector<512x128xf32>
    tpu.vector_store %arg4[%c0_18, %c0_19], %40 {strides = array<i32>} : memref<512x128xf32, #tpu.memory_space<vmem>>, vector<512x128xf32>,
    return
  }
  func.func @transform_0(%arg0: i32) -> (i32, i32) {
    %c0_i32 = arith.constant 0 : i32
    %c0_i32_0 = arith.constant 0 : i32
    return %arg0, %c0_i32 : i32, i32
  }
  func.func @transform_1(%arg0: i32) -> (i32, i32) {
    %c0_i32 = arith.constant 0 : i32
    %c0_i32_0 = arith.constant 0 : i32
    %c0_i32_1 = arith.constant 0 : i32
    return %c0_i32, %c0_i32_0 : i32, i32
  }
  func.func @transform_2(%arg0: i32) -> (i32, i32) {
    %c0_i32 = arith.constant 0 : i32
    %c0_i32_0 = arith.constant 0 : i32
    %c0_i32_1 = arith.constant 0 : i32
    return %c0_i32, %c0_i32_0 : i32, i32
  }
  func.func @transform_3(%arg0: i32) -> (i32, i32) {
    %c0_i32 = arith.constant 0 : i32
    %c0_i32_0 = arith.constant 0 : i32
    return %arg0, %c0_i32 : i32, i32
  }
}

</mosaic_0001>

<bundles_post_ra>
// kernel: tpu_custom_call.1
= control target key start
LH: loop header
LB: loop body
LE: loop exit
PB: predicated region body
PF: predicated region fallthrough
CT: control target
= control target key end

     0   :  { %8 = vsyncpa [#allocation3], 0  ;;  %s5905_s0 = inlined_call_operand.vmem [shape: f32[2048,64], index: 0, kind: input, shape index: {}]   ;;  %s5906_s1 = inlined_call_operand.vmem [shape: f32[320,128], index: 1, kind: input, shape index: {}]   ;;  %s5907_s2 = inlined_call_operand.vmem [shape: f32[8,128], index: 2, kind: input, shape index: {}]   ;;  %s5908_s3 = inlined_call_operand.hbm [shape: f32[2048,128], index: 3, kind: output, shape index: {}]  }
   0x1   :  { %10 = vsyncpa [#allocation3 + $0x1], 0  ;;  %s4023_s12 = smov 0   ;;  %s4025_s13 = smov 0  }
   0x2   :  { %s4027_s14 = smov 0   ;;  %s4029_s15 = smov 0  }
   0x3 LB: > { %s4044_s16 = sadd.s32 4294967295, %s3998_s15   ;;  %s2743_s17 = sadd.s32 4294967294, %s3998_s15   ;;  %s3998_s15 = sphi %s4029_s15, %s6194_s15   ;;  %s3994_s14 = sphi %s4027_s14, %s6193_s14   ;;  %s3990_s13 = sphi %s4025_s13, %s6192_s13   ;;  %s3986_s12 = sphi %s4023_s12, %s6191_s12  }
   0x4   : > { %s4048_s18 = sadd.s32 1, %s3998_s15   ;;  %s91_s19 = sadd.s32 1, %s3994_s14 }
   0x5   : > { %s88_s20 = ssub.s32 %s3998_s15, %s4048_s18  ;;  %p101_p0 = scmp.ne.s32.totalorder %s3994_s14, %s3990_s13 }
   0x6   : > { %p89_p1 = scmp.eq.s32.totalorder %s88_s20, 0  ;;  %p102_p2 = scmp.eq.s32.totalorder %s4044_s16, 3 }
   0x7   : > { %p107_p3 = scmp.ne.s32.totalorder %s3990_s13, %s3986_s12  ;;  %p108_p4 = scmp.eq.s32.totalorder %s2743_s17, 3 }
   0x8   : > { %s4059_s21 = scalar_select %p89_p1, %s3994_s14, %s91_s19  }
   0x9   : > { %p4061_p5 = por %p102_p2, %p101_p0  ;;  %p4065_p6 = por %p108_p4, %p107_p3 }
   0xa   : > { %p2746_p7 = scmp.ge.s32.totalorder %s3998_s15, 1  ;;  %p141_p8 = scmp.lt.s32.totalorder %s3998_s15, 5 }
   0xc   : > { %p142_p9 = pnand %p2746_p7, %p141_p8 }
   0xe   : > { %145 = sbr.rel (%p142_p9) target bundleno = 1148 (0x47c), region = 32 }
  0x15   : > { %v172_v0 = vld [vmem:[%s5906_s1] sm:$0xff]  ;;  %v173_v1 = vld [vmem:[%s5906_s1 + $0x8] sm:$0xff]  ;;  %v174_v2 = vld [vmem:[%s5906_s1 + $0x10] sm:$0xff]  ;;  %s2748_s30 = sshll.u32 %s4044_s16, 6  ;;  %vm283_vm0 = vcmask 523264   ;;  %s2822_s29 = sshll.u32 %s4044_s16, 13 }
  0x16   : > { %v3423_v3 = vpack.c.bf16 %v173_v1, %v172_v0  ;;  %v175_v4 = vld [vmem:[%s5906_s1 + $0x18] sm:$0xff]  ;;  %p166_p10 = scmp.lt.s32.totalorder %s2748_s30, 255  ;;  %v176_v6 = vld [vmem:[%s5906_s1 + $0x20] sm:$0xff]  ;;  %v177_v7 = vld [vmem:[%s5906_s1 + $0x28] sm:$0xff]  ;;  %s5850_s5 = scalar_lea.hbm %s5908_s3, %s2822_s29 }
  0x17   : > { %v3427_v5 = vpack.c.bf16 %v175_v4, %v174_v2  ;;  %v3431_v8 = vpack.c.bf16 %v177_v7, %v176_v6  ;;  %v178_v9 = vld [vmem:[%s5906_s1 + $0x30] sm:$0xff]  ;;  %v179_v10 = vld [vmem:[%s5906_s1 + $0x38] sm:$0xff]  ;;  %v180_v13 = vld [vmem:[%s5906_s1 + $0x40] sm:$0xff]  ;;  %s4000_s8 = smov [#allocation2]  }
  0x18   : > { %3424 = vmatprep.subr.bf16.mxu0 %v3423_v3  ;;  %s6196_s30 = smov (!%p166_p10, %s2748_s30), 255  ;;  %3503 = vmatprep.subr.bf16.mxu1 %v3423_v3  ;;  %v3435_v12 = vpack.c.bf16 %v179_v10, %v178_v9  ;;  %v181_v14 = vld [vmem:[%s5906_s1 + $0x48] sm:$0xff]  ;;  %v182_v16 = vld [vmem:[%s5906_s1 + $0x50] sm:$0xff]  ;;  %v183_v17 = vld [vmem:[%s5906_s1 + $0x58] sm:$0xff]  ;;  %s3940_s9 = sshll.u32 %s4000_s8, 4  ;;  %s3941_s9 = int_to_ptr.vmem [resolvable:$false] %s3940_s9 }
  0x19   : > { %3426 = vmatpush3.bf16.msra.mxu0 %v3423_v3  ;;  %3507 = vmatpush3.bf16.msra.mxu1 %v3423_v3  ;;  %s2749_s10 = sshll.u32 %s6196_s30, 3  ;;  %v3439_v15 = vpack.c.bf16 %v181_v14, %v180_v13  ;;  %v3443_v23 = vpack.c.bf16 %v183_v17, %v182_v16  ;;  %v184_v24 = vld [vmem:[%s5906_s1 + $0x60] sm:$0xff]  ;;  %v185_v25 = vld [vmem:[%s5906_s1 + $0x68] sm:$0xff]  ;;  %v186_v31 = vld [vmem:[%s5906_s1 + $0x70] sm:$0xff] }
  0x1a   : > { %3428 = vmatprep.subr.bf16.mxu0 %v3427_v5  ;;  %3504 = vmatprep.subr.bf16.mxu1 %v3427_v5  ;;  %s4099_s26 = scalar_lea.vmem %s5905_s0, %s2749_s10  ;;  %v3447_v30 = vpack.c.bf16 %v185_v25, %v184_v24  ;;  %v187_v32 = vld [vmem:[%s5906_s1 + $0x78] sm:$0xff]  ;;  %v188_v38 = vld [vmem:[%s5906_s1 + $0x80] sm:$0xff]  ;;  %v189_v39 = vld [vmem:[%s5906_s1 + $0x88] sm:$0xff]  ;;  %s3942_s10 = scalar_lea.vmem %s3941_s9, 16384 }
  0x1b   : > { %v215_v11 = vld [vmem:[%s4099_s26] sm:$0xff]  ;;  %v216_v18 = vld [vmem:[%s4099_s26 + $0x8] sm:$0xff]  ;;  %v217_v19 = vld [vmem:[%s4099_s26 + $0x10] sm:$0xff]  ;;  %v3451_v37 = vpack.c.bf16 %v187_v32, %v186_v31  ;;  %v3455_v44 = vpack.c.bf16 %v189_v39, %v188_v38 }
  0x1c   : > { %3071 = vmatprep.mubr.msk.f32.mxu0 %vm283_vm0, %v215_v11  ;;  %v247_v20 = vld [vmem:[%s4099_s26 + $0x100] sm:$0xff]  ;;  %v248_v21 = vld [vmem:[%s4099_s26 + $0x108] sm:$0xff]  ;;  %v249_v22 = vld [vmem:[%s4099_s26 + $0x110] sm:$0xff] }
  0x1d   : > { %3430 = vmatpush3.bf16.msra.mxu0 %v3427_v5  ;;  %3508 = vmatpush3.bf16.msra.mxu1 %v3427_v5  ;;  %v218_v26 = vld [vmem:[%s4099_s26 + $0x18] sm:$0xff]  ;;  %v219_v27 = vld [vmem:[%s4099_s26 + $0x20] sm:$0xff]  ;;  %v220_v33 = vld [vmem:[%s4099_s26 + $0x28] sm:$0xff] }
  0x1e   : > { %3432 = vmatprep.subr.bf16.mxu0 %v3431_v8  ;;  %3505 = vmatprep.subr.bf16.mxu1 %v3431_v8  ;;  %v250_v28 = vld [vmem:[%s4099_s26 + $0x118] sm:$0xff]  ;;  %v251_v29 = vld [vmem:[%s4099_s26 + $0x120] sm:$0xff]  ;;  %v221_v34 = vld [vmem:[%s4099_s26 + $0x30] sm:$0xff] }
  0x1f   : > { %3119 = vmatprep.mubr.msk.f32.mxu1 %vm283_vm0, %v247_v20  ;;  %v252_v35 = vld [vmem:[%s4099_s26 + $0x128] sm:$0xff]  ;;  %v253_v36 = vld [vmem:[%s4099_s26 + $0x130] sm:$0xff]  ;;  %v222_v40 = vld [vmem:[%s4099_s26 + $0x38] sm:$0xff] }
  0x20   : > { %v223_v41 = vld [vmem:[%s4099_s26 + $0x40] sm:$0xff]  ;;  %v254_v42 = vld [vmem:[%s4099_s26 + $0x138] sm:$0xff]  ;;  %v190_v45 = vld [vmem:[%s5906_s1 + $0x90] sm:$0xff] }
  0x21   : > { %3434 = vmatpush3.bf16.msra.mxu0 %v3431_v8  ;;  %3509 = vmatpush3.bf16.msra.mxu1 %v3431_v8  ;;  %v255_v43 = vld [vmem:[%s4099_s26 + $0x140] sm:$0xff]  ;;  %v191_v46 = vld [vmem:[%s5906_s1 + $0x98] sm:$0xff]  ;;  %v224_v47 = vld [vmem:[%s4099_s26 + $0x48] sm:$0xff] }
  0x22   : > { %3436 = vmatprep.subr.bf16.mxu0 %v3435_v12  ;;  %3506 = vmatprep.subr.bf16.mxu1 %v3435_v12  ;;  %v225_v48 = vld [vmem:[%s4099_s26 + $0x50] sm:$0xff]  ;;  %v256_v49 = vld [vmem:[%s4099_s26 + $0x148] sm:$0xff]  ;;  %v3459_v51 = vpack.c.bf16 %v191_v46, %v190_v45  ;;  %v192_v52 = vld [vmem:[%s5906_s1 + $0xa0] sm:$0xff] }
  0x23   : > { %v257_v50 = vld [vmem:[%s4099_s26 + $0x150] sm:$0xff]  ;;  %v193_v53 = vld [vmem:[%s5906_s1 + $0xa8] sm:$0xff]  ;;  %v226_v54 = vld [vmem:[%s4099_s26 + $0x58] sm:$0xff] }
  0x24   : > { %v227_v55 = vld [vmem:[%s4099_s26 + $0x60] sm:$0xff]  ;;  %v258_v56 = vld [vmem:[%s4099_s26 + $0x158] sm:$0xff]  ;;  %v3463_v58 = vpack.c.bf16 %v193_v53, %v192_v52  ;;  %v194_v59 = vld [vmem:[%s5906_s1 + $0xb0] sm:$0xff] }
  0x25   : > { %3438 = vmatpush3.bf16.msra.mxu0 %v3435_v12  ;;  %3510 = vmatpush3.bf16.msra.mxu1 %v3435_v12  ;;  %v259_v57 = vld [vmem:[%s4099_s26 + $0x160] sm:$0xff]  ;;  %v195_v60 = vld [vmem:[%s5906_s1 + $0xb8] sm:$0xff]  ;;  %v228_v61 = vld [vmem:[%s4099_s26 + $0x68] sm:$0xff] }
  0x26   : > { %3440 = vmatprep.subr.bf16.mxu1 %v3439_v15  ;;  %v229_v62 = vld [vmem:[%s4099_s26 + $0x70] sm:$0xff]  ;;  %v260_v63 = vld [vmem:[%s4099_s26 + $0x168] sm:$0xff]  ;;  %v3467_v1 = vpack.c.bf16 %v195_v60, %v194_v59  ;;  %v230_v2 = vld [vmem:[%s4099_s26 + $0x78] sm:$0xff] }
  0x27   : > { %v261_v0 = vld [vmem:[%s4099_s26 + $0x170] sm:$0xff]  ;;  %v231_v3 = vld [vmem:[%s4099_s26 + $0x80] sm:$0xff]  ;;  %v262_v4 = vld [vmem:[%s4099_s26 + $0x178] sm:$0xff] }
  0x28   : > { %3072 = vmatmul.mubr.msk.f32.vlgmr.msra.gmra.mrb[0].mxu0 %vm283_vm0, %v216_v18  ;;  %3120 = vmatmul.mubr.msk.f32.vlgmr.msra.gmra.mrb[0].mxu1 %vm283_vm0, %v248_v21  ;;  %v263_v5 = vld [vmem:[%s4099_s26 + $0x180] sm:$0xff]  ;;  %v232_v6 = vld [vmem:[%s4099_s26 + $0x88] sm:$0xff]  ;;  %v233_v7 = vld [vmem:[%s4099_s26 + $0x90] sm:$0xff] }
  0x29   : > { %3074 = vmatprep.mubr.msk.f32.mxu0 %vm283_vm0, %v217_v19  ;;  %3122 = vmatprep.mubr.msk.f32.mxu1 %vm283_vm0, %v249_v22  ;;  %v264_v8 = vld [vmem:[%s4099_s26 + $0x188] sm:$0xff]  ;;  %v265_v9 = vld [vmem:[%s4099_s26 + $0x190] sm:$0xff]  ;;  %v234_v10 = vld [vmem:[%s4099_s26 + $0x98] sm:$0xff] }
  0x2a   : > { %3442 = vmatpush3.bf16.msra.mxu1 %v3439_v15  ;;  %v235_v11 = vld [vmem:[%s4099_s26 + $0xa0] sm:$0xff]  ;;  %v266_v12 = vld [vmem:[%s4099_s26 + $0x198] sm:$0xff]  ;;  %v236_v14 = vld [vmem:[%s4099_s26 + $0xa8] sm:$0xff] }
  0x2b   : > { %3444 = vmatprep.subr.bf16.mxu1 %v3443_v23  ;;  %v267_v13 = vld [vmem:[%s4099_s26 + $0x1a0] sm:$0xff]  ;;  %v237_v15 = vld [vmem:[%s4099_s26 + $0xb0] sm:$0xff]  ;;  %v268_v16 = vld [vmem:[%s4099_s26 + $0x1a8] sm:$0xff] }
  0x2c   : > { %3075 = vmatmul.mubr.msk.f32.gmra.mrb[2].mxu0 %vm283_vm0, %v218_v26  ;;  %3123 = vmatmul.mubr.msk.f32.gmra.mrb[2].mxu1 %vm283_vm0, %v250_v28  ;;  %v269_v17 = vld [vmem:[%s4099_s26 + $0x1b0] sm:$0xff]  ;;  %v238_v18 = vld [vmem:[%s4099_s26 + $0xb8] sm:$0xff]  ;;  %v239_v19 = vld [vmem:[%s4099_s26 + $0xc0] sm:$0xff] }
  0x2d   : > { %3077 = vmatprep.mubr.msk.f32.mxu0 %vm283_vm0, %v219_v27  ;;  %3125 = vmatprep.mubr.msk.f32.mxu1 %vm283_vm0, %v251_v29  ;;  %v270_v20 = vld [vmem:[%s4099_s26 + $0x1b8] sm:$0xff]  ;;  %v271_v21 = vld [vmem:[%s4099_s26 + $0x1c0] sm:$0xff]  ;;  %v240_v22 = vld [vmem:[%s4099_s26 + $0xc8] sm:$0xff] }
  0x2e   : > { %3446 = vmatpush3.bf16.msra.mxu1 %v3443_v23  ;;  %v241_v23 = vld [vmem:[%s4099_s26 + $0xd0] sm:$0xff]  ;;  %v272_v24 = vld [vmem:[%s4099_s26 + $0x1c8] sm:$0xff]  ;;  %v242_v26 = vld [vmem:[%s4099_s26 + $0xd8] sm:$0xff] }
  0x2f   : > { %3448 = vmatprep.subr.bf16.mxu1 %v3447_v30  ;;  %v273_v25 = vld [vmem:[%s4099_s26 + $0x1d0] sm:$0xff]  ;;  %v243_v27 = vld [vmem:[%s4099_s26 + $0xe0] sm:$0xff]  ;;  %v274_v28 = vld [vmem:[%s4099_s26 + $0x1d8] sm:$0xff] }
  0x30   : > { %3078 = vmatmul.mubr.msk.f32.gmra.mrb[4].mxu0 %vm283_vm0, %v220_v33  ;;  %3126 = vmatmul.mubr.msk.f32.gmra.mrb[4].mxu1 %vm283_vm0, %v252_v35  ;;  %v275_v29 = vld [vmem:[%s4099_s26 + $0x1e0] sm:$0xff]  ;;  %v245_v31 = vld [vmem:[%s4099_s26 + $0xf0] sm:$0xff]  ;;  %v276_v32 = vld [vmem:[%s4099_s26 + $0x1e8] sm:$0xff] }
  0x31   : > { %3080 = vmatprep.mubr.msk.f32.mxu0 %vm283_vm0, %v221_v34  ;;  %3128 = vmatprep.mubr.msk.f32.mxu1 %vm283_vm0, %v253_v36  ;;  %v277_v33 = vld [vmem:[%s4099_s26 + $0x1f0] sm:$0xff]  ;;  %v246_v34 = vld [vmem:[%s4099_s26 + $0xf8] sm:$0xff]  ;;  %v4280_v36 = vld [vmem:[%s5907_s2] ss:$0 sm:$0xff] }
  0x32   : > { %3450 = vmatpush3.bf16.msra.mxu1 %v3447_v30  ;;  %v244_v30 = vld [vmem:[%s4099_s26 + $0xe8] sm:$0xff]  ;;  %v278_v35 = vld [vmem:[%s4099_s26 + $0x1f8] sm:$0xff]  ;;  %v198_v46 = vld [vmem:[%s5906_s1 + $0xd0] sm:$0xff]  ;;  %s162_s26 = sand.u32 1, %s3990_s13  }
  0x33   : > { %3452 = vmatprep.subr.bf16.mxu1 %v3451_v37  ;;  %v197_v45 = vld [vmem:[%s5906_s1 + $0xc8] sm:$0xff]  ;;  %s2747_s27 = sshll.u32 %s162_s26, 9  ;;  %s5864_s6 = scalar_lea.sflag [#allocation3], %s162_s26 }
  0x34   : > { %3081 = vmatmul.mubr.msk.f32.gmra.mrb[6].mxu0 %vm283_vm0, %v222_v40  ;;  %3129 = vmatmul.mubr.msk.f32.gmra.mrb[6].mxu1 %vm283_vm0, %v254_v42  ;;  %s5415_s28 = scalar_lea.vmem [#allocation2], %s2747_s27 }
  0x35   : > { %3083 = vmatprep.mubr.msk.f32.mxu0 %vm283_vm0, %v223_v41  ;;  %3131 = vmatprep.mubr.msk.f32.mxu1 %vm283_vm0, %v255_v43  ;;  %s2681_s30 = sshll.u32 %s5415_s28, 4  ;;  %s5852_s30 = int_to_ptr.vmem [resolvable:$true] %s2681_s30 }
  0x36   : > { %3454 = vmatpush3.bf16.msra.mxu1 %v3451_v37  ;;  %s3936_s7 = scalar_lea.vmem %s5852_s30, 8192  ;;  %p3943_p0 = scmp.lt.s32.totalorder %s5852_s30, %s3941_s9 }
  0x37   : > { %3456 = vmatprep.subr.bf16.mxu1 %v3455_v44  ;;  %p3937_p11 = scmp.ne.s32.totalorder %s5852_s30, %s3936_s7  ;;  %p3944_p1 = scmp.lt.s32.totalorder %s3942_s10, %s3936_s7 }
  0x38   : > { %3084 = vmatmul.mubr.msk.f32.gmra.mrb[8].mxu0 %vm283_vm0, %v224_v47  ;;  %3132 = vmatmul.mubr.msk.f32.gmra.mrb[8].mxu1 %vm283_vm0, %v256_v49 }
  0x39   : > { %3086 = vmatprep.mubr.msk.f32.mxu0 %vm283_vm0, %v225_v48  ;;  %3134 = vmatprep.mubr.msk.f32.mxu1 %vm283_vm0, %v257_v50  ;;  %v199_v50 = vld [vmem:[%s5906_s1 + $0xd8] sm:$0xff]  ;;  %p3938_p12 = pnand %p3937_p11, %p4061_p5  ;;  %p3945_p2 = por %p3944_p1, %p3943_p0 }
  0x3a   : > { %3458 = vmatpush3.bf16.msra.mxu1 %v3455_v44  ;;  %v196_v44 = vld [vmem:[%s5906_s1 + $0xc0] sm:$0xff] }
  0x3b   : > { %3460 = vmatprep.subr.bf16.mxu1 %v3459_v51  ;;  %v3471_v49 = vpack.c.bf16 %v197_v45, %v196_v44  ;;  %p3939_p13 = pneg %p3938_p12 }
  0x3c   : > { %3087 = vmatmul.mubr.msk.f32.gmra.mrb[10].mxu0 %vm283_vm0, %v226_v54  ;;  %3135 = vmatmul.mubr.msk.f32.gmra.mrb[10].mxu1 %vm283_vm0, %v258_v56  ;;  %v200_v56 = vld [vmem:[%s5906_s1 + $0xe0] sm:$0xff] }
  0x3d   : > { %3089 = vmatprep.mubr.msk.f32.mxu0 %vm283_vm0, %v227_v55  ;;  %3137 = vmatprep.mubr.msk.f32.mxu1 %vm283_vm0, %v259_v57  ;;  %v3475_v55 = vpack.c.bf16 %v199_v50, %v198_v46  ;;  %v201_v57 = vld [vmem:[%s5906_s1 + $0xe8] sm:$0xff]  ;;  %p3946_p3 = pnand %p3945_p2, %p3939_p13 }
  0x3e   : > { %3462 = vmatpush3.bf16.msra.mxu1 %v3459_v51  ;;  %3472 = vmatprep.subr.bf16.mxu0 %v3471_v49 }
  0x3f   : > { %3464 = vmatprep.subr.bf16.mxu1 %v3463_v58  ;;  %3474 = vmatpush3.bf16.msra.mxu0 %v3471_v49 }
  0x40   : > { %3090 = vmatmul.mubr.msk.f32.gmra.mrb[12].mxu0 %vm283_vm0, %v228_v61  ;;  %3138 = vmatmul.mubr.msk.f32.gmra.mrb[12].mxu1 %vm283_vm0, %v260_v63 }
  0x41   : > { %3092 = vmatprep.mubr.msk.f32.mxu0 %vm283_vm0, %v229_v62  ;;  %3140 = vmatprep.mubr.msk.f32.mxu1 %vm283_vm0, %v261_v0  ;;  %v3479_v0 = vpack.c.bf16 %v201_v57, %v200_v56 }
  0x42   : > { %3466 = vmatpush3.bf16.msra.mxu1 %v3463_v58  ;;  %3476 = vmatprep.subr.bf16.mxu0 %v3475_v55 }
  0x43   : > { %3468 = vmatprep.subr.bf16.mxu1 %v3467_v1  ;;  %3478 = vmatpush3.bf16.msra.mxu0 %v3475_v55 }
  0x44   : > { %3093 = vmatmul.mubr.msk.f32.gmra.mrb[14].mxu0 %vm283_vm0, %v230_v2  ;;  %3141 = vmatmul.mubr.msk.f32.gmra.mrb[14].mxu1 %vm283_vm0, %v262_v4 }
  0x45   : > { %3095 = vmatprep.mubr.msk.f32.mxu0 %vm283_vm0, %v231_v3  ;;  %3143 = vmatprep.mubr.msk.f32.mxu1 %vm283_vm0, %v263_v5  ;;  %v202_v5 = vld [vmem:[%s5906_s1 + $0xf0] sm:$0xff] }
  0x46   : > { %3470 = vmatpush3.bf16.msra.mxu1 %v3467_v1  ;;  %3480 = vmatprep.subr.bf16.mxu0 %v3479_v0 }
  0x47   : > { %3482 = vmatpush3.bf16.msra.mxu0 %v3479_v0 }
  0x48   : > { %3096 = vmatmul.mubr.msk.f32.gmra.mrb[16].mxu0 %vm283_vm0, %v232_v6  ;;  %3144 = vmatmul.mubr.msk.f32.gmra.mrb[16].mxu1 %vm283_vm0, %v264_v8  ;;  %v203_v6 = vld [vmem:[%s5906_s1 + $0xf8] sm:$0xff] }
  0x49   : > { %3098 = vmatprep.mubr.msk.f32.mxu0 %vm283_vm0, %v233_v7  ;;  %3146 = vmatprep.mubr.msk.f32.mxu1 %vm283_vm0, %v265_v9 }
  0x4c   : > { %3099 = vmatmul.mubr.msk.f32.gmra.mrb[18].mxu0 %vm283_vm0, %v234_v10  ;;  %3147 = vmatmul.mubr.msk.f32.gmra.mrb[18].mxu1 %vm283_vm0, %v266_v12 }
  0x4d   : > { %3101 = vmatprep.mubr.msk.f32.mxu0 %vm283_vm0, %v235_v11  ;;  %3149 = vmatprep.mubr.msk.f32.mxu1 %vm283_vm0, %v267_v13 }
  0x50   : > { %3102 = vmatmul.mubr.msk.f32.gmra.mrb[20].mxu0 %vm283_vm0, %v236_v14  ;;  %3150 = vmatmul.mubr.msk.f32.gmra.mrb[20].mxu1 %vm283_vm0, %v268_v16  ;;  %v3483_v14 = vpack.c.bf16 %v203_v6, %v202_v5 }
  0x51   : > { %3104 = vmatprep.mubr.msk.f32.mxu0 %vm283_vm0, %v237_v15  ;;  %3152 = vmatprep.mubr.msk.f32.mxu1 %vm283_vm0, %v269_v17 }
  0x52   : > { %3484 = vmatprep.subr.bf16.mxu0 %v3483_v14 }
  0x53   : > { %3486 = vmatpush3.bf16.msra.mxu0 %v3483_v14 }
  0x54   : > { %3105 = vmatmul.mubr.msk.f32.gmra.mrb[22].mxu0 %vm283_vm0, %v238_v18  ;;  %3153 = vmatmul.mubr.msk.f32.gmra.mrb[22].mxu1 %vm283_vm0, %v270_v20  ;;  %v204_v18 = vld [vmem:[%s5906_s1 + $0x100] sm:$0xff] }
  0x55   : > { %3107 = vmatprep.mubr.msk.f32.mxu0 %vm283_vm0, %v239_v19  ;;  %3155 = vmatprep.mubr.msk.f32.mxu1 %vm283_vm0, %v271_v21  ;;  %v205_v19 = vld [vmem:[%s5906_s1 + $0x108] sm:$0xff] }
  0x58   : > { %3108 = vmatmul.mubr.msk.f32.gmra.mrb[24].mxu0 %vm283_vm0, %v240_v22  ;;  %3156 = vmatmul.mubr.msk.f32.gmra.mrb[24].mxu1 %vm283_vm0, %v272_v24 }
  0x59   : > { %3110 = vmatprep.mubr.msk.f32.mxu0 %vm283_vm0, %v241_v23  ;;  %3158 = vmatprep.mubr.msk.f32.mxu1 %vm283_vm0, %v273_v25 }
  0x5c   : > { %3111 = vmatmul.mubr.msk.f32.gmra.mrb[26].mxu0 %vm283_vm0, %v242_v26  ;;  %3159 = vmatmul.mubr.msk.f32.gmra.mrb[26].mxu1 %vm283_vm0, %v274_v28 }
  0x5d   : > { %3113 = vmatprep.mubr.msk.f32.mxu0 %vm283_vm0, %v243_v27  ;;  %3161 = vmatprep.mubr.msk.f32.mxu1 %vm283_vm0, %v275_v29  ;;  %v3487_v27 = vpack.c.bf16 %v205_v19, %v204_v18 }
  0x5f   : > { %3488 = vmatprep.subr.bf16.mxu0 %v3487_v27 }
  0x60   : > { %3114 = vmatmul.mubr.msk.f32.gmra.mrb[28].mxu0 %vm283_vm0, %v244_v30  ;;  %3162 = vmatmul.mubr.msk.f32.gmra.mrb[28].mxu1 %vm283_vm0, %v276_v32  ;;  %v207_v32 = vld [vmem:[%s5906_s1 + $0x118] sm:$0xff] }
  0x61   : > { %3116 = vmatprep.mubr.msk.f32.mxu0 %vm283_vm0, %v245_v31  ;;  %3164 = vmatprep.mubr.msk.f32.mxu1 %vm283_vm0, %v277_v33  ;;  %v206_v31 = vld [vmem:[%s5906_s1 + $0x110] sm:$0xff] }
  0x62   : > { %3490 = vmatpush3.bf16.msra.mxu0 %v3487_v27 }
  0x64   : > { %3117 = vmatmul.mubr.msk.f32.gmra.mrb[30].mxu0 %vm283_vm0, %v246_v34  ;;  %3165 = vmatmul.mubr.msk.f32.gmra.mrb[30].mxu1 %vm283_vm0, %v278_v35 }
  0xfb   : > { %v3073_v37 = vpop.f32.mrb[0].mxu0  ;;  %v3121_v40 = vpop.f32.mrb[0].mxu1 }
  0xfc   : > { %v548_v38 = vadd.f32 %v3073_v37, %v4280_v36  ;;  %v542_v39 = vpop.f32.mrb[1].mxu0  ;;  %v4285_v42 = vadd.f32 %v3121_v40, %v4280_v36  ;;  %v4287_v43 = vpop.f32.mrb[1].mxu1 }
  0xfd   : > { %v543_v41 = vadd.f32 %v4280_v36, %v542_v39 }
  0xfe   : > { %v862_v51 = vmax.f32 %v548_v38, 0.0 }
  0xff   : > { %v861_v47 = vmax.f32 %v543_v41, 0.0  ;;  %v3076_v48 = vpop.f32.mrb[2].mxu0  ;;  %v3124_v54 = vpop.f32.mrb[2].mxu1  ;;  %v3491_v41 = vpack.c.bf16 %v207_v32, %v206_v31 }
 0x100   : > { %v558_v52 = vadd.f32 %v3076_v48, %v4280_v36  ;;  %v552_v53 = vpop.f32.mrb[3].mxu0  ;;  %v4310_v59 = vadd.f32 %v3124_v54, %v4280_v36  ;;  %v712_v60 = vpop.f32.mrb[3].mxu1  ;;  %v209_v48 = vld [vmem:[%s5906_s1 + $0x128] sm:$0xff] }
 0x101   : > { %v553_v58 = vadd.f32 %v4280_v36, %v552_v53  ;;  %3199 = vmatprep.mubr.f32.mxu1 %v861_v47  ;;  %v4313_v61 = vadd.f32 %v4280_v36, %v712_v60  ;;  %v208_v47 = vld [vmem:[%s5906_s1 + $0x120] sm:$0xff]  ;;  %3492 = vmatprep.subr.bf16.mxu0 %v3491_v41 }
 0x102   : > { %3200 = vmatmul.mubr.f32.vlgmr.msra.gmra.mrb[32].mxu1 %v862_v51  ;;  %v864_v1 = vmax.f32 %v558_v52, 0.0  ;;  %v3495_v56 = vpack.c.bf16 %v209_v48, %v208_v47  ;;  %3494 = vmatpush3.bf16.msra.mxu0 %v3491_v41 }
 0x103   : > { %v863_v62 = vmax.f32 %v553_v58, 0.0  ;;  %v3079_v63 = vpop.f32.mrb[4].mxu0  ;;  %v3127_v4 = vpop.f32.mrb[4].mxu1 }
 0x104   : > { %v568_v2 = vadd.f32 %v3079_v63, %v4280_v36  ;;  %v562_v3 = vpop.f32.mrb[5].mxu0  ;;  %v4324_v8 = vadd.f32 %v3127_v4, %v4280_v36  ;;  %v722_v9 = vpop.f32.mrb[5].mxu1  ;;  %v211_v63 = vld [vmem:[%s5906_s1 + $0x138] sm:$0xff]  ;;  %3496 = vmatprep.subr.bf16.mxu0 %v3495_v56 }
 0x105   : > { %v563_v7 = vadd.f32 %v4280_v36, %v562_v3  ;;  %3202 = vmatprep.mubr.f32.mxu1 %v863_v62  ;;  %v4327_v11 = vadd.f32 %v4280_v36, %v722_v9  ;;  %v210_v62 = vld [vmem:[%s5906_s1 + $0x130] sm:$0xff] }
 0x106   : > { %v866_v10 = vmax.f32 %v568_v2, 0.0  ;;  %3203 = vmatmul.mubr.f32.gmra.mrb[34].mxu1 %v864_v1  ;;  %3498 = vmatpush3.bf16.msra.mxu0 %v3495_v56 }
 0x107   : > { %v865_v12 = vmax.f32 %v563_v7, 0.0  ;;  %v3082_v13 = vpop.f32.mrb[6].mxu0  ;;  %v3130_v17 = vpop.f32.mrb[6].mxu1  ;;  %v3499_v7 = vpack.c.bf16 %v211_v63, %v210_v62 }
 0x108   : > { %v578_v15 = vadd.f32 %v3082_v13, %v4280_v36  ;;  %v572_v16 = vpop.f32.mrb[7].mxu0  ;;  %v4338_v21 = vadd.f32 %v3130_v17, %v4280_v36  ;;  %v732_v22 = vpop.f32.mrb[7].mxu1 }
 0x109   : > { %v573_v20 = vadd.f32 %v4280_v36, %v572_v16  ;;  %3205 = vmatprep.mubr.f32.mxu1 %v865_v12  ;;  %v4341_v24 = vadd.f32 %v4280_v36, %v732_v22  ;;  %3500 = vmatprep.subr.bf16.mxu0 %v3499_v7 }
 0x10a   : > { %v868_v23 = vmax.f32 %v578_v15, 0.0  ;;  %3206 = vmatmul.mubr.f32.gmra.mrb[36].mxu1 %v866_v10  ;;  %3502 = vmatpush3.bf16.msra.mxu0 %v3499_v7 }
 0x10b   : > { %v867_v25 = vmax.f32 %v573_v20, 0.0  ;;  %v3085_v26 = vpop.f32.mrb[8].mxu0  ;;  %v3133_v30 = vpop.f32.mrb[8].mxu1 }
 0x10c   : > { %v588_v28 = vadd.f32 %v3085_v26, %v4280_v36  ;;  %v582_v29 = vpop.f32.mrb[9].mxu0  ;;  %v4352_v34 = vadd.f32 %v3133_v30, %v4280_v36  ;;  %v742_v35 = vpop.f32.mrb[9].mxu1 }
 0x10d   : > { %v583_v33 = vadd.f32 %v4280_v36, %v582_v29  ;;  %3208 = vmatprep.mubr.f32.mxu1 %v867_v25  ;;  %v4355_v38 = vadd.f32 %v4280_v36, %v742_v35 }
 0x10e   : > { %v870_v37 = vmax.f32 %v588_v28, 0.0  ;;  %3209 = vmatmul.mubr.f32.gmra.mrb[38].mxu1 %v868_v23 }
 0x10f   : > { %v869_v39 = vmax.f32 %v583_v33, 0.0  ;;  %v3088_v40 = vpop.f32.mrb[10].mxu0  ;;  %v3136_v46 = vpop.f32.mrb[10].mxu1 }
 0x110   : > { %v598_v44 = vadd.f32 %v3088_v40, %v4280_v36  ;;  %v592_v45 = vpop.f32.mrb[11].mxu0  ;;  %v4366_v50 = vadd.f32 %v3136_v46, %v4280_v36  ;;  %v752_v51 = vpop.f32.mrb[11].mxu1 }
 0x111   : > { %v593_v49 = vadd.f32 %v4280_v36, %v592_v45  ;;  %3211 = vmatprep.mubr.f32.mxu1 %v869_v39  ;;  %v4369_v53 = vadd.f32 %v4280_v36, %v752_v51 }
 0x112   : > { %v872_v52 = vmax.f32 %v598_v44, 0.0  ;;  %3212 = vmatmul.mubr.f32.gmra.mrb[40].mxu1 %v870_v37 }
 0x113   : > { %v871_v54 = vmax.f32 %v593_v49, 0.0  ;;  %v3091_v55 = vpop.f32.mrb[12].mxu0  ;;  %v3139_v60 = vpop.f32.mrb[12].mxu1 }
 0x114   : > { %v608_v57 = vadd.f32 %v3091_v55, %v4280_v36  ;;  %v602_v58 = vpop.f32.mrb[13].mxu0  ;;  %v4380_v1 = vadd.f32 %v3139_v60, %v4280_v36  ;;  %v762_v2 = vpop.f32.mrb[13].mxu1 }
 0x115   : > { %v603_v0 = vadd.f32 %v4280_v36, %v602_v58  ;;  %3214 = vmatprep.mubr.f32.mxu1 %v871_v54  ;;  %v4383_v4 = vadd.f32 %v4280_v36, %v762_v2 }
 0x116   : > { %v874_v3 = vmax.f32 %v608_v57, 0.0  ;;  %3215 = vmatmul.mubr.f32.gmra.mrb[42].mxu1 %v872_v52 }
 0x117   : > { %v873_v5 = vmax.f32 %v603_v0, 0.0  ;;  %v3094_v6 = vpop.f32.mrb[14].mxu0  ;;  %v3142_v12 = vpop.f32.mrb[14].mxu1 }
 0x118   : > { %v618_v9 = vadd.f32 %v3094_v6, %v4280_v36  ;;  %v612_v10 = vpop.f32.mrb[15].mxu0  ;;  %v4388_v14 = vadd.f32 %v3142_v12, %v4280_v36  ;;  %v772_v15 = vpop.f32.mrb[15].mxu1 }
 0x119   : > { %v613_v13 = vadd.f32 %v4280_v36, %v612_v10  ;;  %3217 = vmatprep.mubr.f32.mxu1 %v873_v5  ;;  %v4391_v17 = vadd.f32 %v4280_v36, %v772_v15 }
 0x11a   : > { %v876_v16 = vmax.f32 %v618_v9, 0.0  ;;  %3218 = vmatmul.mubr.f32.gmra.mrb[44].mxu1 %v874_v3 }
 0x11b   : > { %v875_v18 = vmax.f32 %v613_v13, 0.0  ;;  %v3097_v19 = vpop.f32.mrb[16].mxu0  ;;  %v3145_v23 = vpop.f32.mrb[16].mxu1 }
 0x11c   : > { %v628_v20 = vadd.f32 %v3097_v19, %v4280_v36  ;;  %v622_v22 = vpop.f32.mrb[17].mxu0  ;;  %v4396_v26 = vadd.f32 %v3145_v23, %v4280_v36  ;;  %v782_v27 = vpop.f32.mrb[17].mxu1 }
 0x11d   : > { %v623_v25 = vadd.f32 %v4280_v36, %v622_v22  ;;  %3220 = vmatprep.mubr.f32.mxu1 %v875_v18  ;;  %v4399_v29 = vadd.f32 %v4280_v36, %v782_v27 }
 0x11e   : > { %v878_v28 = vmax.f32 %v628_v20, 0.0  ;;  %3221 = vmatmul.mubr.f32.gmra.mrb[46].mxu1 %v876_v16 }
 0x11f   : > { %v877_v30 = vmax.f32 %v623_v25, 0.0  ;;  %v3100_v31 = vpop.f32.mrb[18].mxu0  ;;  %v3148_v35 = vpop.f32.mrb[18].mxu1 }
 0x120   : > { %v638_v32 = vadd.f32 %v3100_v31, %v4280_v36  ;;  %v632_v33 = vpop.f32.mrb[19].mxu0  ;;  %v4404_v39 = vadd.f32 %v3148_v35, %v4280_v36  ;;  %v792_v40 = vpop.f32.mrb[19].mxu1 }
 0x121   : > { %v633_v37 = vadd.f32 %v4280_v36, %v632_v33  ;;  %3223 = vmatprep.mubr.f32.mxu1 %v877_v30  ;;  %v4407_v44 = vadd.f32 %v4280_v36, %v792_v40 }
 0x122   : > { %v880_v41 = vmax.f32 %v638_v32, 0.0  ;;  %3224 = vmatmul.mubr.f32.gmra.mrb[48].mxu1 %v878_v28 }
 0x123   : > { %v879_v45 = vmax.f32 %v633_v37, 0.0  ;;  %v3103_v46 = vpop.f32.mrb[20].mxu0  ;;  %v3151_v49 = vpop.f32.mrb[20].mxu1 }
 0x124   : > { %v648_v47 = vadd.f32 %v3103_v46, %v4280_v36  ;;  %v642_v48 = vpop.f32.mrb[21].mxu0  ;;  %v4412_v52 = vadd.f32 %v3151_v49, %v4280_v36  ;;  %v802_v54 = vpop.f32.mrb[21].mxu1 }
 0x125   : > { %v643_v51 = vadd.f32 %v4280_v36, %v642_v48  ;;  %3226 = vmatprep.mubr.f32.mxu1 %v879_v45  ;;  %v4415_v56 = vadd.f32 %v4280_v36, %v802_v54 }
 0x126   : > { %v882_v55 = vmax.f32 %v648_v47, 0.0  ;;  %3227 = vmatmul.mubr.f32.gmra.mrb[50].mxu1 %v880_v41 }
 0x127   : > { %v881_v57 = vmax.f32 %v643_v51, 0.0  ;;  %v3106_v58 = vpop.f32.mrb[22].mxu0  ;;  %v3154_v63 = vpop.f32.mrb[22].mxu1 }
 0x128   : > { %v658_v60 = vadd.f32 %v3106_v58, %v4280_v36  ;;  %v652_v62 = vpop.f32.mrb[23].mxu0  ;;  %v4420_v2 = vadd.f32 %v3154_v63, %v4280_v36  ;;  %v812_v3 = vpop.f32.mrb[23].mxu1  ;;  %v703_v58 = vadd.f32 %v4280_v36, %v4287_v43  ;;  %v894_v43 = vmax.f32 %v4285_v42, 0.0 }
 0x129   : > { %v653_v0 = vadd.f32 %v4280_v36, %v652_v62  ;;  %3229 = vmatprep.mubr.f32.mxu1 %v881_v57  ;;  %v4423_v6 = vadd.f32 %v4280_v36, %v812_v3  ;;  %v901_v42 = vmax.f32 %v4355_v38, 0.0  ;;  %v908_v38 = vmax.f32 %v4388_v14, 0.0 }
 0x12a   : > { %v884_v5 = vmax.f32 %v658_v60, 0.0  ;;  %3230 = vmatmul.mubr.f32.gmra.mrb[52].mxu1 %v882_v55 }
 0x12b   : > { %v883_v7 = vmax.f32 %v653_v0, 0.0  ;;  %v3109_v9 = vpop.f32.mrb[24].mxu0  ;;  %v3157_v13 = vpop.f32.mrb[24].mxu1  ;;  %v915_v14 = vmax.f32 %v4423_v6, 0.0 }
 0x12c   : > { %v668_v10 = vadd.f32 %v3109_v9, %v4280_v36  ;;  %v662_v12 = vpop.f32.mrb[25].mxu0  ;;  %v4428_v16 = vadd.f32 %v3157_v13, %v4280_v36  ;;  %v822_v18 = vpop.f32.mrb[25].mxu1  ;;  %v895_v13 = vmax.f32 %v4313_v61, 0.0  ;;  %v902_v61 = vmax.f32 %v4352_v34, 0.0 }
 0x12d   : > { %v663_v15 = vadd.f32 %v4280_v36, %v662_v12  ;;  %3232 = vmatprep.mubr.f32.mxu1 %v883_v7  ;;  %v4431_v20 = vadd.f32 %v4280_v36, %v822_v18  ;;  %v893_v12 = vmax.f32 %v703_v58, 0.0  ;;  %v897_v18 = vmax.f32 %v4327_v11, 0.0 }
 0x12e   : > { %v886_v19 = vmax.f32 %v668_v10, 0.0  ;;  %3233 = vmatmul.mubr.f32.gmra.mrb[54].mxu1 %v884_v5  ;;  %v904_v11 = vmax.f32 %v4366_v50, 0.0  ;;  %v909_v34 = vmax.f32 %v4399_v29, 0.0  ;;  %v911_v50 = vmax.f32 %v4407_v44, 0.0 }
 0x12f   : > { %v885_v22 = vmax.f32 %v663_v15, 0.0  ;;  %v3112_v23 = vpop.f32.mrb[26].mxu0  ;;  %v3160_v28 = vpop.f32.mrb[26].mxu1  ;;  %v896_v15 = vmax.f32 %v4310_v59, 0.0  ;;  %v903_v59 = vmax.f32 %v4369_v53, 0.0  ;;  %v910_v53 = vmax.f32 %v4396_v26, 0.0 }
 0x130   : > { %v678_v25 = vadd.f32 %v3112_v23, %v4280_v36  ;;  %v672_v27 = vpop.f32.mrb[27].mxu0  ;;  %v4436_v31 = vadd.f32 %v3160_v28, %v4280_v36  ;;  %v832_v32 = vpop.f32.mrb[27].mxu1  ;;  %v916_v29 = vmax.f32 %v4420_v2, 0.0  ;;  %v917_v26 = vmax.f32 %v4431_v20, 0.0 }
 0x131   : > { %v673_v30 = vadd.f32 %v4280_v36, %v672_v27  ;;  %3235 = vmatprep.mubr.f32.mxu1 %v885_v22  ;;  %v4439_v35 = vadd.f32 %v4280_v36, %v832_v32  ;;  %v900_v22 = vmax.f32 %v4338_v21, 0.0  ;;  %v907_v21 = vmax.f32 %v4391_v17, 0.0 }
 0x132   : > { %v888_v33 = vmax.f32 %v678_v25, 0.0  ;;  %3236 = vmatmul.mubr.f32.gmra.mrb[56].mxu1 %v886_v19  ;;  %v898_v19 = vmax.f32 %v4324_v8, 0.0  ;;  %v905_v8 = vmax.f32 %v4383_v4, 0.0  ;;  %v912_v4 = vmax.f32 %v4404_v39, 0.0 }
 0x133   : > { %v887_v37 = vmax.f32 %v673_v30, 0.0  ;;  %v3115_v40 = vpop.f32.mrb[28].mxu0  ;;  %v3163_v46 = vpop.f32.mrb[28].mxu1  ;;  %v914_v17 = vmax.f32 %v4412_v52, 0.0  ;;  %v918_v44 = vmax.f32 %v4428_v16, 0.0  ;;  %v919_v39 = vmax.f32 %v4439_v35, 0.0 }
 0x134   : > { %v688_v41 = vadd.f32 %v3115_v40, %v4280_v36  ;;  %v682_v45 = vpop.f32.mrb[29].mxu0  ;;  %v4444_v48 = vadd.f32 %v3163_v46, %v4280_v36  ;;  %v842_v49 = vpop.f32.mrb[29].mxu1  ;;  %v4493_v16 = vld [vmem:[%s5907_s2 + $0x1] ss:$0 sm:$0xff] }
 0x135   : > { %v683_v47 = vadd.f32 %v4280_v36, %v682_v45  ;;  %3238 = vmatprep.mubr.f32.mxu1 %v887_v37  ;;  %v4447_v54 = vadd.f32 %v4280_v36, %v842_v49 }
 0x136   : > { %v890_v51 = vmax.f32 %v688_v41, 0.0  ;;  %3239 = vmatmul.mubr.f32.gmra.mrb[58].mxu1 %v888_v33  ;;  %v922_v6 = vmax.f32 %v4444_v48, 0.0 }
 0x137   : > { %v889_v55 = vmax.f32 %v683_v47, 0.0  ;;  %v3118_v57 = vpop.f32.mrb[30].mxu0  ;;  %v3166_v63 = vpop.f32.mrb[30].mxu1  ;;  %v921_v52 = vmax.f32 %v4447_v54, 0.0 }
 0x138   : > { %v698_v60 = vadd.f32 %v3118_v57, %v4280_v36  ;;  %v692_v62 = vpop.f32.mrb[31].mxu0  ;;  %v4454_v3 = vadd.f32 %v3166_v63, %v4280_v36  ;;  %v852_v5 = vpop.f32.mrb[31].mxu1 }
 0x139   : > { %v693_v0 = vadd.f32 %v4280_v36, %v692_v62  ;;  %3241 = vmatprep.mubr.f32.mxu1 %v889_v55  ;;  %v4457_v9 = vadd.f32 %v4280_v36, %v852_v5  ;;  %v899_v36 = vmax.f32 %v4341_v24, 0.0  ;;  %v906_v24 = vmax.f32 %v4380_v1, 0.0 }
 0x13a   : > { %v892_v7 = vmax.f32 %v698_v60, 0.0  ;;  %3242 = vmatmul.mubr.f32.gmra.mrb[60].mxu1 %v890_v51  ;;  %v913_v1 = vmax.f32 %v4415_v56, 0.0  ;;  %v920_v56 = vmax.f32 %v4436_v31, 0.0  ;;  %v924_v20 = vmax.f32 %v4454_v3, 0.0 }
 0x13b   : > { %v891_v10 = vmax.f32 %v693_v0, 0.0  ;;  %v923_v2 = vmax.f32 %v4457_v9, 0.0 }
 0x13d   : > { %3244 = vmatprep.mubr.f32.mxu1 %v891_v10 }
 0x13e   : > { %3245 = vmatmul.mubr.f32.gmra.mrb[62].mxu1 %v892_v7 }
 0x13f   : > { %3247 = vmatprep.mubr.f32.mxu1 %v893_v12 }
 0x142   : > { %3248 = vmatmul.mubr.f32.gmra.mrb[64].mxu1 %v894_v43 }
 0x143   : > { %3250 = vmatprep.mubr.f32.mxu1 %v895_v13 }
 0x146   : > { %3251 = vmatmul.mubr.f32.gmra.mrb[66].mxu1 %v896_v15 }
 0x147   : > { %3253 = vmatprep.mubr.f32.mxu1 %v897_v18 }
 0x14a   : > { %3254 = vmatmul.mubr.f32.gmra.mrb[68].mxu1 %v898_v19 }
 0x14b   : > { %3256 = vmatprep.mubr.f32.mxu1 %v899_v36 }
 0x14e   : > { %3257 = vmatmul.mubr.f32.gmra.mrb[70].mxu1 %v900_v22 }
 0x14f   : > { %3259 = vmatprep.mubr.f32.mxu1 %v901_v42 }
 0x152   : > { %3260 = vmatmul.mubr.f32.gmra.mrb[72].mxu1 %v902_v61 }
 0x153   : > { %3262 = vmatprep.mubr.f32.mxu1 %v903_v59 }
 0x156   : > { %3263 = vmatmul.mubr.f32.gmra.mrb[74].mxu1 %v904_v11 }
 0x157   : > { %3265 = vmatprep.mubr.f32.mxu1 %v905_v8 }
 0x15a   : > { %3266 = vmatmul.mubr.f32.gmra.mrb[76].mxu1 %v906_v24 }
 0x15b   : > { %3268 = vmatprep.mubr.f32.mxu1 %v907_v21 }
 0x15e   : > { %3269 = vmatmul.mubr.f32.gmra.mrb[78].mxu1 %v908_v38 }
 0x15f   : > { %3271 = vmatprep.mubr.f32.mxu1 %v909_v34 }
 0x162   : > { %3272 = vmatmul.mubr.f32.gmra.mrb[80].mxu1 %v910_v53 }
 0x163   : > { %3274 = vmatprep.mubr.f32.mxu1 %v911_v50 }
 0x166   : > { %3275 = vmatmul.mubr.f32.gmra.mrb[82].mxu1 %v912_v4 }
 0x167   : > { %3277 = vmatprep.mubr.f32.mxu1 %v913_v1 }
 0x16a   : > { %3278 = vmatmul.mubr.f32.gmra.mrb[84].mxu1 %v914_v17 }
 0x16b   : > { %3280 = vmatprep.mubr.f32.mxu1 %v915_v14 }
 0x16e   : > { %3281 = vmatmul.mubr.f32.gmra.mrb[86].mxu1 %v916_v29 }
 0x16f   : > { %3283 = vmatprep.mubr.f32.mxu1 %v917_v26 }
 0x172   : > { %3284 = vmatmul.mubr.f32.gmra.mrb[88].mxu1 %v918_v44 }
 0x173   : > { %3286 = vmatprep.mubr.f32.mxu1 %v919_v39 }
 0x176   : > { %3287 = vmatmul.mubr.f32.gmra.mrb[90].mxu1 %v920_v56 }
 0x177   : > { %3289 = vmatprep.mubr.f32.mxu1 %v921_v52 }
 0x17a   : > { %3290 = vmatmul.mubr.f32.gmra.mrb[92].mxu1 %v922_v6 }
 0x17b   : > { %3292 = vmatprep.mubr.f32.mxu1 %v923_v2 }
 0x17e   : > { %3293 = vmatmul.mubr.f32.gmra.mrb[94].mxu1 %v924_v20 }
 0x1d5   : > { %v3201_v23 = vpop.f32.mrb[32].mxu1 }
 0x1d6   : > { %v1001_v25 = vadd.f32 %v3201_v23, %v4493_v16  ;;  %v995_v27 = vpop.f32.mrb[33].mxu1 }
 0x1d7   : > { %v996_v28 = vadd.f32 %v4493_v16, %v995_v27 }
 0x1d8   : > { %v1315_v32 = vmax.f32 %v1001_v25, 0.0 }
 0x1d9   : > { %v1314_v30 = vmax.f32 %v996_v28, 0.0  ;;  %v3204_v31 = vpop.f32.mrb[34].mxu1 }
 0x1da   : > { %v1011_v33 = vadd.f32 %v3204_v31, %v4493_v16  ;;  %v1005_v35 = vpop.f32.mrb[35].mxu1 }
 0x1db   : > { %v1006_v37 = vadd.f32 %v4493_v16, %v1005_v35  ;;  %3327 = vmatprep.mubr.f32.mxu0 %v1314_v30 }
 0x1dc   : > { %3328 = vmatmul.mubr.f32.vlgmr.msra.gmra.mrb[32].mxu0 %v1315_v32  ;;  %v1317_v45 = vmax.f32 %v1011_v33, 0.0 }
 0x1dd   : > { %v1316_v40 = vmax.f32 %v1006_v37, 0.0  ;;  %v3207_v41 = vpop.f32.mrb[36].mxu1 }
 0x1de   : > { %v1021_v46 = vadd.f32 %v3207_v41, %v4493_v16  ;;  %v1015_v47 = vpop.f32.mrb[37].mxu1 }
 0x1df   : > { %v1016_v48 = vadd.f32 %v4493_v16, %v1015_v47  ;;  %3330 = vmatprep.mubr.f32.mxu0 %v1316_v40 }
 0x1e0   : > { %v1319_v49 = vmax.f32 %v1021_v46, 0.0  ;;  %3331 = vmatmul.mubr.f32.gmra.mrb[34].mxu0 %v1317_v45 }
 0x1e1   : > { %v1318_v51 = vmax.f32 %v1016_v48, 0.0  ;;  %v3210_v54 = vpop.f32.mrb[38].mxu1 }
 0x1e2   : > { %v1031_v55 = vadd.f32 %v3210_v54, %v4493_v16  ;;  %v1025_v57 = vpop.f32.mrb[39].mxu1 }
 0x1e3   : > { %v1026_v58 = vadd.f32 %v4493_v16, %v1025_v57  ;;  %3333 = vmatprep.mubr.f32.mxu0 %v1318_v51 }
 0x1e4   : > { %v1321_v60 = vmax.f32 %v1031_v55, 0.0  ;;  %3334 = vmatmul.mubr.f32.gmra.mrb[36].mxu0 %v1319_v49 }
 0x1e5   : > { %v1320_v62 = vmax.f32 %v1026_v58, 0.0  ;;  %v3213_v63 = vpop.f32.mrb[40].mxu1 }
 0x1e6   : > { %v1041_v0 = vadd.f32 %v3213_v63, %v4493_v16  ;;  %v1035_v3 = vpop.f32.mrb[41].mxu1 }
 0x1e7   : > { %v1036_v5 = vadd.f32 %v4493_v16, %v1035_v3  ;;  %3336 = vmatprep.mubr.f32.mxu0 %v1320_v62 }
 0x1e8   : > { %v1323_v7 = vmax.f32 %v1041_v0, 0.0  ;;  %3337 = vmatmul.mubr.f32.gmra.mrb[38].mxu0 %v1321_v60 }
 0x1e9   : > { %v1322_v9 = vmax.f32 %v1036_v5, 0.0  ;;  %v3216_v10 = vpop.f32.mrb[42].mxu1 }
 0x1ea   : > { %v1051_v12 = vadd.f32 %v3216_v10, %v4493_v16  ;;  %v1045_v43 = vpop.f32.mrb[43].mxu1 }
 0x1eb   : > { %v1046_v13 = vadd.f32 %v4493_v16, %v1045_v43  ;;  %3339 = vmatprep.mubr.f32.mxu0 %v1322_v9 }
 0x1ec   : > { %v1325_v15 = vmax.f32 %v1051_v12, 0.0  ;;  %3340 = vmatmul.mubr.f32.gmra.mrb[40].mxu0 %v1323_v7 }
 0x1ed   : > { %v1324_v18 = vmax.f32 %v1046_v13, 0.0  ;;  %v3219_v19 = vpop.f32.mrb[44].mxu1 }
 0x1ee   : > { %v1061_v36 = vadd.f32 %v3219_v19, %v4493_v16  ;;  %v1055_v22 = vpop.f32.mrb[45].mxu1 }
 0x1ef   : > { %v1056_v42 = vadd.f32 %v4493_v16, %v1055_v22  ;;  %3342 = vmatprep.mubr.f32.mxu0 %v1324_v18 }
 0x1f0   : > { %v1327_v61 = vmax.f32 %v1061_v36, 0.0  ;;  %3343 = vmatmul.mubr.f32.gmra.mrb[42].mxu0 %v1325_v15 }
 0x1f1   : > { %v1326_v59 = vmax.f32 %v1056_v42, 0.0  ;;  %v3222_v11 = vpop.f32.mrb[46].mxu1 }
 0x1f2   : > { %v1071_v8 = vadd.f32 %v3222_v11, %v4493_v16  ;;  %v1065_v24 = vpop.f32.mrb[47].mxu1 }
 0x1f3   : > { %v1066_v21 = vadd.f32 %v4493_v16, %v1065_v24  ;;  %3345 = vmatprep.mubr.f32.mxu0 %v1326_v59 }
 0x1f4   : > { %v1329_v38 = vmax.f32 %v1071_v8, 0.0  ;;  %3346 = vmatmul.mubr.f32.gmra.mrb[44].mxu0 %v1327_v61 }
 0x1f5   : > { %v1328_v34 = vmax.f32 %v1066_v21, 0.0  ;;  %v3225_v53 = vpop.f32.mrb[48].mxu1 }
 0x1f6   : > { %v1081_v50 = vadd.f32 %v3225_v53, %v4493_v16  ;;  %v1075_v4 = vpop.f32.mrb[49].mxu1 }
 0x1f7   : > { %v1076_v1 = vadd.f32 %v4493_v16, %v1075_v4  ;;  %3348 = vmatprep.mubr.f32.mxu0 %v1328_v34 }
 0x1f8   : > { %v1331_v17 = vmax.f32 %v1081_v50, 0.0  ;;  %3349 = vmatmul.mubr.f32.gmra.mrb[46].mxu0 %v1329_v38 }
 0x1f9   : > { %v1330_v14 = vmax.f32 %v1076_v1, 0.0  ;;  %v3228_v29 = vpop.f32.mrb[50].mxu1 }
 0x1fa   : > { %v1091_v26 = vadd.f32 %v3228_v29, %v4493_v16  ;;  %v1085_v44 = vpop.f32.mrb[51].mxu1 }
 0x1fb   : > { %v1086_v39 = vadd.f32 %v4493_v16, %v1085_v44  ;;  %3351 = vmatprep.mubr.f32.mxu0 %v1330_v14 }
 0x1fc   : > { %v1333_v56 = vmax.f32 %v1091_v26, 0.0  ;;  %3352 = vmatmul.mubr.f32.gmra.mrb[48].mxu0 %v1331_v17 }
 0x1fd   : > { %v1332_v52 = vmax.f32 %v1086_v39, 0.0  ;;  %v3231_v6 = vpop.f32.mrb[52].mxu1 }
 0x1fe   : > { %v1101_v2 = vadd.f32 %v3231_v6, %v4493_v16  ;;  %v1095_v20 = vpop.f32.mrb[53].mxu1 }
 0x1ff   : > { %v1096_v23 = vadd.f32 %v4493_v16, %v1095_v20  ;;  %3354 = vmatprep.mubr.f32.mxu0 %v1332_v52 }
 0x200   : > { %v1335_v25 = vmax.f32 %v1101_v2, 0.0  ;;  %3355 = vmatmul.mubr.f32.gmra.mrb[50].mxu0 %v1333_v56 }
 0x201   : > { %v1334_v27 = vmax.f32 %v1096_v23, 0.0  ;;  %v3234_v28 = vpop.f32.mrb[54].mxu1 }
 0x202   : > { %v1111_v30 = vadd.f32 %v3234_v28, %v4493_v16  ;;  %v1105_v31 = vpop.f32.mrb[55].mxu1 }
 0x203   : > { %v1106_v32 = vadd.f32 %v4493_v16, %v1105_v31  ;;  %3357 = vmatprep.mubr.f32.mxu0 %v1334_v27 }
 0x204   : > { %v1337_v33 = vmax.f32 %v1111_v30, 0.0  ;;  %3358 = vmatmul.mubr.f32.gmra.mrb[52].mxu0 %v1335_v25 }
 0x205   : > { %v1336_v35 = vmax.f32 %v1106_v32, 0.0  ;;  %v3237_v37 = vpop.f32.mrb[56].mxu1 }
 0x206   : > { %v1121_v40 = vadd.f32 %v3237_v37, %v4493_v16  ;;  %v1115_v41 = vpop.f32.mrb[57].mxu1 }
 0x207   : > { %v1116_v45 = vadd.f32 %v4493_v16, %v1115_v41  ;;  %3360 = vmatprep.mubr.f32.mxu0 %v1336_v35 }
 0x208   : > { %v1339_v46 = vmax.f32 %v1121_v40, 0.0  ;;  %3361 = vmatmul.mubr.f32.gmra.mrb[54].mxu0 %v1337_v33 }
 0x209   : > { %v1338_v47 = vmax.f32 %v1116_v45, 0.0  ;;  %v3240_v48 = vpop.f32.mrb[58].mxu1 }
 0x20a   : > { %v1131_v49 = vadd.f32 %v3240_v48, %v4493_v16  ;;  %v1125_v51 = vpop.f32.mrb[59].mxu1 }
 0x20b   : > { %v1126_v54 = vadd.f32 %v4493_v16, %v1125_v51  ;;  %3363 = vmatprep.mubr.f32.mxu0 %v1338_v47 }
 0x20c   : > { %v1341_v55 = vmax.f32 %v1131_v49, 0.0  ;;  %3364 = vmatmul.mubr.f32.gmra.mrb[56].mxu0 %v1339_v46 }
 0x20d   : > { %v1340_v57 = vmax.f32 %v1126_v54, 0.0  ;;  %v3243_v58 = vpop.f32.mrb[60].mxu1 }
 0x20e   : > { %v1141_v60 = vadd.f32 %v3243_v58, %v4493_v16  ;;  %v1135_v62 = vpop.f32.mrb[61].mxu1 }
 0x20f   : > { %v1136_v63 = vadd.f32 %v4493_v16, %v1135_v62  ;;  %3366 = vmatprep.mubr.f32.mxu0 %v1340_v57 }
 0x210   : > { %v1343_v0 = vmax.f32 %v1141_v60, 0.0  ;;  %3367 = vmatmul.mubr.f32.gmra.mrb[58].mxu0 %v1341_v55 }
 0x211   : > { %v1342_v3 = vmax.f32 %v1136_v63, 0.0  ;;  %v3246_v5 = vpop.f32.mrb[62].mxu1 }
 0x212   : > { %v1151_v7 = vadd.f32 %v3246_v5, %v4493_v16  ;;  %v1145_v9 = vpop.f32.mrb[63].mxu1 }
 0x213   : > { %v1146_v10 = vadd.f32 %v4493_v16, %v1145_v9  ;;  %3369 = vmatprep.mubr.f32.mxu0 %v1342_v3 }
 0x214   : > { %v1345_v12 = vmax.f32 %v1151_v7, 0.0  ;;  %3370 = vmatmul.mubr.f32.gmra.mrb[60].mxu0 %v1343_v0 }
 0x215   : > { %v1344_v43 = vmax.f32 %v1146_v10, 0.0  ;;  %v3249_v13 = vpop.f32.mrb[64].mxu1 }
 0x216   : > { %v1161_v15 = vadd.f32 %v3249_v13, %v4493_v16  ;;  %v1155_v18 = vpop.f32.mrb[65].mxu1 }
 0x217   : > { %v1156_v19 = vadd.f32 %v4493_v16, %v1155_v18  ;;  %3372 = vmatprep.mubr.f32.mxu0 %v1344_v43 }
 0x218   : > { %v1347_v36 = vmax.f32 %v1161_v15, 0.0  ;;  %3373 = vmatmul.mubr.f32.gmra.mrb[62].mxu0 %v1345_v12 }
 0x219   : > { %v1346_v22 = vmax.f32 %v1156_v19, 0.0  ;;  %v3252_v42 = vpop.f32.mrb[66].mxu1 }
 0x21a   : > { %v1171_v61 = vadd.f32 %v3252_v42, %v4493_v16  ;;  %v1165_v59 = vpop.f32.mrb[67].mxu1 }
 0x21b   : > { %v1166_v11 = vadd.f32 %v4493_v16, %v1165_v59  ;;  %3375 = vmatprep.mubr.f32.mxu0 %v1346_v22 }
 0x21c   : > { %v1349_v8 = vmax.f32 %v1171_v61, 0.0  ;;  %3376 = vmatmul.mubr.f32.gmra.mrb[64].mxu0 %v1347_v36 }
 0x21d   : > { %v1348_v24 = vmax.f32 %v1166_v11, 0.0  ;;  %v3255_v21 = vpop.f32.mrb[68].mxu1 }
 0x21e   : > { %v1181_v38 = vadd.f32 %v3255_v21, %v4493_v16  ;;  %v1175_v34 = vpop.f32.mrb[69].mxu1 }
 0x21f   : > { %v1176_v53 = vadd.f32 %v4493_v16, %v1175_v34  ;;  %3378 = vmatprep.mubr.f32.mxu0 %v1348_v24 }
 0x220   : > { %v1351_v50 = vmax.f32 %v1181_v38, 0.0  ;;  %3379 = vmatmul.mubr.f32.gmra.mrb[66].mxu0 %v1349_v8 }
 0x221   : > { %v1350_v4 = vmax.f32 %v1176_v53, 0.0  ;;  %v3258_v1 = vpop.f32.mrb[70].mxu1 }
 0x222   : > { %v1191_v17 = vadd.f32 %v3258_v1, %v4493_v16  ;;  %v1185_v14 = vpop.f32.mrb[71].mxu1 }
 0x223   : > { %v1186_v29 = vadd.f32 %v4493_v16, %v1185_v14  ;;  %3381 = vmatprep.mubr.f32.mxu0 %v1350_v4 }
 0x224   : > { %v1353_v26 = vmax.f32 %v1191_v17, 0.0  ;;  %3382 = vmatmul.mubr.f32.gmra.mrb[68].mxu0 %v1351_v50 }
 0x225   : > { %v1352_v44 = vmax.f32 %v1186_v29, 0.0  ;;  %v3261_v39 = vpop.f32.mrb[72].mxu1 }
 0x226   : > { %v1201_v56 = vadd.f32 %v3261_v39, %v4493_v16  ;;  %v1195_v52 = vpop.f32.mrb[73].mxu1 }
 0x227   : > { %v1196_v6 = vadd.f32 %v4493_v16, %v1195_v52  ;;  %3384 = vmatprep.mubr.f32.mxu0 %v1352_v44 }
 0x228   : > { %v1355_v2 = vmax.f32 %v1201_v56, 0.0  ;;  %3385 = vmatmul.mubr.f32.gmra.mrb[70].mxu0 %v1353_v26 }
 0x229   : > { %v1354_v20 = vmax.f32 %v1196_v6, 0.0  ;;  %v3264_v23 = vpop.f32.mrb[74].mxu1 }
 0x22a   : > { %v1211_v25 = vadd.f32 %v3264_v23, %v4493_v16  ;;  %v1205_v27 = vpop.f32.mrb[75].mxu1 }
 0x22b   : > { %v1206_v28 = vadd.f32 %v4493_v16, %v1205_v27  ;;  %3387 = vmatprep.mubr.f32.mxu0 %v1354_v20 }
 0x22c   : > { %v1357_v30 = vmax.f32 %v1211_v25, 0.0  ;;  %3388 = vmatmul.mubr.f32.gmra.mrb[72].mxu0 %v1355_v2 }
 0x22d   : > { %v1356_v31 = vmax.f32 %v1206_v28, 0.0  ;;  %v3267_v32 = vpop.f32.mrb[76].mxu1  ;;  %v1767_v28 = vlaneseq }
 0x22e   : > { %v1221_v33 = vadd.f32 %v3267_v32, %v4493_v16  ;;  %v1215_v35 = vpop.f32.mrb[77].mxu1 }
 0x22f   : > { %v1216_v37 = vadd.f32 %v4493_v16, %v1215_v35  ;;  %3390 = vmatprep.mubr.f32.mxu0 %v1356_v31  ;;  %v4564_v31 = vld [vmem:[%s5907_s2 + $0x2] ss:$0 sm:$0xff] }
 0x230   : > { %v1359_v40 = vmax.f32 %v1221_v33, 0.0  ;;  %3391 = vmatmul.mubr.f32.gmra.mrb[74].mxu0 %v1357_v30  ;;  %v4559_v30 = vand.u32 127, %v1767_v28 }
 0x231   : > { %v1358_v41 = vmax.f32 %v1216_v37, 0.0  ;;  %v3270_v45 = vpop.f32.mrb[78].mxu1 }
 0x232   : > { %v1231_v46 = vadd.f32 %v3270_v45, %v4493_v16  ;;  %v1225_v47 = vpop.f32.mrb[79].mxu1  ;;  %6005 = vst [vmem:[#allocation5_spill] sm:$0xff] %v4559_v30  ;;  %vm1769_vm1 = vcmp.lt.s32.totalorder %v4559_v30, 8 }
 0x233   : > { %v1226_v48 = vadd.f32 %v4493_v16, %v1225_v47  ;;  %3393 = vmatprep.mubr.f32.mxu0 %v1358_v41 }
 0x234   : > { %v1361_v49 = vmax.f32 %v1231_v46, 0.0  ;;  %3394 = vmatmul.mubr.f32.gmra.mrb[76].mxu0 %v1359_v40 }
 0x235   : > { %v1360_v51 = vmax.f32 %v1226_v48, 0.0  ;;  %v3273_v54 = vpop.f32.mrb[80].mxu1 }
 0x236   : > { %v1241_v55 = vadd.f32 %v3273_v54, %v4493_v16  ;;  %v1235_v57 = vpop.f32.mrb[81].mxu1 }
 0x237   : > { %v1236_v58 = vadd.f32 %v4493_v16, %v1235_v57  ;;  %3396 = vmatprep.mubr.f32.mxu0 %v1360_v51 }
 0x238   : > { %v1363_v60 = vmax.f32 %v1241_v55, 0.0  ;;  %3397 = vmatmul.mubr.f32.gmra.mrb[78].mxu0 %v1361_v49 }
 0x239   : > { %v1362_v62 = vmax.f32 %v1236_v58, 0.0  ;;  %v3276_v63 = vpop.f32.mrb[82].mxu1 }
 0x23a   : > { %v1251_v0 = vadd.f32 %v3276_v63, %v4493_v16  ;;  %v1245_v3 = vpop.f32.mrb[83].mxu1 }
 0x23b   : > { %v1246_v5 = vadd.f32 %v4493_v16, %v1245_v3  ;;  %3399 = vmatprep.mubr.f32.mxu0 %v1362_v62 }
 0x23c   : > { %v1365_v7 = vmax.f32 %v1251_v0, 0.0  ;;  %3400 = vmatmul.mubr.f32.gmra.mrb[80].mxu0 %v1363_v60 }
 0x23d   : > { %v1364_v9 = vmax.f32 %v1246_v5, 0.0  ;;  %v3279_v10 = vpop.f32.mrb[84].mxu1 }
 0x23e   : > { %v1261_v12 = vadd.f32 %v3279_v10, %v4493_v16  ;;  %v1255_v43 = vpop.f32.mrb[85].mxu1 }
 0x23f   : > { %v1256_v13 = vadd.f32 %v4493_v16, %v1255_v43  ;;  %3402 = vmatprep.mubr.f32.mxu0 %v1364_v9 }
 0x240   : > { %v1367_v15 = vmax.f32 %v1261_v12, 0.0  ;;  %3403 = vmatmul.mubr.f32.gmra.mrb[82].mxu0 %v1365_v7 }
 0x241   : > { %v1366_v18 = vmax.f32 %v1256_v13, 0.0  ;;  %v3282_v19 = vpop.f32.mrb[86].mxu1 }
 0x242   : > { %v1271_v36 = vadd.f32 %v3282_v19, %v4493_v16  ;;  %v1265_v22 = vpop.f32.mrb[87].mxu1 }
 0x243   : > { %v1266_v42 = vadd.f32 %v4493_v16, %v1265_v22  ;;  %3405 = vmatprep.mubr.f32.mxu0 %v1366_v18 }
 0x244   : > { %v1369_v61 = vmax.f32 %v1271_v36, 0.0  ;;  %3406 = vmatmul.mubr.f32.gmra.mrb[84].mxu0 %v1367_v15 }
 0x245   : > { %v1368_v59 = vmax.f32 %v1266_v42, 0.0  ;;  %v3285_v11 = vpop.f32.mrb[88].mxu1 }
 0x246   : > { %v1281_v8 = vadd.f32 %v3285_v11, %v4493_v16  ;;  %v1275_v24 = vpop.f32.mrb[89].mxu1 }
 0x247   : > { %v1276_v21 = vadd.f32 %v4493_v16, %v1275_v24  ;;  %3408 = vmatprep.mubr.f32.mxu0 %v1368_v59 }
 0x248   : > { %v1371_v38 = vmax.f32 %v1281_v8, 0.0  ;;  %3409 = vmatmul.mubr.f32.gmra.mrb[86].mxu0 %v1369_v61 }
 0x249   : > { %v1370_v34 = vmax.f32 %v1276_v21, 0.0  ;;  %v3288_v53 = vpop.f32.mrb[90].mxu1 }
 0x24a   : > { %v1291_v50 = vadd.f32 %v3288_v53, %v4493_v16  ;;  %v1285_v4 = vpop.f32.mrb[91].mxu1 }
 0x24b   : > { %v1286_v1 = vadd.f32 %v4493_v16, %v1285_v4  ;;  %3411 = vmatprep.mubr.f32.mxu0 %v1370_v34 }
 0x24c   : > { %v1373_v17 = vmax.f32 %v1291_v50, 0.0  ;;  %3412 = vmatmul.mubr.f32.gmra.mrb[88].mxu0 %v1371_v38 }
 0x24d   : > { %v1372_v14 = vmax.f32 %v1286_v1, 0.0  ;;  %v3291_v29 = vpop.f32.mrb[92].mxu1 }
 0x24e   : > { %v1301_v26 = vadd.f32 %v3291_v29, %v4493_v16  ;;  %v1295_v44 = vpop.f32.mrb[93].mxu1 }
 0x24f   : > { %v1296_v39 = vadd.f32 %v4493_v16, %v1295_v44  ;;  %3414 = vmatprep.mubr.f32.mxu0 %v1372_v14 }
 0x250   : > { %v1375_v56 = vmax.f32 %v1301_v26, 0.0  ;;  %3415 = vmatmul.mubr.f32.gmra.mrb[90].mxu0 %v1373_v17 }
 0x251   : > { %v1374_v52 = vmax.f32 %v1296_v39, 0.0  ;;  %v3294_v6 = vpop.f32.mrb[94].mxu1 }
 0x252   : > { %v1311_v2 = vadd.f32 %v3294_v6, %v4493_v16  ;;  %v1305_v20 = vpop.f32.mrb[95].mxu1 }
 0x253   : > { %v1306_v23 = vadd.f32 %v4493_v16, %v1305_v20  ;;  %3417 = vmatprep.mubr.f32.mxu0 %v1374_v52 }
 0x254   : > { %v1377_v25 = vmax.f32 %v1311_v2, 0.0  ;;  %3418 = vmatmul.mubr.f32.gmra.mrb[92].mxu0 %v1375_v56 }
 0x255   : > { %v1376_v27 = vmax.f32 %v1306_v23, 0.0 }
 0x257   : > { %3420 = vmatprep.mubr.f32.mxu0 %v1376_v27 }
 0x258   : > { %3421 = vmatmul.mubr.f32.gmra.mrb[94].mxu0 %v1377_v25 }
 0x2af   : > { %v3329_v32 = vpop.f32.mrb[32].mxu0 }
 0x2b0   : > { %v4568_v33 = vadd.f32 %v3329_v32, %v4564_v31  ;;  %v1448_v16 = vpop.f32.mrb[33].mxu0 }
 0x2b1   : > { %v4571_v35 = vadd.f32 %v4564_v31, %v1448_v16 }
 0x2b2   : > { %6006 = vst [vmem:[#allocation6_spill] sm:$0xff] %v4568_v33  ;;  %v4576_v37 = vsel %vm1769_vm1, %v4568_v33, -inf }
 0x2b3   : > { %6007 = vst [vmem:[#allocation7_spill] sm:$0xff] %v4571_v35  ;;  %1836 = vmax.xlane.f32.xlu0 %v4576_v37  ;;  %v3332_v40 = vpop.f32.mrb[34].mxu0  ;;  %v4593_v48 = vsel %vm1769_vm1, %v4571_v35, -inf }
 0x2b4   : > { %v4580_v41 = vadd.f32 %v3332_v40, %v4564_v31  ;;  %v1458_v45 = vpop.f32.mrb[35].mxu0 }
 0x2b5   : > { %v4583_v46 = vadd.f32 %v4564_v31, %v1458_v45 }
 0x2b6   : > { %6008 = vst [vmem:[#allocation8_spill] sm:$0xff] %v4580_v41  ;;  %v4588_v47 = vsel %vm1769_vm1, %v4580_v41, -inf }
 0x2b7   : > { %6009 = vst [vmem:[#allocation9_spill] sm:$0xff] %v4583_v46  ;;  %1840 = vmax.xlane.f32.xlu1 %v4588_v47  ;;  %v3335_v49 = vpop.f32.mrb[36].mxu0  ;;  %1834 = vmax.xlane.f32.xlu0 %v4593_v48  ;;  %v4606_v57 = vsel %vm1769_vm1, %v4583_v46, -inf }
 0x2b8   : > { %v1468_v51 = vpop.f32.mrb[37].mxu0  ;;  %v4601_v55 = vadd.f32 %v3335_v49, %v4564_v31 }
 0x2b9   : > { %v4598_v54 = vadd.f32 %v4564_v31, %v1468_v51 }
 0x2ba   : > { %6011 = vst [vmem:[#allocation11_spill] sm:$0xff] %v4601_v55  ;;  %v4624_v3 = vsel %vm1769_vm1, %v4601_v55, -inf }
 0x2bb   : > { %6010 = vst [vmem:[#allocation10_spill] sm:$0xff] %v4598_v54  ;;  %v3338_v58 = vpop.f32.mrb[38].mxu0  ;;  %1838 = vmax.xlane.f32.xlu1 %v4606_v57  ;;  %v4612_v60 = vsel %vm1769_vm1, %v4598_v54, -inf }
 0x2bc   : > { %v1478_v62 = vpop.f32.mrb[39].mxu0  ;;  %1842 = vmax.xlane.f32.xlu0 %v4612_v60  ;;  %v4619_v0 = vadd.f32 %v3338_v58, %v4564_v31 }
 0x2bd   : > { %v4616_v63 = vadd.f32 %v4564_v31, %v1478_v62 }
 0x2be   : > { %6013 = vst [vmem:[#allocation13_spill] sm:$0xff] %v4619_v0  ;;  %v4642_v43 = vsel %vm1769_vm1, %v4619_v0, -inf }
 0x2bf   : > { %6012 = vst [vmem:[#allocation12_spill] sm:$0xff] %v4616_v63  ;;  %v3341_v5 = vpop.f32.mrb[40].mxu0  ;;  %1844 = vmax.xlane.f32.xlu1 %v4624_v3  ;;  %v4630_v7 = vsel %vm1769_vm1, %v4616_v63, -inf }
 0x2c0   : > { %v1488_v9 = vpop.f32.mrb[41].mxu0  ;;  %1846 = vmax.xlane.f32.xlu0 %v4630_v7  ;;  %v4637_v12 = vadd.f32 %v3341_v5, %v4564_v31 }
 0x2c1   : > { %v4634_v10 = vadd.f32 %v4564_v31, %v1488_v9 }
 0x2c2   : > { %6015 = vst [vmem:[#allocation15_spill] sm:$0xff] %v4637_v12  ;;  %v4660_v22 = vsel %vm1769_vm1, %v4637_v12, -inf }
 0x2c3   : > { %6014 = vst [vmem:[#allocation14_spill] sm:$0xff] %v4634_v10  ;;  %v3344_v13 = vpop.f32.mrb[42].mxu0  ;;  %1848 = vmax.xlane.f32.xlu1 %v4642_v43  ;;  %v4648_v15 = vsel %vm1769_vm1, %v4634_v10, -inf }
 0x2c4   : > { %v1498_v18 = vpop.f32.mrb[43].mxu0  ;;  %1850 = vmax.xlane.f32.xlu0 %v4648_v15  ;;  %v4655_v36 = vadd.f32 %v3344_v13, %v4564_v31 }
 0x2c5   : > { %v4652_v19 = vadd.f32 %v4564_v31, %v1498_v18 }
 0x2c6   : > { %6017 = vst [vmem:[#allocation17_spill] sm:$0xff] %v4655_v36  ;;  %v4678_v24 = vsel %vm1769_vm1, %v4655_v36, -inf }
 0x2c7   : > { %6016 = vst [vmem:[#allocation16_spill] sm:$0xff] %v4652_v19  ;;  %v3347_v42 = vpop.f32.mrb[44].mxu0  ;;  %1852 = vmax.xlane.f32.xlu1 %v4660_v22  ;;  %v4666_v61 = vsel %vm1769_vm1, %v4652_v19, -inf }
 0x2c8   : > { %v1508_v59 = vpop.f32.mrb[45].mxu0  ;;  %1854 = vmax.xlane.f32.xlu0 %v4666_v61  ;;  %v4673_v8 = vadd.f32 %v3347_v42, %v4564_v31 }
 0x2c9   : > { %v4670_v11 = vadd.f32 %v4564_v31, %v1508_v59 }
 0x2ca   : > { %6019 = vst [vmem:[#allocation19_spill] sm:$0xff] %v4673_v8  ;;  %v4696_v4 = vsel %vm1769_vm1, %v4673_v8, -inf }
 0x2cb   : > { %6018 = vst [vmem:[#allocation18_spill] sm:$0xff] %v4670_v11  ;;  %v3350_v21 = vpop.f32.mrb[46].mxu0  ;;  %1856 = vmax.xlane.f32.xlu1 %v4678_v24  ;;  %v4684_v38 = vsel %vm1769_vm1, %v4670_v11, -inf }
 0x2cc   : > { %v1518_v34 = vpop.f32.mrb[47].mxu0  ;;  %1858 = vmax.xlane.f32.xlu0 %v4684_v38  ;;  %v4691_v50 = vadd.f32 %v3350_v21, %v4564_v31 }
 0x2cd   : > { %v4688_v53 = vadd.f32 %v4564_v31, %v1518_v34 }
 0x2ce   : > { %6021 = vst [vmem:[#allocation21_spill] sm:$0xff] %v4691_v50  ;;  %v4714_v44 = vsel %vm1769_vm1, %v4691_v50, -inf }
 0x2cf   : > { %6020 = vst [vmem:[#allocation20_spill] sm:$0xff] %v4688_v53  ;;  %v3353_v1 = vpop.f32.mrb[48].mxu0  ;;  %1860 = vmax.xlane.f32.xlu1 %v4696_v4  ;;  %v4702_v17 = vsel %vm1769_vm1, %v4688_v53, -inf }
 0x2d0   : > { %v1528_v14 = vpop.f32.mrb[49].mxu0  ;;  %1862 = vmax.xlane.f32.xlu0 %v4702_v17  ;;  %v4709_v26 = vadd.f32 %v3353_v1, %v4564_v31 }
 0x2d1   : > { %v4706_v29 = vadd.f32 %v4564_v31, %v1528_v14 }
 0x2d2   : > { %6023 = vst [vmem:[#allocation23_spill] sm:$0xff] %v4709_v26  ;;  %v4732_v20 = vsel %vm1769_vm1, %v4709_v26, -inf }
 0x2d3   : > { %6022 = vst [vmem:[#allocation22_spill] sm:$0xff] %v4706_v29  ;;  %v3356_v39 = vpop.f32.mrb[50].mxu0  ;;  %1864 = vmax.xlane.f32.xlu1 %v4714_v44  ;;  %v4720_v56 = vsel %vm1769_vm1, %v4706_v29, -inf }
 0x2d4   : > { %v1538_v52 = vpop.f32.mrb[51].mxu0  ;;  %1866 = vmax.xlane.f32.xlu0 %v4720_v56  ;;  %v4727_v2 = vadd.f32 %v3356_v39, %v4564_v31 }
 0x2d5   : > { %v4724_v6 = vadd.f32 %v4564_v31, %v1538_v52 }
 0x2d6   : > { %6025 = vst [vmem:[#allocation25_spill] sm:$0xff] %v4727_v2  ;;  %v4750_v16 = vsel %vm1769_vm1, %v4727_v2, -inf }
 0x2d7   : > { %6024 = vst [vmem:[#allocation24_spill] sm:$0xff] %v4724_v6  ;;  %v3359_v23 = vpop.f32.mrb[52].mxu0  ;;  %1868 = vmax.xlane.f32.xlu1 %v4732_v20  ;;  %v4738_v25 = vsel %vm1769_vm1, %v4724_v6, -inf }
 0x2d8   : > { %v1548_v27 = vpop.f32.mrb[53].mxu0  ;;  %1870 = vmax.xlane.f32.xlu0 %v4738_v25  ;;  %v4745_v32 = vadd.f32 %v3359_v23, %v4564_v31 }
 0x2d9   : > { %v4742_v28 = vadd.f32 %v4564_v31, %v1548_v27 }
 0x2da   : > { %6027 = vst [vmem:[#allocation27_spill] sm:$0xff] %v4745_v32  ;;  %v4768_v62 = vsel %vm1769_vm1, %v4745_v32, -inf }
 0x2db   : > { %6026 = vst [vmem:[#allocation26_spill] sm:$0xff] %v4742_v28  ;;  %v3362_v40 = vpop.f32.mrb[54].mxu0  ;;  %1872 = vmax.xlane.f32.xlu1 %v4750_v16  ;;  %v4756_v45 = vsel %vm1769_vm1, %v4742_v28, -inf }
 0x2dc   : > { %v1558_v49 = vpop.f32.mrb[55].mxu0  ;;  %1874 = vmax.xlane.f32.xlu0 %v4756_v45  ;;  %v4763_v58 = vadd.f32 %v3362_v40, %v4564_v31 }
 0x2dd   : > { %v4760_v51 = vadd.f32 %v4564_v31, %v1558_v49 }
 0x2de   : > { %6029 = vst [vmem:[#allocation29_spill] sm:$0xff] %v4763_v58  ;;  %v4786_v59 = vsel %vm1769_vm1, %v4763_v58, -inf }
 0x2df   : > { %6028 = vst [vmem:[#allocation28_spill] sm:$0xff] %v4760_v51  ;;  %v3365_v5 = vpop.f32.mrb[56].mxu0  ;;  %1876 = vmax.xlane.f32.xlu1 %v4768_v62  ;;  %v4774_v9 = vsel %vm1769_vm1, %v4760_v51, -inf }
 0x2e0   : > { %v1568_v13 = vpop.f32.mrb[57].mxu0  ;;  %1878 = vmax.xlane.f32.xlu0 %v4774_v9  ;;  %v4781_v42 = vadd.f32 %v3365_v5, %v4564_v31 }
 0x2e1   : > { %v4778_v18 = vadd.f32 %v4564_v31, %v1568_v13 }
 0x2e2   : > { %6031 = vst [vmem:[#allocation31_spill] sm:$0xff] %v4781_v42  ;;  %v4804_v52 = vsel %vm1769_vm1, %v4781_v42, -inf }
 0x2e3   : > { %6030 = vst [vmem:[#allocation30_spill] sm:$0xff] %v4778_v18  ;;  %v3368_v21 = vpop.f32.mrb[58].mxu0  ;;  %1880 = vmax.xlane.f32.xlu1 %v4786_v59  ;;  %v4792_v34 = vsel %vm1769_vm1, %v4778_v18, -inf }
 0x2e4   : > { %v1578_v1 = vpop.f32.mrb[59].mxu0  ;;  %1882 = vmax.xlane.f32.xlu0 %v4792_v34  ;;  %v4799_v39 = vadd.f32 %v3368_v21, %v4564_v31 }
 0x2e5   : > { %v4796_v14 = vadd.f32 %v4564_v31, %v1578_v1 }
 0x2e6   : > { %6033 = vst [vmem:[#allocation33_spill] sm:$0xff] %v4799_v39  ;;  %v4822_v13 = vsel %vm1769_vm1, %v4799_v39, -inf }
 0x2e7   : > { %6032 = vst [vmem:[#allocation32_spill] sm:$0xff] %v4796_v14  ;;  %v3371_v23 = vpop.f32.mrb[60].mxu0  ;;  %1884 = vmax.xlane.f32.xlu1 %v4804_v52  ;;  %v4810_v27 = vsel %vm1769_vm1, %v4796_v14, -inf }
 0x2e8   : > { %v1588_v40 = vpop.f32.mrb[61].mxu0  ;;  %1886 = vmax.xlane.f32.xlu0 %v4810_v27  ;;  %v4817_v5 = vadd.f32 %v3371_v23, %v4564_v31 }
 0x2e9   : > { %v4814_v49 = vadd.f32 %v4564_v31, %v1588_v40 }
 0x2ea   : > { %6035 = vst [vmem:[#allocation35_spill] sm:$0xff] %v4817_v5  ;;  %v4840_v39 = vsel %vm1769_vm1, %v4817_v5, -inf }
 0x2eb   : > { %6034 = vst [vmem:[#allocation34_spill] sm:$0xff] %v4814_v49  ;;  %v3374_v21 = vpop.f32.mrb[62].mxu0  ;;  %1888 = vmax.xlane.f32.xlu1 %v4822_v13  ;;  %v4828_v1 = vsel %vm1769_vm1, %v4814_v49, -inf }
 0x2ec   : > { %v1598_v14 = vpop.f32.mrb[63].mxu0  ;;  %1890 = vmax.xlane.f32.xlu0 %v4828_v1  ;;  %v4835_v23 = vadd.f32 %v3374_v21, %v4564_v31 }
 0x2ed   : > { %v4832_v40 = vadd.f32 %v4564_v31, %v1598_v14 }
 0x2ee   : > { %6037 = vst [vmem:[#allocation37_spill] sm:$0xff] %v4835_v23  ;;  %v4858_v5 = vsel %vm1769_vm1, %v4835_v23, -inf }
 0x2ef   : > { %6036 = vst [vmem:[#allocation36_spill] sm:$0xff] %v4832_v40  ;;  %v3377_v18 = vpop.f32.mrb[64].mxu0  ;;  %1892 = vmax.xlane.f32.xlu1 %v4840_v39  ;;  %v4846_v49 = vsel %vm1769_vm1, %v4832_v40, -inf }
 0x2f0   : > { %v1608_v42 = vpop.f32.mrb[65].mxu0  ;;  %1894 = vmax.xlane.f32.xlu0 %v4846_v49  ;;  %v4853_v21 = vadd.f32 %v3377_v18, %v4564_v31 }
 0x2f1   : > { %v4850_v14 = vadd.f32 %v4564_v31, %v1608_v42 }
 0x2f2   : > { %6039 = vst [vmem:[#allocation39_spill] sm:$0xff] %v4853_v21  ;;  %v4876_v23 = vsel %vm1769_vm1, %v4853_v21, -inf }
 0x2f3   : > { %6038 = vst [vmem:[#allocation38_spill] sm:$0xff] %v4850_v14  ;;  %v3380_v51 = vpop.f32.mrb[66].mxu0  ;;  %1896 = vmax.xlane.f32.xlu1 %v4858_v5  ;;  %v4864_v40 = vsel %vm1769_vm1, %v4850_v14, -inf }
 0x2f4   : > { %v1618_v58 = vpop.f32.mrb[67].mxu0  ;;  %1898 = vmax.xlane.f32.xlu0 %v4864_v40  ;;  %v4871_v18 = vadd.f32 %v3380_v51, %v4564_v31 }
 0x2f5   : > { %v4868_v42 = vadd.f32 %v4564_v31, %v1618_v58 }
 0x2f6   : > { %6041 = vst [vmem:[#allocation41_spill] sm:$0xff] %v4871_v18  ;;  %v4894_v21 = vsel %vm1769_vm1, %v4871_v18, -inf }
 0x2f7   : > { %6040 = vst [vmem:[#allocation40_spill] sm:$0xff] %v4868_v42  ;;  %v3383_v28 = vpop.f32.mrb[68].mxu0  ;;  %1900 = vmax.xlane.f32.xlu1 %v4876_v23  ;;  %v4882_v14 = vsel %vm1769_vm1, %v4868_v42, -inf }
 0x2f8   : > { %v1628_v32 = vpop.f32.mrb[69].mxu0  ;;  %1902 = vmax.xlane.f32.xlu0 %v4882_v14  ;;  %v4889_v51 = vadd.f32 %v3383_v28, %v4564_v31 }
 0x2f9   : > { %v4886_v58 = vadd.f32 %v4564_v31, %v1628_v32 }
 0x2fa   : > { %6043 = vst [vmem:[#allocation43_spill] sm:$0xff] %v4889_v51  ;;  %v4912_v18 = vsel %vm1769_vm1, %v4889_v51, -inf }
 0x2fb   : > { %6042 = vst [vmem:[#allocation42_spill] sm:$0xff] %v4886_v58  ;;  %v3386_v6 = vpop.f32.mrb[70].mxu0  ;;  %1904 = vmax.xlane.f32.xlu1 %v4894_v21  ;;  %v4900_v42 = vsel %vm1769_vm1, %v4886_v58, -inf }
 0x2fc   : > { %v1638_v2 = vpop.f32.mrb[71].mxu0  ;;  %1906 = vmax.xlane.f32.xlu0 %v4900_v42  ;;  %v4907_v28 = vadd.f32 %v3386_v6, %v4564_v31 }
 0x2fd   : > { %v4904_v32 = vadd.f32 %v4564_v31, %v1638_v2 }
 0x2fe   : > { %6045 = vst [vmem:[#allocation45_spill] sm:$0xff] %v4907_v28  ;;  %v4930_v51 = vsel %vm1769_vm1, %v4907_v28, -inf }
 0x2ff   : > { %6044 = vst [vmem:[#allocation44_spill] sm:$0xff] %v4904_v32  ;;  %v3389_v29 = vpop.f32.mrb[72].mxu0  ;;  %1908 = vmax.xlane.f32.xlu1 %v4912_v18  ;;  %v4918_v58 = vsel %vm1769_vm1, %v4904_v32, -inf }
 0x300   : > { %v1648_v26 = vpop.f32.mrb[73].mxu0  ;;  %1910 = vmax.xlane.f32.xlu0 %v4918_v58  ;;  %v4925_v6 = vadd.f32 %v3389_v29, %v4564_v31 }
 0x301   : > { %v4922_v2 = vadd.f32 %v4564_v31, %v1648_v26 }
 0x302   : > { %6047 = vst [vmem:[#allocation47_spill] sm:$0xff] %v4925_v6  ;;  %v4948_v28 = vsel %vm1769_vm1, %v4925_v6, -inf }
 0x303   : > { %6046 = vst [vmem:[#allocation46_spill] sm:$0xff] %v4922_v2  ;;  %v3392_v53 = vpop.f32.mrb[74].mxu0  ;;  %1912 = vmax.xlane.f32.xlu1 %v4930_v51  ;;  %v4936_v32 = vsel %vm1769_vm1, %v4922_v2, -inf }
 0x304   : > { %v1658_v50 = vpop.f32.mrb[75].mxu0  ;;  %1914 = vmax.xlane.f32.xlu0 %v4936_v32  ;;  %v4943_v29 = vadd.f32 %v3392_v53, %v4564_v31 }
 0x305   : > { %v4940_v26 = vadd.f32 %v4564_v31, %v1658_v50 }
 0x306   : > { %6049 = vst [vmem:[#allocation49_spill] sm:$0xff] %v4943_v29  ;;  %v4966_v6 = vsel %vm1769_vm1, %v4943_v29, -inf }
 0x307   : > { %6048 = vst [vmem:[#allocation48_spill] sm:$0xff] %v4940_v26  ;;  %v3395_v11 = vpop.f32.mrb[76].mxu0  ;;  %1916 = vmax.xlane.f32.xlu1 %v4948_v28  ;;  %v4954_v2 = vsel %vm1769_vm1, %v4940_v26, -inf }
 0x308   : > { %v1668_v8 = vpop.f32.mrb[77].mxu0  ;;  %1918 = vmax.xlane.f32.xlu0 %v4954_v2  ;;  %v4961_v53 = vadd.f32 %v3395_v11, %v4564_v31 }
 0x309   : > { %v4958_v50 = vadd.f32 %v4564_v31, %v1668_v8 }
 0x30a   : > { %6051 = vst [vmem:[#allocation51_spill] sm:$0xff] %v4961_v53  ;;  %v4984_v29 = vsel %vm1769_vm1, %v4961_v53, -inf }
 0x30b   : > { %6050 = vst [vmem:[#allocation50_spill] sm:$0xff] %v4958_v50  ;;  %v3398_v19 = vpop.f32.mrb[78].mxu0  ;;  %1920 = vmax.xlane.f32.xlu1 %v4966_v6  ;;  %v4972_v26 = vsel %vm1769_vm1, %v4958_v50, -inf }
 0x30c   : > { %v1678_v36 = vpop.f32.mrb[79].mxu0  ;;  %1922 = vmax.xlane.f32.xlu0 %v4972_v26  ;;  %v4979_v11 = vadd.f32 %v3398_v19, %v4564_v31 }
 0x30d   : > { %v4976_v8 = vadd.f32 %v4564_v31, %v1678_v36 }
 0x30e   : > { %6053 = vst [vmem:[#allocation53_spill] sm:$0xff] %v4979_v11  ;;  %v5002_v53 = vsel %vm1769_vm1, %v4979_v11, -inf }
 0x30f   : > { %6052 = vst [vmem:[#allocation52_spill] sm:$0xff] %v4976_v8  ;;  %v3401_v10 = vpop.f32.mrb[80].mxu0  ;;  %1924 = vmax.xlane.f32.xlu1 %v4984_v29  ;;  %v4990_v50 = vsel %vm1769_vm1, %v4976_v8, -inf }
 0x310   : > { %v1688_v12 = vpop.f32.mrb[81].mxu0  ;;  %1926 = vmax.xlane.f32.xlu0 %v4990_v50  ;;  %v4997_v19 = vadd.f32 %v3401_v10, %v4564_v31 }
 0x311   : > { %v4994_v36 = vadd.f32 %v4564_v31, %v1688_v12 }
 0x312   : > { %6055 = vst [vmem:[#allocation55_spill] sm:$0xff] %v4997_v19  ;;  %v5020_v11 = vsel %vm1769_vm1, %v4997_v19, -inf }
 0x313   : > { %6054 = vst [vmem:[#allocation54_spill] sm:$0xff] %v4994_v36  ;;  %v3404_v63 = vpop.f32.mrb[82].mxu0  ;;  %1928 = vmax.xlane.f32.xlu1 %v5002_v53  ;;  %v5008_v8 = vsel %vm1769_vm1, %v4994_v36, -inf }
 0x314   : > { %v1698_v0 = vpop.f32.mrb[83].mxu0  ;;  %1930 = vmax.xlane.f32.xlu0 %v5008_v8  ;;  %v5015_v10 = vadd.f32 %v3404_v63, %v4564_v31 }
 0x315   : > { %v5012_v12 = vadd.f32 %v4564_v31, %v1698_v0 }
 0x316   : > { %6057 = vst [vmem:[#allocation57_spill] sm:$0xff] %v5015_v10  ;;  %v5038_v19 = vsel %vm1769_vm1, %v5015_v10, -inf }
 0x317   : > { %6056 = vst [vmem:[#allocation56_spill] sm:$0xff] %v5012_v12  ;;  %v3407_v54 = vpop.f32.mrb[84].mxu0  ;;  %1932 = vmax.xlane.f32.xlu1 %v5020_v11  ;;  %v5026_v36 = vsel %vm1769_vm1, %v5012_v12, -inf  ;;  %6061 = vst [vmem:[#allocation61_spill] sm:$0xff] %v5038_v19 }
 0x318   : > { %6058 = vst [vmem:[#allocation58_spill] sm:$0xff] %v5026_v36  ;;  %v1708_v55 = vpop.f32.mrb[85].mxu0  ;;  %1934 = vmax.xlane.f32.xlu0 %v5026_v36  ;;  %v5033_v63 = vadd.f32 %v3407_v54, %v4564_v31 }
 0x319   : > { %v5030_v0 = vadd.f32 %v4564_v31, %v1708_v55 }
 0x31a   : > { %6060 = vst [vmem:[#allocation60_spill] sm:$0xff] %v5033_v63  ;;  %v5056_v10 = vsel %vm1769_vm1, %v5033_v63, -inf }
 0x31b   : > { %6059 = vst [vmem:[#allocation59_spill] sm:$0xff] %v5030_v0  ;;  %v3410_v46 = vpop.f32.mrb[86].mxu0  ;;  %1936 = vmax.xlane.f32.xlu1 %v5038_v19  ;;  %v5044_v12 = vsel %vm1769_vm1, %v5030_v0, -inf  ;;  %6065 = vst [vmem:[#allocation65_spill] sm:$0xff] %v5056_v10 }
 0x31c   : > { %6062 = vst [vmem:[#allocation62_spill] sm:$0xff] %v5044_v12  ;;  %v1718_v41 = vpop.f32.mrb[87].mxu0  ;;  %1938 = vmax.xlane.f32.xlu0 %v5044_v12  ;;  %v5051_v54 = vadd.f32 %v3410_v46, %v4564_v31 }
 0x31d   : > { %v5048_v55 = vadd.f32 %v4564_v31, %v1718_v41 }
 0x31e   : > { %6064 = vst [vmem:[#allocation64_spill] sm:$0xff] %v5051_v54  ;;  %v5074_v63 = vsel %vm1769_vm1, %v5051_v54, -inf }
 0x31f   : > { %6063 = vst [vmem:[#allocation63_spill] sm:$0xff] %v5048_v55  ;;  %v3413_v35 = vpop.f32.mrb[88].mxu0  ;;  %1940 = vmax.xlane.f32.xlu1 %v5056_v10  ;;  %v5062_v0 = vsel %vm1769_vm1, %v5048_v55, -inf  ;;  %6069 = vst [vmem:[#allocation69_spill] sm:$0xff] %v5074_v63 }
 0x320   : > { %6066 = vst [vmem:[#allocation66_spill] sm:$0xff] %v5062_v0  ;;  %v1728_v33 = vpop.f32.mrb[89].mxu0  ;;  %1942 = vmax.xlane.f32.xlu0 %v5062_v0  ;;  %v5069_v46 = vadd.f32 %v3413_v35, %v4564_v31 }
 0x321   : > { %v5066_v41 = vadd.f32 %v4564_v31, %v1728_v33 }
 0x322   : > { %6068 = vst [vmem:[#allocation68_spill] sm:$0xff] %v5069_v46  ;;  %v5092_v54 = vsel %vm1769_vm1, %v5069_v46, -inf }
 0x323   : > { %6067 = vst [vmem:[#allocation67_spill] sm:$0xff] %v5066_v41  ;;  %v3416_v10 = vpop.f32.mrb[90].mxu0  ;;  %1944 = vmax.xlane.f32.xlu1 %v5074_v63  ;;  %v5080_v55 = vsel %vm1769_vm1, %v5066_v41, -inf  ;;  %6073 = vst [vmem:[#allocation73_spill] sm:$0xff] %v5092_v54 }
 0x324   : > { %6070 = vst [vmem:[#allocation70_spill] sm:$0xff] %v5080_v55  ;;  %v1738_v0 = vpop.f32.mrb[91].mxu0  ;;  %1946 = vmax.xlane.f32.xlu0 %v5080_v55  ;;  %v5087_v35 = vadd.f32 %v3416_v10, %v4564_v31 }
 0x325   : > { %v5084_v33 = vadd.f32 %v4564_v31, %v1738_v0 }
 0x326   : > { %6072 = vst [vmem:[#allocation72_spill] sm:$0xff] %v5087_v35  ;;  %v5110_v46 = vsel %vm1769_vm1, %v5087_v35, -inf }
 0x327   : > { %6071 = vst [vmem:[#allocation71_spill] sm:$0xff] %v5084_v33  ;;  %v3419_v63 = vpop.f32.mrb[92].mxu0  ;;  %1948 = vmax.xlane.f32.xlu1 %v5092_v54  ;;  %v5098_v41 = vsel %vm1769_vm1, %v5084_v33, -inf  ;;  %6077 = vst [vmem:[#allocation77_spill] sm:$0xff] %v5110_v46 }
 0x328   : > { %6074 = vst [vmem:[#allocation74_spill] sm:$0xff] %v5098_v41  ;;  %v1748_v55 = vpop.f32.mrb[93].mxu0  ;;  %1950 = vmax.xlane.f32.xlu0 %v5098_v41  ;;  %v5105_v10 = vadd.f32 %v3419_v63, %v4564_v31 }
 0x329   : > { %v5102_v0 = vadd.f32 %v4564_v31, %v1748_v55 }
 0x32a   : > { %6076 = vst [vmem:[#allocation76_spill] sm:$0xff] %v5105_v10  ;;  %v5128_v35 = vsel %vm1769_vm1, %v5105_v10, -inf }
 0x32b   : > { %6075 = vst [vmem:[#allocation75_spill] sm:$0xff] %v5102_v0  ;;  %v3422_v54 = vpop.f32.mrb[94].mxu0  ;;  %1952 = vmax.xlane.f32.xlu1 %v5110_v46  ;;  %v5116_v33 = vsel %vm1769_vm1, %v5102_v0, -inf  ;;  %6081 = vst [vmem:[#allocation81_spill] sm:$0xff] %v5128_v35 }
 0x32c   : > { %6078 = vst [vmem:[#allocation78_spill] sm:$0xff] %v5116_v33  ;;  %v1758_v41 = vpop.f32.mrb[95].mxu0  ;;  %1954 = vmax.xlane.f32.xlu0 %v5116_v33  ;;  %v5123_v63 = vadd.f32 %v3422_v54, %v4564_v31 }
 0x32d   : > { %v5120_v55 = vadd.f32 %v4564_v31, %v1758_v41 }
 0x32e   : > { %6080 = vst [vmem:[#allocation80_spill] sm:$0xff] %v5123_v63  ;;  %v5140_v41 = vsel %vm1769_vm1, %v5123_v63, -inf }
 0x32f   : > { %6079 = vst [vmem:[#allocation79_spill] sm:$0xff] %v5120_v55  ;;  %1956 = vmax.xlane.f32.xlu1 %v5128_v35  ;;  %v5134_v0 = vsel %vm1769_vm1, %v5120_v55, -inf  ;;  %6083 = vst [vmem:[#allocation83_spill] sm:$0xff] %v5140_v41 }
 0x330   : > { %6082 = vst [vmem:[#allocation82_spill] sm:$0xff] %v5134_v0  ;;  %1958 = vmax.xlane.f32.xlu0 %v5134_v0 }
 0x333   : > { %1960 = vmax.xlane.f32.xlu1 %v5140_v41 }
 0x340   : > { %v1837_v31 = vpop.xlane.xlu0 %1836 }
 0x341   : > { %v1963_v54 = vsub.f32 %v4576_v37, %v1837_v31 }
 0x343   : > { %v2028_v10 = vmul.f32 1.442695, %v1963_v54 }
 0x344   : > { %v1841_v33 = vpop.xlane.xlu1 %1840  ;;  %v1835_v35 = vpop.xlane.xlu0 %1834 }
 0x345   : > { %3552 = vpow2.f32 %v2028_v10  ;;  %v1965_v46 = vsub.f32 %v4588_v47, %v1841_v33  ;;  %v1962_v55 = vsub.f32 %v4593_v48, %v1835_v35 }
 0x347   : > { %v2032_v12 = vmul.f32 1.442695, %v1965_v46  ;;  %v2026_v0 = vmul.f32 1.442695, %v1962_v55 }
 0x348   : > { %v1839_v19 = vpop.xlane.xlu1 %1838 }
 0x349   : > { %3554 = vpow2.f32 %v2032_v12  ;;  %v1964_v63 = vsub.f32 %v4606_v57, %v1839_v19  ;;  %v1843_v30 = vpop.xlane.xlu0 %1842 }
 0x34a   : > { %3556 = vpow2.f32 %v2026_v0  ;;  %v1966_v41 = vsub.f32 %v4612_v60, %v1843_v30 }
 0x34b   : > { %v2030_v36 = vmul.f32 1.442695, %v1964_v63 }
 0x34c   : > { %v1845_v37 = vpop.xlane.xlu1 %1844  ;;  %v2034_v54 = vmul.f32 1.442695, %v1966_v41 }
 0x34d   : > { %3558 = vpow2.f32 %v2030_v36  ;;  %v1967_v31 = vsub.f32 %v4624_v3, %v1845_v37  ;;  %v1847_v10 = vpop.xlane.xlu0 %1846 }
 0x34e   : > { %v1968_v47 = vsub.f32 %v4630_v7, %v1847_v10 }
 0x34f   : > { %v5150_v48 = vpop.eup %3552  ;;  %v2036_v46 = vmul.f32 1.442695, %v1967_v31 }
 0x350   : > { %2156 = vadd.xlane.f32.xlu1 %v5150_v48  ;;  %v1849_v12 = vpop.xlane.xlu1 %1848  ;;  %v2038_v30 = vmul.f32 1.442695, %v1968_v47 }
 0x351   : > { %3560 = vpow2.f32 %v2036_v46  ;;  %v1969_v57 = vsub.f32 %v4642_v43, %v1849_v12  ;;  %v1851_v19 = vpop.xlane.xlu0 %1850 }
 0x352   : > { %3562 = vpow2.f32 %v2034_v54  ;;  %v1970_v60 = vsub.f32 %v4648_v15, %v1851_v19 }
 0x353   : > { %v5155_v36 = vpop.eup %3554  ;;  %v2040_v3 = vmul.f32 1.442695, %v1969_v57 }
 0x354   : > { %v5157_v33 = vpop.eup %3556  ;;  %2160 = vadd.xlane.f32.xlu1 %v5155_v36  ;;  %v1853_v7 = vpop.xlane.xlu1 %1852  ;;  %v2042_v43 = vmul.f32 1.442695, %v1970_v60 }
 0x355   : > { %3564 = vpow2.f32 %v2040_v3  ;;  %v1971_v35 = vsub.f32 %v4660_v22, %v1853_v7  ;;  %2154 = vadd.xlane.f32.xlu0 %v5157_v33  ;;  %v1855_v0 = vpop.xlane.xlu0 %1854 }
 0x356   : > { %3566 = vpow2.f32 %v2038_v30  ;;  %v1972_v55 = vsub.f32 %v4666_v61, %v1855_v0 }
 0x357   : > { %v5163_v63 = vpop.eup %3558  ;;  %v2044_v15 = vmul.f32 1.442695, %v1971_v35 }
 0x358   : > { %v1857_v41 = vpop.xlane.xlu1 %1856  ;;  %v2046_v10 = vmul.f32 1.442695, %v1972_v55 }
 0x359   : > { %3568 = vpow2.f32 %v2044_v15  ;;  %v1973_v37 = vsub.f32 %v4678_v24, %v1857_v41  ;;  %2158 = vadd.xlane.f32.xlu0 %v5163_v63  ;;  %v1859_v31 = vpop.xlane.xlu0 %1858 }
 0x35a   : > { %3570 = vpow2.f32 %v2042_v43  ;;  %v1974_v22 = vsub.f32 %v4684_v38, %v1859_v31 }
 0x35b   : > { %v5168_v54 = vpop.eup %3560  ;;  %v2048_v47 = vmul.f32 1.442695, %v1973_v37 }
 0x35c   : > { %v5170_v46 = vpop.eup %3562  ;;  %2164 = vadd.xlane.f32.xlu1 %v5168_v54  ;;  %v1861_v61 = vpop.xlane.xlu1 %1860  ;;  %v2050_v57 = vmul.f32 1.442695, %v1974_v22 }
 0x35d   : > { %3572 = vpow2.f32 %v2048_v47  ;;  %v1975_v12 = vsub.f32 %v4696_v4, %v1861_v61  ;;  %2162 = vadd.xlane.f32.xlu0 %v5170_v46  ;;  %v1863_v24 = vpop.xlane.xlu0 %1862 }
 0x35e   : > { %3574 = vpow2.f32 %v2046_v10  ;;  %v1976_v19 = vsub.f32 %v4702_v17, %v1863_v24 }
 0x35f   : > { %v5176_v30 = vpop.eup %3564  ;;  %v2052_v38 = vmul.f32 1.442695, %v1975_v12 }
 0x360   : > { %v5178_v60 = vpop.eup %3566  ;;  %2168 = vadd.xlane.f32.xlu1 %v5176_v30  ;;  %v1865_v3 = vpop.xlane.xlu1 %1864  ;;  %v2054_v35 = vmul.f32 1.442695, %v1976_v19 }
 0x361   : > { %3576 = vpow2.f32 %v2052_v38  ;;  %v1977_v7 = vsub.f32 %v4714_v44, %v1865_v3  ;;  %2166 = vadd.xlane.f32.xlu0 %v5178_v60  ;;  %v1867_v4 = vpop.xlane.xlu0 %1866 }
 0x362   : > { %3578 = vpow2.f32 %v2050_v57  ;;  %v1978_v0 = vsub.f32 %v4720_v56, %v1867_v4 }
 0x363   : > { %v5184_v43 = vpop.eup %3568  ;;  %v2056_v17 = vmul.f32 1.442695, %v1977_v7 }
 0x364   : > { %v5186_v55 = vpop.eup %3570  ;;  %2172 = vadd.xlane.f32.xlu1 %v5184_v43  ;;  %v1869_v15 = vpop.xlane.xlu1 %1868  ;;  %v2058_v37 = vmul.f32 1.442695, %v1978_v0 }
 0x365   : > { %3580 = vpow2.f32 %v2056_v17  ;;  %v1979_v41 = vsub.f32 %v4732_v20, %v1869_v15  ;;  %2170 = vadd.xlane.f32.xlu0 %v5186_v55  ;;  %v1871_v44 = vpop.xlane.xlu0 %1870 }
 0x366   : > { %3582 = vpow2.f32 %v2054_v35  ;;  %v1980_v31 = vsub.f32 %v4738_v25, %v1871_v44 }
 0x367   : > { %v5192_v10 = vpop.eup %3572  ;;  %v2060_v56 = vmul.f32 1.442695, %v1979_v41 }
 0x368   : > { %v5194_v22 = vpop.eup %3574  ;;  %2176 = vadd.xlane.f32.xlu1 %v5192_v10  ;;  %v1873_v47 = vpop.xlane.xlu1 %1872  ;;  %v2062_v12 = vmul.f32 1.442695, %v1980_v31 }
 0x369   : > { %3584 = vpow2.f32 %v2060_v56  ;;  %v1981_v61 = vsub.f32 %v4750_v16, %v1873_v47  ;;  %2174 = vadd.xlane.f32.xlu0 %v5194_v22  ;;  %v1875_v20 = vpop.xlane.xlu0 %1874 }
 0x36a   : > { %3586 = vpow2.f32 %v2058_v37  ;;  %v1982_v24 = vsub.f32 %v4756_v45, %v1875_v20 }
 0x36b   : > { %v5200_v57 = vpop.eup %3576  ;;  %v2064_v25 = vmul.f32 1.442695, %v1981_v61 }
 0x36c   : > { %v5202_v19 = vpop.eup %3578  ;;  %2180 = vadd.xlane.f32.xlu1 %v5200_v57  ;;  %v1877_v38 = vpop.xlane.xlu1 %1876  ;;  %v2066_v7 = vmul.f32 1.442695, %v1982_v24 }
 0x36d   : > { %3588 = vpow2.f32 %v2064_v25  ;;  %v1983_v3 = vsub.f32 %v4768_v62, %v1877_v38  ;;  %2178 = vadd.xlane.f32.xlu0 %v5202_v19  ;;  %v1879_v16 = vpop.xlane.xlu0 %1878 }
 0x36e   : > { %3590 = vpow2.f32 %v2062_v12  ;;  %v1984_v4 = vsub.f32 %v4774_v9, %v1879_v16 }
 0x36f   : > { %v5208_v35 = vpop.eup %3580  ;;  %v2068_v45 = vmul.f32 1.442695, %v1983_v3 }
 0x370   : > { %v5210_v0 = vpop.eup %3582  ;;  %2184 = vadd.xlane.f32.xlu1 %v5208_v35  ;;  %v1881_v17 = vpop.xlane.xlu1 %1880  ;;  %v2070_v41 = vmul.f32 1.442695, %v1984_v4 }
 0x371   : > { %3592 = vpow2.f32 %v2068_v45  ;;  %v1985_v15 = vsub.f32 %v4786_v59, %v1881_v17  ;;  %2182 = vadd.xlane.f32.xlu0 %v5210_v0  ;;  %v1883_v62 = vpop.xlane.xlu0 %1882 }
 0x372   : > { %3594 = vpow2.f32 %v2066_v7  ;;  %v1986_v44 = vsub.f32 %v4792_v34, %v1883_v62 }
 0x373   : > { %v5216_v37 = vpop.eup %3584  ;;  %v2072_v9 = vmul.f32 1.442695, %v1985_v15 }
 0x374   : > { %v5218_v31 = vpop.eup %3586  ;;  %2188 = vadd.xlane.f32.xlu1 %v5216_v37  ;;  %v1885_v56 = vpop.xlane.xlu1 %1884  ;;  %v2074_v61 = vmul.f32 1.442695, %v1986_v44 }
 0x375   : > { %3596 = vpow2.f32 %v2072_v9  ;;  %v1987_v47 = vsub.f32 %v4804_v52, %v1885_v56  ;;  %2186 = vadd.xlane.f32.xlu0 %v5218_v31  ;;  %v1887_v59 = vpop.xlane.xlu0 %1886 }
 0x376   : > { %3598 = vpow2.f32 %v2070_v41  ;;  %v1988_v20 = vsub.f32 %v4810_v27, %v1887_v59 }
 0x377   : > { %v5224_v12 = vpop.eup %3588  ;;  %v2076_v34 = vmul.f32 1.442695, %v1987_v47 }
 0x378   : > { %v5226_v24 = vpop.eup %3590  ;;  %2192 = vadd.xlane.f32.xlu1 %v5224_v12  ;;  %v1889_v25 = vpop.xlane.xlu1 %1888  ;;  %v2078_v3 = vmul.f32 1.442695, %v1988_v20 }
 0x379   : > { %3600 = vpow2.f32 %v2076_v34  ;;  %v1989_v38 = vsub.f32 %v4822_v13, %v1889_v25  ;;  %2190 = vadd.xlane.f32.xlu0 %v5226_v24  ;;  %v1891_v52 = vpop.xlane.xlu0 %1890 }
 0x37a   : > { %3602 = vpow2.f32 %v2074_v61  ;;  %v1990_v16 = vsub.f32 %v4828_v1, %v1891_v52 }
 0x37b   : > { %v5232_v7 = vpop.eup %3592  ;;  %v2080_v27 = vmul.f32 1.442695, %v1989_v38 }
 0x37c   : > { %v5234_v4 = vpop.eup %3594  ;;  %2196 = vadd.xlane.f32.xlu1 %v5232_v7  ;;  %v1893_v45 = vpop.xlane.xlu1 %1892  ;;  %v2082_v15 = vmul.f32 1.442695, %v1990_v16 }
 0x37d   : > { %3604 = vpow2.f32 %v2080_v27  ;;  %v1991_v17 = vsub.f32 %v4840_v39, %v1893_v45  ;;  %2194 = vadd.xlane.f32.xlu0 %v5234_v4  ;;  %v1895_v13 = vpop.xlane.xlu0 %1894 }
 0x37e   : > { %3606 = vpow2.f32 %v2078_v3  ;;  %v1992_v62 = vsub.f32 %v4846_v49, %v1895_v13 }
 0x37f   : > { %v5240_v41 = vpop.eup %3596  ;;  %v2084_v1 = vmul.f32 1.442695, %v1991_v17 }
 0x380   : > { %v5242_v44 = vpop.eup %3598  ;;  %2200 = vadd.xlane.f32.xlu1 %v5240_v41  ;;  %v1897_v9 = vpop.xlane.xlu1 %1896  ;;  %v2086_v47 = vmul.f32 1.442695, %v1992_v62 }
 0x381   : > { %3608 = vpow2.f32 %v2084_v1  ;;  %v1993_v56 = vsub.f32 %v4858_v5, %v1897_v9  ;;  %2198 = vadd.xlane.f32.xlu0 %v5242_v44  ;;  %v1899_v39 = vpop.xlane.xlu0 %1898 }
 0x382   : > { %3610 = vpow2.f32 %v2082_v15  ;;  %v1994_v59 = vsub.f32 %v4864_v40, %v1899_v39 }
 0x383   : > { %v5248_v61 = vpop.eup %3600  ;;  %v2088_v49 = vmul.f32 1.442695, %v1993_v56 }
 0x384   : > { %v5250_v20 = vpop.eup %3602  ;;  %2204 = vadd.xlane.f32.xlu1 %v5248_v61  ;;  %v1901_v34 = vpop.xlane.xlu1 %1900  ;;  %v2090_v38 = vmul.f32 1.442695, %v1994_v59 }
 0x385   : > { %3612 = vpow2.f32 %v2088_v49  ;;  %v1995_v25 = vsub.f32 %v4876_v23, %v1901_v34  ;;  %2202 = vadd.xlane.f32.xlu0 %v5250_v20  ;;  %v1903_v5 = vpop.xlane.xlu0 %1902 }
 0x386   : > { %3614 = vpow2.f32 %v2086_v47  ;;  %v1996_v52 = vsub.f32 %v4882_v14, %v1903_v5 }
 0x387   : > { %v5256_v3 = vpop.eup %3604  ;;  %v2092_v40 = vmul.f32 1.442695, %v1995_v25 }
 0x388   : > { %v5258_v16 = vpop.eup %3606  ;;  %2208 = vadd.xlane.f32.xlu1 %v5256_v3  ;;  %v1905_v27 = vpop.xlane.xlu1 %1904  ;;  %v2094_v17 = vmul.f32 1.442695, %v1996_v52 }
 0x389   : > { %3616 = vpow2.f32 %v2092_v40  ;;  %v1997_v45 = vsub.f32 %v4894_v21, %v1905_v27  ;;  %2206 = vadd.xlane.f32.xlu0 %v5258_v16  ;;  %v1907_v23 = vpop.xlane.xlu0 %1906 }
 0x38a   : > { %3618 = vpow2.f32 %v2090_v38  ;;  %v1998_v13 = vsub.f32 %v4900_v42, %v1907_v23 }
 0x38b   : > { %v5264_v15 = vpop.eup %3608  ;;  %v2096_v14 = vmul.f32 1.442695, %v1997_v45 }
 0x38c   : > { %v5266_v62 = vpop.eup %3610  ;;  %2212 = vadd.xlane.f32.xlu1 %v5264_v15  ;;  %v1909_v1 = vpop.xlane.xlu1 %1908  ;;  %v2098_v56 = vmul.f32 1.442695, %v1998_v13 }
 0x38d   : > { %3620 = vpow2.f32 %v2096_v14  ;;  %v1999_v9 = vsub.f32 %v4912_v18, %v1909_v1  ;;  %2210 = vadd.xlane.f32.xlu0 %v5266_v62  ;;  %v1911_v21 = vpop.xlane.xlu0 %1910 }
 0x38e   : > { %3622 = vpow2.f32 %v2094_v17  ;;  %v2000_v39 = vsub.f32 %v4918_v58, %v1911_v21 }
 0x38f   : > { %v5272_v47 = vpop.eup %3612  ;;  %v2100_v42 = vmul.f32 1.442695, %v1999_v9 }
 0x390   : > { %v5274_v59 = vpop.eup %3614  ;;  %2216 = vadd.xlane.f32.xlu1 %v5272_v47  ;;  %v1913_v49 = vpop.xlane.xlu1 %1912  ;;  %v2102_v25 = vmul.f32 1.442695, %v2000_v39 }
 0x391   : > { %3624 = vpow2.f32 %v2100_v42  ;;  %v2001_v34 = vsub.f32 %v4930_v51, %v1913_v49  ;;  %2214 = vadd.xlane.f32.xlu0 %v5274_v59  ;;  %v1915_v18 = vpop.xlane.xlu0 %1914 }
 0x392   : > { %3626 = vpow2.f32 %v2098_v56  ;;  %v2002_v5 = vsub.f32 %v4936_v32, %v1915_v18 }
 0x393   : > { %v5280_v38 = vpop.eup %3616  ;;  %v2104_v58 = vmul.f32 1.442695, %v2001_v34 }
 0x394   : > { %v5282_v52 = vpop.eup %3618  ;;  %2220 = vadd.xlane.f32.xlu1 %v5280_v38  ;;  %v1917_v40 = vpop.xlane.xlu1 %1916  ;;  %v2106_v45 = vmul.f32 1.442695, %v2002_v5 }
 0x395   : > { %3628 = vpow2.f32 %v2104_v58  ;;  %v2003_v27 = vsub.f32 %v4948_v28, %v1917_v40  ;;  %2218 = vadd.xlane.f32.xlu0 %v5282_v52  ;;  %v1919_v51 = vpop.xlane.xlu0 %1918 }
 0x396   : > { %3630 = vpow2.f32 %v2102_v25  ;;  %v2004_v23 = vsub.f32 %v4954_v2, %v1919_v51 }
 0x397   : > { %v5288_v17 = vpop.eup %3620  ;;  %v2108_v32 = vmul.f32 1.442695, %v2003_v27 }
 0x398   : > { %v5290_v13 = vpop.eup %3622  ;;  %2224 = vadd.xlane.f32.xlu1 %v5288_v17  ;;  %v1921_v14 = vpop.xlane.xlu1 %1920  ;;  %v2110_v9 = vmul.f32 1.442695, %v2004_v23 }
 0x399   : > { %3632 = vpow2.f32 %v2108_v32  ;;  %v2005_v1 = vsub.f32 %v4966_v6, %v1921_v14  ;;  %2222 = vadd.xlane.f32.xlu0 %v5290_v13  ;;  %v1923_v28 = vpop.xlane.xlu0 %1922 }
 0x39a   : > { %3634 = vpow2.f32 %v2106_v45  ;;  %v2006_v21 = vsub.f32 %v4972_v26, %v1923_v28  ;;  %v6084_v28 = vld [vmem:[#allocation58_spill] sm:$0xff] }
 0x39b   : > { %v5296_v56 = vpop.eup %3624  ;;  %v2112_v2 = vmul.f32 1.442695, %v2005_v1 }
 0x39c   : > { %v5298_v39 = vpop.eup %3626  ;;  %2228 = vadd.xlane.f32.xlu1 %v5296_v56  ;;  %v1925_v42 = vpop.xlane.xlu1 %1924  ;;  %v2114_v34 = vmul.f32 1.442695, %v2006_v21 }
 0x39d   : > { %3636 = vpow2.f32 %v2112_v2  ;;  %v2007_v49 = vsub.f32 %v4984_v29, %v1925_v42  ;;  %2226 = vadd.xlane.f32.xlu0 %v5298_v39  ;;  %v1927_v6 = vpop.xlane.xlu0 %1926 }
 0x39e   : > { %3638 = vpow2.f32 %v2110_v9  ;;  %v2008_v18 = vsub.f32 %v4990_v50, %v1927_v6 }
 0x39f   : > { %v5304_v25 = vpop.eup %3628  ;;  %v2116_v26 = vmul.f32 1.442695, %v2007_v49  ;;  %v6085_v49 = vld [vmem:[#allocation61_spill] sm:$0xff] }
 0x3a0   : > { %v5306_v5 = vpop.eup %3630  ;;  %2232 = vadd.xlane.f32.xlu1 %v5304_v25  ;;  %v1929_v58 = vpop.xlane.xlu1 %1928  ;;  %v2118_v27 = vmul.f32 1.442695, %v2008_v18  ;;  %v6086_v18 = vld [vmem:[#allocation62_spill] sm:$0xff] }
 0x3a1   : > { %3640 = vpow2.f32 %v2116_v26  ;;  %v2009_v40 = vsub.f32 %v5002_v53, %v1929_v58  ;;  %2230 = vadd.xlane.f32.xlu0 %v5306_v5  ;;  %v1931_v29 = vpop.xlane.xlu0 %1930 }
 0x3a2   : > { %3642 = vpow2.f32 %v2114_v34  ;;  %v2010_v51 = vsub.f32 %v5008_v8, %v1931_v29 }
 0x3a3   : > { %v5312_v45 = vpop.eup %3632  ;;  %v2120_v50 = vmul.f32 1.442695, %v2009_v40 }
 0x3a4   : > { %v5314_v23 = vpop.eup %3634  ;;  %2236 = vadd.xlane.f32.xlu1 %v5312_v45  ;;  %v1933_v32 = vpop.xlane.xlu1 %1932  ;;  %v2122_v1 = vmul.f32 1.442695, %v2010_v51  ;;  %v6087_v51 = vld [vmem:[#allocation65_spill] sm:$0xff] }
 0x3a5   : > { %3644 = vpow2.f32 %v2120_v50  ;;  %v2011_v14 = vsub.f32 %v5020_v11, %v1933_v32  ;;  %2234 = vadd.xlane.f32.xlu0 %v5314_v23  ;;  %v1935_v53 = vpop.xlane.xlu0 %1934 }
 0x3a6   : > { %3646 = vpow2.f32 %v2118_v27  ;;  %v2012_v9 = vsub.f32 %v6084_v28, %v1935_v53  ;;  %v6088_v53 = vld [vmem:[#allocation66_spill] sm:$0xff] }
 0x3a7   : > { %v5320_v21 = vpop.eup %3636  ;;  %v2124_v8 = vmul.f32 1.442695, %v2011_v14 }
 0x3a8   : > { %v5322_v2 = vpop.eup %3638  ;;  %2240 = vadd.xlane.f32.xlu1 %v5320_v21  ;;  %v1937_v42 = vpop.xlane.xlu1 %1936  ;;  %v2126_v34 = vmul.f32 1.442695, %v2012_v9 }
 0x3a9   : > { %3648 = vpow2.f32 %v2124_v8  ;;  %v2013_v6 = vsub.f32 %v6085_v49, %v1937_v42  ;;  %2238 = vadd.xlane.f32.xlu0 %v5322_v2  ;;  %v1939_v11 = vpop.xlane.xlu0 %1938  ;;  %v6089_v49 = vld [vmem:[#allocation69_spill] sm:$0xff] }
 0x3aa   : > { %3650 = vpow2.f32 %v2122_v1  ;;  %v2014_v26 = vsub.f32 %v6086_v18, %v1939_v11 }
 0x3ab   : > { %v5328_v58 = vpop.eup %3640  ;;  %v2128_v40 = vmul.f32 1.442695, %v2013_v6 }
 0x3ac   : > { %v5330_v29 = vpop.eup %3642  ;;  %2244 = vadd.xlane.f32.xlu1 %v5328_v58  ;;  %v1941_v27 = vpop.xlane.xlu1 %1940  ;;  %v2130_v14 = vmul.f32 1.442695, %v2014_v26 }
 0x3ad   : > { %3652 = vpow2.f32 %v2128_v40  ;;  %v2015_v50 = vsub.f32 %v6087_v51, %v1941_v27  ;;  %2242 = vadd.xlane.f32.xlu0 %v5330_v29  ;;  %v1943_v32 = vpop.xlane.xlu0 %1942 }
 0x3ae   : > { %3654 = vpow2.f32 %v2126_v34  ;;  %v2016_v1 = vsub.f32 %v6088_v53, %v1943_v32  ;;  %v6090_v34 = vld [vmem:[#allocation70_spill] sm:$0xff]  ;;  %v6093_v32 = vld [vmem:[#allocation73_spill] sm:$0xff] }
 0x3af   : > { %v5336_v28 = vpop.eup %3644  ;;  %v2132_v9 = vmul.f32 1.442695, %v2015_v50 }
 0x3b0   : > { %v5338_v8 = vpop.eup %3646  ;;  %2248 = vadd.xlane.f32.xlu1 %v5336_v28  ;;  %v1945_v42 = vpop.xlane.xlu1 %1944  ;;  %v2134_v18 = vmul.f32 1.442695, %v2016_v1 }
 0x3b1   : > { %3656 = vpow2.f32 %v2132_v9  ;;  %v2017_v6 = vsub.f32 %v6089_v49, %v1945_v42  ;;  %2246 = vadd.xlane.f32.xlu0 %v5338_v8  ;;  %v1947_v11 = vpop.xlane.xlu0 %1946 }
 0x3b2   : > { %3658 = vpow2.f32 %v2130_v14  ;;  %v2018_v26 = vsub.f32 %v6090_v34, %v1947_v11  ;;  %v6094_v14 = vld [vmem:[#allocation74_spill] sm:$0xff] }
 0x3b3   : > { %v5344_v40 = vpop.eup %3648  ;;  %v2136_v27 = vmul.f32 1.442695, %v2017_v6 }
 0x3b4   : > { %6091 = vst [vmem:[#allocation58_spill] sm:$0xff] %v5344_v40  ;;  %v5346_v51 = vpop.eup %3650  ;;  %2252 = vadd.xlane.f32.xlu1 %v5344_v40  ;;  %v1949_v50 = vpop.xlane.xlu1 %1948  ;;  %v2138_v42 = vmul.f32 1.442695, %v2018_v26  ;;  %v6097_v40 = vld [vmem:[#allocation77_spill] sm:$0xff] }
 0x3b5   : > { %6092 = vst [vmem:[#allocation61_spill] sm:$0xff] %v5346_v51  ;;  %3660 = vpow2.f32 %v2136_v27  ;;  %v2019_v53 = vsub.f32 %v6093_v32, %v1949_v50  ;;  %2250 = vadd.xlane.f32.xlu0 %v5346_v51  ;;  %v1951_v9 = vpop.xlane.xlu0 %1950 }
 0x3b6   : > { %3662 = vpow2.f32 %v2134_v18  ;;  %v2020_v1 = vsub.f32 %v6094_v14, %v1951_v9  ;;  %v6098_v18 = vld [vmem:[#allocation78_spill] sm:$0xff] }
 0x3b7   : > { %v5352_v49 = vpop.eup %3652  ;;  %v2140_v11 = vmul.f32 1.442695, %v2019_v53 }
 0x3b8   : > { %6095 = vst [vmem:[#allocation62_spill] sm:$0xff] %v5352_v49  ;;  %v5354_v34 = vpop.eup %3654  ;;  %2256 = vadd.xlane.f32.xlu1 %v5352_v49  ;;  %v1953_v6 = vpop.xlane.xlu1 %1952  ;;  %v2142_v32 = vmul.f32 1.442695, %v2020_v1  ;;  %v6100_v49 = vld [vmem:[#allocation81_spill] sm:$0xff] }
 0x3b9   : > { %6096 = vst [vmem:[#allocation65_spill] sm:$0xff] %v5354_v34  ;;  %3664 = vpow2.f32 %v2140_v11  ;;  %v2021_v27 = vsub.f32 %v6097_v40, %v1953_v6  ;;  %2254 = vadd.xlane.f32.xlu0 %v5354_v34  ;;  %v1955_v50 = vpop.xlane.xlu0 %1954 }
 0x3ba   : > { %3666 = vpow2.f32 %v2138_v42  ;;  %v2022_v26 = vsub.f32 %v6098_v18, %v1955_v50  ;;  %v6101_v42 = vld [vmem:[#allocation82_spill] sm:$0xff] }
 0x3bb   : > { %v5360_v51 = vpop.eup %3656  ;;  %v2144_v9 = vmul.f32 1.442695, %v2021_v27 }
 0x3bc   : > { %6099 = vst [vmem:[#allocation66_spill] sm:$0xff] %v5360_v51  ;;  %v5362_v14 = vpop.eup %3658  ;;  %2260 = vadd.xlane.f32.xlu1 %v5360_v51  ;;  %v1957_v53 = vpop.xlane.xlu1 %1956  ;;  %v2146_v6 = vmul.f32 1.442695, %v2022_v26  ;;  %v6103_v51 = vld [vmem:[#allocation83_spill] sm:$0xff] }
 0x3bd   : > { %3668 = vpow2.f32 %v2144_v9  ;;  %v2023_v11 = vsub.f32 %v6100_v49, %v1957_v53  ;;  %2258 = vadd.xlane.f32.xlu0 %v5362_v14  ;;  %v1959_v40 = vpop.xlane.xlu0 %1958 }
 0x3be   : > { %3670 = vpow2.f32 %v2142_v32  ;;  %v2024_v1 = vsub.f32 %v6101_v42, %v1959_v40 }
 0x3bf   : > { %v5368_v34 = vpop.eup %3660  ;;  %v2148_v50 = vmul.f32 1.442695, %v2023_v11 }
 0x3c0   : > { %v5370_v18 = vpop.eup %3662  ;;  %2264 = vadd.xlane.f32.xlu1 %v5368_v34  ;;  %v1961_v27 = vpop.xlane.xlu1 %1960  ;;  %v2150_v49 = vmul.f32 1.442695, %v2024_v1 }
 0x3c1   : > { %6102 = vst [vmem:[#allocation69_spill] sm:$0xff] %v5370_v18  ;;  %3672 = vpow2.f32 %v2148_v50  ;;  %v2025_v9 = vsub.f32 %v6103_v51, %v1961_v27  ;;  %2262 = vadd.xlane.f32.xlu0 %v5370_v18  ;;  %v6112_v50 = vld [vmem:[#allocation6_spill] sm:$0xff]  ;;  %v6119_v18 = vld [vmem:[#allocation13_spill] sm:$0xff] }
 0x3c2   : > { %3674 = vpow2.f32 %v2146_v6 }
 0x3c3   : > { %v5375_v53 = vpop.eup %3664  ;;  %v2152_v32 = vmul.f32 1.442695, %v2025_v9  ;;  %v6113_v9 = vld [vmem:[#allocation7_spill] sm:$0xff] }
 0x3c4   : > { %6104 = vst [vmem:[#allocation70_spill] sm:$0xff] %v5375_v53  ;;  %v5377_v26 = vpop.eup %3666  ;;  %2268 = vadd.xlane.f32.xlu1 %v5375_v53 }
 0x3c5   : > { %6105 = vst [vmem:[#allocation73_spill] sm:$0xff] %v5377_v26  ;;  %3676 = vpow2.f32 %v2152_v32  ;;  %2266 = vadd.xlane.f32.xlu0 %v5377_v26 }
 0x3c6   : > { %3678 = vpow2.f32 %v2150_v49  ;;  %v6114_v49 = vld [vmem:[#allocation8_spill] sm:$0xff] }
 0x3c7   : > { %v5381_v11 = vpop.eup %3668  ;;  %3680 = vtanh.f32 %v6112_v50 }
 0x3c8   : > { %6106 = vst [vmem:[#allocation74_spill] sm:$0xff] %v5381_v11  ;;  %v5383_v40 = vpop.eup %3670  ;;  %2272 = vadd.xlane.f32.xlu1 %v5381_v11 }
 0x3c9   : > { %6107 = vst [vmem:[#allocation77_spill] sm:$0xff] %v5383_v40  ;;  %2270 = vadd.xlane.f32.xlu0 %v5383_v40 }
 0x3cb   : > { %v5387_v51 = vpop.eup %3672 }
 0x3cc   : > { %6108 = vst [vmem:[#allocation78_spill] sm:$0xff] %v5387_v51  ;;  %v5389_v6 = vpop.eup %3674  ;;  %2276 = vadd.xlane.f32.xlu1 %v5387_v51  ;;  %v6115_v51 = vld [vmem:[#allocation9_spill] sm:$0xff] }
 0x3cd   : > { %6109 = vst [vmem:[#allocation81_spill] sm:$0xff] %v5389_v6  ;;  %2274 = vadd.xlane.f32.xlu0 %v5389_v6 }
 0x3cf   : > { %v5393_v42 = vpop.eup %3676 }
 0x3d0   : > { %6110 = vst [vmem:[#allocation82_spill] sm:$0xff] %v5393_v42  ;;  %v5395_v1 = vpop.eup %3678  ;;  %2280 = vadd.xlane.f32.xlu1 %v5393_v42 }
 0x3d1   : > { %6111 = vst [vmem:[#allocation83_spill] sm:$0xff] %v5395_v1  ;;  %2278 = vadd.xlane.f32.xlu0 %v5395_v1  ;;  %v3681_v40 = vpop.eup %3680  ;;  %v6116_v1 = vld [vmem:[#allocation5_spill] sm:$0xff] }
 0x3d2   : > { %vm2474_vm2 = vcmp.eq.s32.totalorder %v6116_v1, 8 }
 0x3dd   : > { %v2157_v27 = vpop.xlane.xlu1 %2156 }
 0x3de   : > { %3682 = vrcp.f32 %v2157_v27  ;;  %v6117_v27 = vld [vmem:[#allocation11_spill] sm:$0xff] }
 0x3df   : > { %3684 = vtanh.f32 %v6113_v9  ;;  %v6118_v9 = vld [vmem:[#allocation10_spill] sm:$0xff] }
 0x3e0   : > { %3686 = vtanh.f32 %v6114_v49 }
 0x3e1   : > { %v2161_v32 = vpop.xlane.xlu1 %2160 }
 0x3e2   : > { %3688 = vrcp.f32 %v2161_v32  ;;  %v2155_v6 = vpop.xlane.xlu0 %2154 }
 0x3e3   : > { %3690 = vrcp.f32 %v2155_v6  ;;  %v2476_v6 = vsel %vm2474_vm2, %v3681_v40, 0.0 }
 0x3e4   : > { %3692 = vtanh.f32 %v6115_v51 }
 0x3e6   : > { %v2159_v42 = vpop.xlane.xlu0 %2158 }
 0x3e7   : > { %3694 = vrcp.f32 %v2159_v42 }
 0x3e8   : > { %v3683_v50 = vpop.eup %3682  ;;  %3696 = vtanh.f32 %v6117_v27 }
 0x3e9   : > { %3698 = vtanh.f32 %v6118_v9  ;;  %v2347_v49 = vmul.f32 %v3683_v50, %v5150_v48  ;;  %v2165_v32 = vpop.xlane.xlu1 %2164  ;;  %v3685_v11 = vpop.eup %3684  ;;  %v6120_v50 = vld [vmem:[#allocation12_spill] sm:$0xff] }
 0x3ea   : > { %3700 = vrcp.f32 %v2165_v32  ;;  %v2163_v51 = vpop.xlane.xlu0 %2162  ;;  %v3687_v26 = vpop.eup %3686 }
 0x3eb   : > { %v2540_v53 = vsel %vm1769_vm1, %v2347_v49, %v2476_v6  ;;  %3702 = vrcp.f32 %v2163_v51  ;;  %v2478_v9 = vsel %vm2474_vm2, %v3687_v26, 0.0  ;;  %v6121_v51 = vld [vmem:[#allocation15_spill] sm:$0xff]  ;;  %v6122_v26 = vld [vmem:[#allocation14_spill] sm:$0xff] }
 0x3ec   : > { %v3689_v42 = vpop.eup %3688  ;;  %3704 = vtanh.f32 %v6119_v18  ;;  %2604 = vst [vmem:[%s5415_s28 + $0x8] sm:$0xff] %v2540_v53  ;;  %v2475_v18 = vsel %vm2474_vm2, %v3685_v11, 0.0 }
 0x3ed   : > { %v3691_v48 = vpop.eup %3690  ;;  %3706 = vtanh.f32 %v6120_v50  ;;  %v2349_v40 = vmul.f32 %v3689_v42, %v5155_v36  ;;  %v2169_v27 = vpop.xlane.xlu1 %2168 }
 0x3ee   : > { %v2346_v49 = vmul.f32 %v3691_v48, %v5157_v33  ;;  %3708 = vrcp.f32 %v2169_v27  ;;  %v2167_v32 = vpop.xlane.xlu0 %2166  ;;  %v3693_v6 = vpop.eup %3692 }
 0x3ef   : > { %v2542_v53 = vsel %vm1769_vm1, %v2349_v40, %v2478_v9  ;;  %3710 = vrcp.f32 %v2167_v32  ;;  %v2477_v27 = vsel %vm2474_vm2, %v3693_v6, 0.0  ;;  %v6123_v32 = vld [vmem:[#allocation17_spill] sm:$0xff] }
 0x3f0   : > { %3712 = vtanh.f32 %v6121_v51  ;;  %2606 = vst [vmem:[%s5415_s28 + $0x18] sm:$0xff] %v2542_v53  ;;  %v2539_v36 = vsel %vm1769_vm1, %v2346_v49, %v2475_v18  ;;  %v6124_v53 = vld [vmem:[#allocation16_spill] sm:$0xff] }
 0x3f1   : > { %v3695_v42 = vpop.eup %3694  ;;  %3714 = vtanh.f32 %v6122_v26  ;;  %2603 = vst [vmem:[%s5415_s28] sm:$0xff] %v2539_v36  ;;  %v2173_v33 = vpop.xlane.xlu1 %2172 }
 0x3f2   : > { %v3697_v48 = vpop.eup %3696  ;;  %v2348_v11 = vmul.f32 %v3695_v42, %v5163_v63  ;;  %3716 = vrcp.f32 %v2173_v33  ;;  %v2171_v50 = vpop.xlane.xlu0 %2170 }
 0x3f3   : > { %v3699_v40 = vpop.eup %3698  ;;  %3718 = vrcp.f32 %v2171_v50  ;;  %v2480_v6 = vsel %vm2474_vm2, %v3697_v48, 0.0 }
 0x3f4   : > { %v3701_v9 = vpop.eup %3700  ;;  %3720 = vtanh.f32 %v6123_v32  ;;  %v2541_v49 = vsel %vm1769_vm1, %v2348_v11, %v2477_v27  ;;  %v2479_v11 = vsel %vm2474_vm2, %v3699_v40, 0.0  ;;  %v6126_v32 = vld [vmem:[#allocation18_spill] sm:$0xff] }
 0x3f5   : > { %v3703_v18 = vpop.eup %3702  ;;  %3722 = vtanh.f32 %v6124_v53  ;;  %2605 = vst [vmem:[%s5415_s28 + $0x10] sm:$0xff] %v2541_v49  ;;  %v2351_v63 = vmul.f32 %v3701_v9, %v5168_v54  ;;  %v2177_v51 = vpop.xlane.xlu1 %2176  ;;  %v6125_v54 = vld [vmem:[#allocation19_spill] sm:$0xff] }
 0x3f6   : > { %v3705_v36 = vpop.eup %3704  ;;  %v2350_v42 = vmul.f32 %v3703_v18, %v5170_v46  ;;  %3724 = vrcp.f32 %v2177_v51  ;;  %v2175_v26 = vpop.xlane.xlu0 %2174 }
 0x3f7   : > { %v3707_v33 = vpop.eup %3706  ;;  %v2544_v50 = vsel %vm1769_vm1, %v2351_v63, %v2480_v6  ;;  %3726 = vrcp.f32 %v2175_v26  ;;  %v2482_v18 = vsel %vm2474_vm2, %v3705_v36, 0.0 }
 0x3f8   : > { %v3709_v27 = vpop.eup %3708  ;;  %3728 = vtanh.f32 %v6125_v54  ;;  %2608 = vst [vmem:[%s5415_s28 + $0x28] sm:$0xff] %v2544_v50  ;;  %v2543_v9 = vsel %vm1769_vm1, %v2350_v42, %v2479_v11  ;;  %v2481_v6 = vsel %vm2474_vm2, %v3707_v33, 0.0  ;;  %v6128_v50 = vld [vmem:[#allocation20_spill] sm:$0xff] }
 0x3f9   : > { %v3711_v48 = vpop.eup %3710  ;;  %3730 = vtanh.f32 %v6126_v32  ;;  %2607 = vst [vmem:[%s5415_s28 + $0x20] sm:$0xff] %v2543_v9  ;;  %v2353_v46 = vmul.f32 %v3709_v27, %v5176_v30  ;;  %v2181_v49 = vpop.xlane.xlu1 %2180  ;;  %v6127_v30 = vld [vmem:[#allocation21_spill] sm:$0xff] }
 0x3fa   : > { %v3713_v40 = vpop.eup %3712  ;;  %v2352_v53 = vmul.f32 %v3711_v48, %v5178_v60  ;;  %3732 = vrcp.f32 %v2181_v49  ;;  %v2179_v63 = vpop.xlane.xlu0 %2178 }
 0x3fb   : > { %v3715_v51 = vpop.eup %3714  ;;  %v2546_v42 = vsel %vm1769_vm1, %v2353_v46, %v2482_v18  ;;  %3734 = vrcp.f32 %v2179_v63  ;;  %v2484_v54 = vsel %vm2474_vm2, %v3713_v40, 0.0  ;;  %v6130_v63 = vld [vmem:[#allocation22_spill] sm:$0xff] }
 0x3fc   : > { %v3717_v26 = vpop.eup %3716  ;;  %3736 = vtanh.f32 %v6127_v30  ;;  %2610 = vst [vmem:[%s5415_s28 + $0x38] sm:$0xff] %v2546_v42  ;;  %v2545_v11 = vsel %vm1769_vm1, %v2352_v53, %v2481_v6  ;;  %v2483_v46 = vsel %vm2474_vm2, %v3715_v51, 0.0 }
 0x3fd   : > { %v3719_v36 = vpop.eup %3718  ;;  %3738 = vtanh.f32 %v6128_v50  ;;  %2609 = vst [vmem:[%s5415_s28 + $0x30] sm:$0xff] %v2545_v11  ;;  %v2355_v60 = vmul.f32 %v3717_v26, %v5184_v43  ;;  %v2185_v27 = vpop.xlane.xlu1 %2184  ;;  %v6129_v43 = vld [vmem:[#allocation23_spill] sm:$0xff] }
 0x3fe   : > { %v3721_v33 = vpop.eup %3720  ;;  %v2354_v9 = vmul.f32 %v3719_v36, %v5186_v55  ;;  %3740 = vrcp.f32 %v2185_v27  ;;  %v2183_v48 = vpop.xlane.xlu0 %2182 }
 0x3ff   : > { %v3723_v32 = vpop.eup %3722  ;;  %v2548_v49 = vsel %vm1769_vm1, %v2355_v60, %v2484_v54  ;;  %3742 = vrcp.f32 %v2183_v48  ;;  %v2486_v42 = vsel %vm2474_vm2, %v3721_v33, 0.0  ;;  %v6132_v54 = vld [vmem:[#allocation24_spill] sm:$0xff] }
 0x400   : > { %v3725_v18 = vpop.eup %3724  ;;  %3744 = vtanh.f32 %v6129_v43  ;;  %2612 = vst [vmem:[%s5415_s28 + $0x48] sm:$0xff] %v2548_v49  ;;  %v2547_v53 = vsel %vm1769_vm1, %v2354_v9, %v2483_v46  ;;  %v2485_v36 = vsel %vm2474_vm2, %v3723_v32, 0.0 }
 0x401   : > { %v3727_v40 = vpop.eup %3726  ;;  %3746 = vtanh.f32 %v6130_v63  ;;  %2611 = vst [vmem:[%s5415_s28 + $0x40] sm:$0xff] %v2547_v53  ;;  %v2357_v55 = vmul.f32 %v3725_v18, %v5192_v10  ;;  %v2189_v6 = vpop.xlane.xlu1 %2188  ;;  %v6131_v10 = vld [vmem:[#allocation25_spill] sm:$0xff] }
 0x402   : > { %v3729_v51 = vpop.eup %3728  ;;  %v2356_v26 = vmul.f32 %v3727_v40, %v5194_v22  ;;  %3748 = vrcp.f32 %v2189_v6  ;;  %v2187_v30 = vpop.xlane.xlu0 %2186  ;;  %v6134_v6 = vld [vmem:[#allocation26_spill] sm:$0xff] }
 0x403   : > { %v3731_v11 = vpop.eup %3730  ;;  %v2550_v50 = vsel %vm1769_vm1, %v2357_v55, %v2486_v42  ;;  %3750 = vrcp.f32 %v2187_v30  ;;  %v2488_v32 = vsel %vm2474_vm2, %v3729_v51, 0.0 }
 0x404   : > { %v3733_v60 = vpop.eup %3732  ;;  %3752 = vtanh.f32 %v6131_v10  ;;  %2614 = vst [vmem:[%s5415_s28 + $0x58] sm:$0xff] %v2550_v50  ;;  %v2549_v27 = vsel %vm1769_vm1, %v2356_v26, %v2485_v36  ;;  %v2487_v43 = vsel %vm2474_vm2, %v3731_v11, 0.0 }
 0x405   : > { %v3735_v33 = vpop.eup %3734  ;;  %3754 = vtanh.f32 %v6132_v54  ;;  %2613 = vst [vmem:[%s5415_s28 + $0x50] sm:$0xff] %v2549_v27  ;;  %v2359_v22 = vmul.f32 %v3733_v60, %v5200_v57  ;;  %v2193_v9 = vpop.xlane.xlu1 %2192  ;;  %v6133_v57 = vld [vmem:[#allocation27_spill] sm:$0xff]  ;;  %v6136_v54 = vld [vmem:[#allocation28_spill] sm:$0xff] }
 0x406   : > { %v3737_v48 = vpop.eup %3736  ;;  %v2358_v46 = vmul.f32 %v3735_v33, %v5202_v19  ;;  %3756 = vrcp.f32 %v2193_v9  ;;  %v2191_v49 = vpop.xlane.xlu0 %2190 }
 0x407   : > { %v3739_v18 = vpop.eup %3738  ;;  %v2552_v53 = vsel %vm1769_vm1, %v2359_v22, %v2488_v32  ;;  %3758 = vrcp.f32 %v2191_v49  ;;  %v2490_v26 = vsel %vm2474_vm2, %v3737_v48, 0.0 }
 0x408   : > { %v3741_v40 = vpop.eup %3740  ;;  %3760 = vtanh.f32 %v6133_v57  ;;  %2616 = vst [vmem:[%s5415_s28 + $0x68] sm:$0xff] %v2552_v53  ;;  %v2551_v63 = vsel %vm1769_vm1, %v2358_v46, %v2487_v43  ;;  %v2489_v50 = vsel %vm2474_vm2, %v3739_v18, 0.0 }
 0x409   : > { %v3743_v55 = vpop.eup %3742  ;;  %3762 = vtanh.f32 %v6134_v6  ;;  %2615 = vst [vmem:[%s5415_s28 + $0x60] sm:$0xff] %v2551_v63  ;;  %v2361_v19 = vmul.f32 %v3741_v40, %v5208_v35  ;;  %v2197_v51 = vpop.xlane.xlu1 %2196  ;;  %v6135_v35 = vld [vmem:[#allocation29_spill] sm:$0xff]  ;;  %v6138_v63 = vld [vmem:[#allocation30_spill] sm:$0xff] }
 0x40a   : > { %v3745_v42 = vpop.eup %3744  ;;  %v2360_v30 = vmul.f32 %v3743_v55, %v5210_v0  ;;  %3764 = vrcp.f32 %v2197_v51  ;;  %v2195_v11 = vpop.xlane.xlu0 %2194 }
 0x40b   : > { %v3747_v36 = vpop.eup %3746  ;;  %v2554_v60 = vsel %vm1769_vm1, %v2361_v19, %v2490_v26  ;;  %3766 = vrcp.f32 %v2195_v11  ;;  %v2492_v48 = vsel %vm2474_vm2, %v3745_v42, 0.0 }
 0x40c   : > { %v3749_v10 = vpop.eup %3748  ;;  %3768 = vtanh.f32 %v6135_v35  ;;  %2618 = vst [vmem:[%s5415_s28 + $0x78] sm:$0xff] %v2554_v60  ;;  %v2553_v27 = vsel %vm1769_vm1, %v2360_v30, %v2489_v50  ;;  %v2491_v18 = vsel %vm2474_vm2, %v3747_v36, 0.0 }
 0x40d   : > { %v3751_v33 = vpop.eup %3750  ;;  %3770 = vtanh.f32 %v6136_v54  ;;  %2617 = vst [vmem:[%s5415_s28 + $0x70] sm:$0xff] %v2553_v27  ;;  %v2363_v0 = vmul.f32 %v3749_v10, %v5216_v37  ;;  %v2201_v22 = vpop.xlane.xlu1 %2200  ;;  %v6137_v37 = vld [vmem:[#allocation31_spill] sm:$0xff]  ;;  %v6140_v10 = vld [vmem:[#allocation32_spill] sm:$0xff] }
 0x40e   : > { %v3753_v9 = vpop.eup %3752  ;;  %v2362_v32 = vmul.f32 %v3751_v33, %v5218_v31  ;;  %3772 = vrcp.f32 %v2201_v22  ;;  %v2199_v46 = vpop.xlane.xlu0 %2198 }
 0x40f   : > { %v3755_v49 = vpop.eup %3754  ;;  %v2556_v43 = vsel %vm1769_vm1, %v2363_v0, %v2492_v48  ;;  %3774 = vrcp.f32 %v2199_v46  ;;  %v2494_v19 = vsel %vm2474_vm2, %v3753_v9, 0.0 }
 0x410   : > { %v3757_v53 = vpop.eup %3756  ;;  %3776 = vtanh.f32 %v6137_v37  ;;  %2620 = vst [vmem:[%s5415_s28 + $0x88] sm:$0xff] %v2556_v43  ;;  %v2555_v40 = vsel %vm1769_vm1, %v2362_v32, %v2491_v18  ;;  %v2493_v30 = vsel %vm2474_vm2, %v3755_v49, 0.0  ;;  %v6142_v18 = vld [vmem:[#allocation34_spill] sm:$0xff] }
 0x411   : > { %v3759_v57 = vpop.eup %3758  ;;  %3778 = vtanh.f32 %v6138_v63  ;;  %2619 = vst [vmem:[%s5415_s28 + $0x80] sm:$0xff] %v2555_v40  ;;  %v2365_v31 = vmul.f32 %v3757_v53, %v5224_v12  ;;  %v2205_v55 = vpop.xlane.xlu1 %2204  ;;  %v6139_v12 = vld [vmem:[#allocation33_spill] sm:$0xff] }
 0x412   : > { %v3761_v6 = vpop.eup %3760  ;;  %v2364_v51 = vmul.f32 %v3759_v57, %v5226_v24  ;;  %3780 = vrcp.f32 %v2205_v55  ;;  %v2203_v42 = vpop.xlane.xlu0 %2202 }
 0x413   : > { %v3763_v26 = vpop.eup %3762  ;;  %v2558_v11 = vsel %vm1769_vm1, %v2365_v31, %v2494_v19  ;;  %3782 = vrcp.f32 %v2203_v42  ;;  %v2496_v33 = vsel %vm2474_vm2, %v3761_v6, 0.0  ;;  %v6144_v42 = vld [vmem:[#allocation36_spill] sm:$0xff] }
 0x414   : > { %v3765_v36 = vpop.eup %3764  ;;  %3784 = vtanh.f32 %v6139_v12  ;;  %2622 = vst [vmem:[%s5415_s28 + $0x98] sm:$0xff] %v2558_v11  ;;  %v2557_v50 = vsel %vm1769_vm1, %v2364_v51, %v2493_v30  ;;  %v2495_v9 = vsel %vm2474_vm2, %v3763_v26, 0.0 }
 0x415   : > { %v3767_v60 = vpop.eup %3766  ;;  %3786 = vtanh.f32 %v6140_v10  ;;  %2621 = vst [vmem:[%s5415_s28 + $0x90] sm:$0xff] %v2557_v50  ;;  %v2367_v24 = vmul.f32 %v3765_v36, %v5232_v7  ;;  %v2209_v35 = vpop.xlane.xlu1 %2208  ;;  %v6141_v7 = vld [vmem:[#allocation35_spill] sm:$0xff] }
 0x416   : > { %v3769_v27 = vpop.eup %3768  ;;  %v2366_v54 = vmul.f32 %v3767_v60, %v5234_v4  ;;  %3788 = vrcp.f32 %v2209_v35  ;;  %v2207_v0 = vpop.xlane.xlu0 %2206 }
 0x417   : > { %v3771_v22 = vpop.eup %3770  ;;  %v2560_v48 = vsel %vm1769_vm1, %v2367_v24, %v2496_v33  ;;  %3790 = vrcp.f32 %v2207_v0  ;;  %v2498_v37 = vsel %vm2474_vm2, %v3769_v27, 0.0  ;;  %v6146_v33 = vld [vmem:[#allocation38_spill] sm:$0xff] }
 0x418   : > { %v3773_v32 = vpop.eup %3772  ;;  %3792 = vtanh.f32 %v6141_v7  ;;  %2624 = vst [vmem:[%s5415_s28 + $0xa8] sm:$0xff] %v2560_v48  ;;  %v2559_v46 = vsel %vm1769_vm1, %v2366_v54, %v2495_v9  ;;  %v2497_v31 = vsel %vm2474_vm2, %v3771_v22, 0.0 }
 0x419   : > { %v3775_v49 = vpop.eup %3774  ;;  %3794 = vtanh.f32 %v6142_v18  ;;  %2623 = vst [vmem:[%s5415_s28 + $0xa0] sm:$0xff] %v2559_v46  ;;  %v2369_v4 = vmul.f32 %v3773_v32, %v5240_v41  ;;  %v2213_v43 = vpop.xlane.xlu1 %2212  ;;  %v6143_v41 = vld [vmem:[#allocation37_spill] sm:$0xff] }
 0x41a   : > { %v3777_v53 = vpop.eup %3776  ;;  %v2368_v40 = vmul.f32 %v3775_v49, %v5242_v44  ;;  %3796 = vrcp.f32 %v2213_v43  ;;  %v2211_v57 = vpop.xlane.xlu0 %2210  ;;  %v6148_v43 = vld [vmem:[#allocation40_spill] sm:$0xff] }
 0x41b   : > { %v3779_v63 = vpop.eup %3778  ;;  %v2562_v55 = vsel %vm1769_vm1, %v2369_v4, %v2498_v37  ;;  %3798 = vrcp.f32 %v2211_v57  ;;  %v2500_v11 = vsel %vm2474_vm2, %v3777_v53, 0.0 }
 0x41c   : > { %v3781_v6 = vpop.eup %3780  ;;  %3800 = vtanh.f32 %v6143_v41  ;;  %2626 = vst [vmem:[%s5415_s28 + $0xb8] sm:$0xff] %v2562_v55  ;;  %v2561_v19 = vsel %vm1769_vm1, %v2368_v40, %v2497_v31  ;;  %v2499_v60 = vsel %vm2474_vm2, %v3779_v63, 0.0 }
 0x41d   : > { %v3783_v51 = vpop.eup %3782  ;;  %3802 = vtanh.f32 %v6144_v42  ;;  %2625 = vst [vmem:[%s5415_s28 + $0xb0] sm:$0xff] %v2561_v19  ;;  %v2371_v44 = vmul.f32 %v3781_v6, %v5248_v61  ;;  %v2217_v26 = vpop.xlane.xlu1 %2216  ;;  %v6145_v61 = vld [vmem:[#allocation39_spill] sm:$0xff]  ;;  %v6150_v42 = vld [vmem:[#allocation42_spill] sm:$0xff] }
 0x41e   : > { %v3785_v30 = vpop.eup %3784  ;;  %v2370_v36 = vmul.f32 %v3783_v51, %v5250_v20  ;;  %3804 = vrcp.f32 %v2217_v26  ;;  %v2215_v12 = vpop.xlane.xlu0 %2214 }
 0x41f   : > { %v3787_v50 = vpop.eup %3786  ;;  %v2564_v10 = vsel %vm1769_vm1, %v2371_v44, %v2500_v11  ;;  %3806 = vrcp.f32 %v2215_v12  ;;  %v2502_v22 = vsel %vm2474_vm2, %v3785_v30, 0.0 }
 0x420   : > { %v3789_v24 = vpop.eup %3788  ;;  %3808 = vtanh.f32 %v6145_v61  ;;  %2628 = vst [vmem:[%s5415_s28 + $0xc8] sm:$0xff] %v2564_v10  ;;  %v2563_v35 = vsel %vm1769_vm1, %v2370_v36, %v2499_v60  ;;  %v2501_v7 = vsel %vm2474_vm2, %v3787_v50, 0.0 }
 0x421   : > { %v3791_v27 = vpop.eup %3790  ;;  %3810 = vtanh.f32 %v6146_v33  ;;  %2627 = vst [vmem:[%s5415_s28 + $0xc0] sm:$0xff] %v2563_v35  ;;  %v2373_v20 = vmul.f32 %v3789_v24, %v5256_v3  ;;  %v2221_v54 = vpop.xlane.xlu1 %2220  ;;  %v6147_v3 = vld [vmem:[#allocation41_spill] sm:$0xff]  ;;  %v6152_v35 = vld [vmem:[#allocation44_spill] sm:$0xff] }
 0x422   : > { %v3793_v0 = vpop.eup %3792  ;;  %v2372_v9 = vmul.f32 %v3791_v27, %v5258_v16  ;;  %3812 = vrcp.f32 %v2221_v54  ;;  %v2219_v48 = vpop.xlane.xlu0 %2218 }
 0x423   : > { %v3795_v32 = vpop.eup %3794  ;;  %v2566_v46 = vsel %vm1769_vm1, %v2373_v20, %v2502_v22  ;;  %3814 = vrcp.f32 %v2219_v48  ;;  %v2504_v40 = vsel %vm2474_vm2, %v3793_v0, 0.0 }
 0x424   : > { %v3797_v49 = vpop.eup %3796  ;;  %3816 = vtanh.f32 %v6147_v3  ;;  %2630 = vst [vmem:[%s5415_s28 + $0xd8] sm:$0xff] %v2566_v46  ;;  %v2565_v18 = vsel %vm1769_vm1, %v2372_v9, %v2501_v7  ;;  %v2503_v55 = vsel %vm2474_vm2, %v3795_v32, 0.0 }
 0x425   : > { %v3799_v4 = vpop.eup %3798  ;;  %3818 = vtanh.f32 %v6148_v43  ;;  %2629 = vst [vmem:[%s5415_s28 + $0xd0] sm:$0xff] %v2565_v18  ;;  %v2375_v16 = vmul.f32 %v3797_v49, %v5264_v15  ;;  %v2225_v53 = vpop.xlane.xlu1 %2224  ;;  %v6149_v15 = vld [vmem:[#allocation43_spill] sm:$0xff]  ;;  %v6154_v49 = vld [vmem:[#allocation46_spill] sm:$0xff] }
 0x426   : > { %v3801_v37 = vpop.eup %3800  ;;  %v2374_v57 = vmul.f32 %v3799_v4, %v5266_v62  ;;  %3820 = vrcp.f32 %v2225_v53  ;;  %v2223_v63 = vpop.xlane.xlu0 %2222 }
 0x427   : > { %v3803_v31 = vpop.eup %3802  ;;  %v2568_v6 = vsel %vm1769_vm1, %v2375_v16, %v2504_v40  ;;  %3822 = vrcp.f32 %v2223_v63  ;;  %v2506_v30 = vsel %vm2474_vm2, %v3801_v37, 0.0 }
 0x428   : > { %v3805_v41 = vpop.eup %3804  ;;  %3824 = vtanh.f32 %v6149_v15  ;;  %2632 = vst [vmem:[%s5415_s28 + $0xe8] sm:$0xff] %v2568_v6  ;;  %v2567_v19 = vsel %vm1769_vm1, %v2374_v57, %v2503_v55  ;;  %v2505_v50 = vsel %vm2474_vm2, %v3803_v31, 0.0  ;;  %v6156_v55 = vld [vmem:[#allocation48_spill] sm:$0xff] }
 0x429   : > { %v3807_v51 = vpop.eup %3806  ;;  %3826 = vtanh.f32 %v6150_v42  ;;  %2631 = vst [vmem:[%s5415_s28 + $0xe0] sm:$0xff] %v2567_v19  ;;  %v2377_v62 = vmul.f32 %v3805_v41, %v5272_v47  ;;  %v2229_v44 = vpop.xlane.xlu1 %2228  ;;  %v6151_v47 = vld [vmem:[#allocation45_spill] sm:$0xff] }
 0x42a   : > { %v3809_v26 = vpop.eup %3808  ;;  %v2376_v11 = vmul.f32 %v3807_v51, %v5274_v59  ;;  %3828 = vrcp.f32 %v2229_v44  ;;  %v2227_v36 = vpop.xlane.xlu0 %2226 }
 0x42b   : > { %v3811_v12 = vpop.eup %3810  ;;  %v2570_v60 = vsel %vm1769_vm1, %v2377_v62, %v2506_v30  ;;  %3830 = vrcp.f32 %v2227_v36  ;;  %v2508_v20 = vsel %vm2474_vm2, %v3809_v26, 0.0  ;;  %v6158_v36 = vld [vmem:[#allocation50_spill] sm:$0xff] }
 0x42c   : > { %v3813_v10 = vpop.eup %3812  ;;  %3832 = vtanh.f32 %v6151_v47  ;;  %2634 = vst [vmem:[%s5415_s28 + $0xf8] sm:$0xff] %v2570_v60  ;;  %v2569_v24 = vsel %vm1769_vm1, %v2376_v11, %v2505_v50  ;;  %v2507_v9 = vsel %vm2474_vm2, %v3811_v12, 0.0 }
 0x42d   : > { %v3815_v61 = vpop.eup %3814  ;;  %3834 = vtanh.f32 %v6152_v35  ;;  %2633 = vst [vmem:[%s5415_s28 + $0xf0] sm:$0xff] %v2569_v24  ;;  %v2379_v59 = vmul.f32 %v3813_v10, %v5280_v38  ;;  %v2233_v27 = vpop.xlane.xlu1 %2232  ;;  %v6153_v38 = vld [vmem:[#allocation47_spill] sm:$0xff] }
 0x42e   : > { %v3817_v33 = vpop.eup %3816  ;;  %v2378_v54 = vmul.f32 %v3815_v61, %v5282_v52  ;;  %3836 = vrcp.f32 %v2233_v27  ;;  %v2231_v0 = vpop.xlane.xlu0 %2230 }
 0x42f   : > { %v3819_v22 = vpop.eup %3818  ;;  %v2572_v48 = vsel %vm1769_vm1, %v2379_v59, %v2508_v20  ;;  %3838 = vrcp.f32 %v2231_v0  ;;  %v2510_v4 = vsel %vm2474_vm2, %v3817_v33, 0.0  ;;  %v6160_v20 = vld [vmem:[#allocation52_spill] sm:$0xff] }
 0x430   : > { %v3821_v32 = vpop.eup %3820  ;;  %3840 = vtanh.f32 %v6153_v38  ;;  %2636 = vst [vmem:[%s5415_s28 + $0x108] sm:$0xff] %v2572_v48  ;;  %v2571_v7 = vsel %vm1769_vm1, %v2378_v54, %v2507_v9  ;;  %v2509_v37 = vsel %vm2474_vm2, %v3819_v22, 0.0 }
 0x431   : > { %v3823_v46 = vpop.eup %3822  ;;  %3842 = vtanh.f32 %v6154_v49  ;;  %2635 = vst [vmem:[%s5415_s28 + $0x100] sm:$0xff] %v2571_v7  ;;  %v2381_v52 = vmul.f32 %v3821_v32, %v5288_v17  ;;  %v2237_v3 = vpop.xlane.xlu1 %2236  ;;  %v6155_v17 = vld [vmem:[#allocation49_spill] sm:$0xff] }
 0x432   : > { %v3825_v18 = vpop.eup %3824  ;;  %v2380_v43 = vmul.f32 %v3823_v46, %v5290_v13  ;;  %3844 = vrcp.f32 %v2237_v3  ;;  %v2235_v16 = vpop.xlane.xlu0 %2234  ;;  %v6162_v3 = vld [vmem:[#allocation54_spill] sm:$0xff] }
 0x433   : > { %v3827_v53 = vpop.eup %3826  ;;  %v2574_v40 = vsel %vm1769_vm1, %v2381_v52, %v2510_v4  ;;  %3846 = vrcp.f32 %v2235_v16  ;;  %v2512_v15 = vsel %vm2474_vm2, %v3825_v18, 0.0 }
 0x434   : > { %v3829_v57 = vpop.eup %3828  ;;  %3848 = vtanh.f32 %v6155_v17  ;;  %2638 = vst [vmem:[%s5415_s28 + $0x118] sm:$0xff] %v2574_v40  ;;  %v2573_v63 = vsel %vm1769_vm1, %v2380_v43, %v2509_v37  ;;  %v2511_v62 = vsel %vm2474_vm2, %v3827_v53, 0.0 }
 0x435   : > { %v3831_v31 = vpop.eup %3830  ;;  %3850 = vtanh.f32 %v6156_v55  ;;  %2637 = vst [vmem:[%s5415_s28 + $0x110] sm:$0xff] %v2573_v63  ;;  %v2383_v13 = vmul.f32 %v3829_v57, %v5296_v56  ;;  %v2241_v6 = vpop.xlane.xlu1 %2240  ;;  %v6157_v56 = vld [vmem:[#allocation51_spill] sm:$0xff]  ;;  %v6164_v55 = vld [vmem:[#allocation56_spill] sm:$0xff] }
 0x436   : > { %v3833_v41 = vpop.eup %3832  ;;  %v2382_v19 = vmul.f32 %v3831_v31, %v5298_v39  ;;  %3852 = vrcp.f32 %v2241_v6  ;;  %v2239_v51 = vpop.xlane.xlu0 %2238 }
 0x437   : > { %v3835_v42 = vpop.eup %3834  ;;  %v2576_v44 = vsel %vm1769_vm1, %v2383_v13, %v2512_v15  ;;  %3854 = vrcp.f32 %v2239_v51  ;;  %v2514_v60 = vsel %vm2474_vm2, %v3833_v41, 0.0 }
 0x438   : > { %v3837_v26 = vpop.eup %3836  ;;  %3856 = vtanh.f32 %v6157_v56  ;;  %2640 = vst [vmem:[%s5415_s28 + $0x128] sm:$0xff] %v2576_v44  ;;  %v2575_v30 = vsel %vm1769_vm1, %v2382_v19, %v2511_v62  ;;  %v2513_v61 = vsel %vm2474_vm2, %v3835_v42, 0.0 }
 0x439   : > { %v3839_v11 = vpop.eup %3838  ;;  %3858 = vtanh.f32 %v6158_v36  ;;  %2639 = vst [vmem:[%s5415_s28 + $0x120] sm:$0xff] %v2575_v30  ;;  %v2385_v39 = vmul.f32 %v3837_v26, %v5304_v25  ;;  %v2245_v12 = vpop.xlane.xlu1 %2244  ;;  %v6159_v25 = vld [vmem:[#allocation53_spill] sm:$0xff]  ;;  %v6166_v30 = vld [vmem:[#allocation59_spill] sm:$0xff] }
 0x43a   : > { %v3841_v50 = vpop.eup %3840  ;;  %v2384_v10 = vmul.f32 %v3839_v11, %v5306_v5  ;;  %3860 = vrcp.f32 %v2245_v12  ;;  %v2243_v47 = vpop.xlane.xlu0 %2242 }
 0x43b   : > { %v3843_v24 = vpop.eup %3842  ;;  %v2578_v35 = vsel %vm1769_vm1, %v2385_v39, %v2514_v60  ;;  %3862 = vrcp.f32 %v2243_v47  ;;  %v2516_v22 = vsel %vm2474_vm2, %v3841_v50, 0.0 }
 0x43c   : > { %v3845_v59 = vpop.eup %3844  ;;  %3864 = vtanh.f32 %v6159_v25  ;;  %2642 = vst [vmem:[%s5415_s28 + $0x138] sm:$0xff] %v2578_v35  ;;  %v2577_v27 = vsel %vm1769_vm1, %v2384_v10, %v2513_v61  ;;  %v2515_v38 = vsel %vm2474_vm2, %v3843_v24, 0.0 }
 0x43d   : > { %v3847_v33 = vpop.eup %3846  ;;  %3866 = vtanh.f32 %v6160_v20  ;;  %2641 = vst [vmem:[%s5415_s28 + $0x130] sm:$0xff] %v2577_v27  ;;  %v2387_v5 = vmul.f32 %v3845_v59, %v5312_v45  ;;  %v2249_v54 = vpop.xlane.xlu1 %2248  ;;  %v6161_v45 = vld [vmem:[#allocation55_spill] sm:$0xff] }
 0x43e   : > { %v3849_v0 = vpop.eup %3848  ;;  %v2386_v9 = vmul.f32 %v3847_v33, %v5314_v23  ;;  %3868 = vrcp.f32 %v2249_v54  ;;  %v2247_v48 = vpop.xlane.xlu0 %2246  ;;  %v6168_v59 = vld [vmem:[#allocation63_spill] sm:$0xff] }
 0x43f   : > { %v3851_v32 = vpop.eup %3850  ;;  %v2580_v7 = vsel %vm1769_vm1, %v2387_v5, %v2516_v22  ;;  %3870 = vrcp.f32 %v2247_v48  ;;  %v2518_v43 = vsel %vm2474_vm2, %v3849_v0, 0.0  ;;  %v6170_v5 = vld [vmem:[#allocation61_spill] sm:$0xff] }
 0x440   : > { %v3853_v46 = vpop.eup %3852  ;;  %3872 = vtanh.f32 %v6161_v45  ;;  %2644 = vst [vmem:[%s5415_s28 + $0x148] sm:$0xff] %v2580_v7  ;;  %v2579_v49 = vsel %vm1769_vm1, %v2386_v9, %v2515_v38  ;;  %v2517_v40 = vsel %vm2474_vm2, %v3851_v32, 0.0  ;;  %v6171_v38 = vld [vmem:[#allocation68_spill] sm:$0xff]  ;;  %v6172_v45 = vld [vmem:[#allocation67_spill] sm:$0xff] }
 0x441   : > { %v3855_v52 = vpop.eup %3854  ;;  %3874 = vtanh.f32 %v6162_v3  ;;  %2643 = vst [vmem:[%s5415_s28 + $0x140] sm:$0xff] %v2579_v49  ;;  %v2389_v23 = vmul.f32 %v3853_v46, %v5320_v21  ;;  %v2253_v18 = vpop.xlane.xlu1 %2252  ;;  %v6163_v21 = vld [vmem:[#allocation57_spill] sm:$0xff]  ;;  %v6173_v49 = vld [vmem:[#allocation62_spill] sm:$0xff] }
 0x442   : > { %v3857_v4 = vpop.eup %3856  ;;  %v2388_v16 = vmul.f32 %v3855_v52, %v5322_v2  ;;  %3876 = vrcp.f32 %v2253_v18  ;;  %v2251_v53 = vpop.xlane.xlu0 %2250 }
 0x443   : > { %v3859_v37 = vpop.eup %3858  ;;  %v2582_v57 = vsel %vm1769_vm1, %v2389_v23, %v2518_v43  ;;  %3878 = vrcp.f32 %v2251_v53  ;;  %v2520_v41 = vsel %vm2474_vm2, %v3857_v4, 0.0  ;;  %v6174_v4 = vld [vmem:[#allocation65_spill] sm:$0xff] }
 0x444   : > { %v3861_v17 = vpop.eup %3860  ;;  %3880 = vtanh.f32 %v6163_v21  ;;  %2646 = vst [vmem:[%s5415_s28 + $0x158] sm:$0xff] %v2582_v57  ;;  %v2581_v63 = vsel %vm1769_vm1, %v2388_v16, %v2517_v40  ;;  %v2519_v42 = vsel %vm2474_vm2, %v3859_v37, 0.0 }
 0x445   : > { %v3863_v31 = vpop.eup %3862  ;;  %3882 = vtanh.f32 %v6164_v55  ;;  %2645 = vst [vmem:[%s5415_s28 + $0x150] sm:$0xff] %v2581_v63  ;;  %v2391_v2 = vmul.f32 %v3861_v17, %v5328_v58  ;;  %v2257_v13 = vpop.xlane.xlu1 %2256  ;;  %v6165_v58 = vld [vmem:[#allocation60_spill] sm:$0xff]  ;;  %v6177_v55 = vld [vmem:[#allocation66_spill] sm:$0xff] }
 0x446   : > { %v3865_v6 = vpop.eup %3864  ;;  %v2390_v15 = vmul.f32 %v3863_v31, %v5330_v29  ;;  %3884 = vrcp.f32 %v2257_v13  ;;  %v2255_v19 = vpop.xlane.xlu0 %2254  ;;  %v6175_v17 = vld [vmem:[#allocation72_spill] sm:$0xff]  ;;  %v6176_v31 = vld [vmem:[#allocation71_spill] sm:$0xff] }
 0x447   : > { %v3867_v51 = vpop.eup %3866  ;;  %v2584_v62 = vsel %vm1769_vm1, %v2391_v2, %v2520_v41  ;;  %3886 = vrcp.f32 %v2255_v19  ;;  %v2522_v39 = vsel %vm2474_vm2, %v3865_v6, 0.0 }
 0x448   : > { %v3869_v44 = vpop.eup %3868  ;;  %3888 = vtanh.f32 %v6165_v58  ;;  %2648 = vst [vmem:[%s5415_s28 + $0x168] sm:$0xff] %v2584_v62  ;;  %v2583_v26 = vsel %vm1769_vm1, %v2390_v15, %v2519_v42  ;;  %v2521_v10 = vsel %vm2474_vm2, %v3867_v51, 0.0  ;;  %v6178_v58 = vld [vmem:[#allocation76_spill] sm:$0xff] }
 0x449   : > { %v3871_v56 = vpop.eup %3870  ;;  %3890 = vtanh.f32 %v6166_v30  ;;  %2647 = vst [vmem:[%s5415_s28 + $0x160] sm:$0xff] %v2583_v26  ;;  %v2393_v29 = vmul.f32 %v3869_v44, %v5336_v28  ;;  %v2261_v11 = vpop.xlane.xlu1 %2260  ;;  %v6167_v28 = vld [vmem:[#allocation64_spill] sm:$0xff]  ;;  %v6179_v30 = vld [vmem:[#allocation75_spill] sm:$0xff] }
 0x44a   : > { %v3873_v36 = vpop.eup %3872  ;;  %v2392_v12 = vmul.f32 %v3871_v56, %v5338_v8  ;;  %3892 = vrcp.f32 %v2261_v11  ;;  %v2259_v50 = vpop.xlane.xlu0 %2258  ;;  %v6169_v8 = vld [vmem:[#allocation58_spill] sm:$0xff] }
 0x44b   : > { %v3875_v60 = vpop.eup %3874  ;;  %v2586_v47 = vsel %vm1769_vm1, %v2393_v29, %v2522_v39  ;;  %3894 = vrcp.f32 %v2259_v50  ;;  %v2524_v20 = vsel %vm2474_vm2, %v3873_v36, 0.0  ;;  %v6180_v39 = vld [vmem:[#allocation69_spill] sm:$0xff] }
 0x44c   : > { %v3877_v24 = vpop.eup %3876  ;;  %3896 = vtanh.f32 %v6167_v28  ;;  %2650 = vst [vmem:[%s5415_s28 + $0x178] sm:$0xff] %v2586_v47  ;;  %v2585_v61 = vsel %vm1769_vm1, %v2392_v12, %v2521_v10  ;;  %v2523_v9 = vsel %vm2474_vm2, %v3875_v60, 0.0 }
 0x44d   : > { %v3879_v35 = vpop.eup %3878  ;;  %3898 = vtanh.f32 %v6168_v59  ;;  %2649 = vst [vmem:[%s5415_s28 + $0x170] sm:$0xff] %v2585_v61  ;;  %v2395_v25 = vmul.f32 %v3877_v24, %v6169_v8  ;;  %v2265_v27 = vpop.xlane.xlu1 %2264  ;;  %v6183_v59 = vld [vmem:[#allocation70_spill] sm:$0xff] }
 0x44e   : > { %v3881_v33 = vpop.eup %3880  ;;  %v2394_v54 = vmul.f32 %v3879_v35, %v6170_v5  ;;  %3900 = vrcp.f32 %v2265_v27  ;;  %v2263_v0 = vpop.xlane.xlu0 %2262  ;;  %v6182_v35 = vld [vmem:[#allocation79_spill] sm:$0xff] }
 0x44f   : > { %v3883_v22 = vpop.eup %3882  ;;  %v2588_v48 = vsel %vm1769_vm1, %v2395_v25, %v2524_v20  ;;  %3902 = vrcp.f32 %v2263_v0  ;;  %v2526_v18 = vsel %vm2474_vm2, %v3881_v33, 0.0  ;;  %v6184_v20 = vld [vmem:[#allocation73_spill] sm:$0xff] }
 0x450   : > { %v3885_v32 = vpop.eup %3884  ;;  %3904 = vtanh.f32 %v6171_v38  ;;  %2652 = vst [vmem:[%s5415_s28 + $0x188] sm:$0xff] %v2588_v48  ;;  %v2587_v7 = vsel %vm1769_vm1, %v2394_v54, %v2523_v9  ;;  %v2525_v37 = vsel %vm2474_vm2, %v3883_v22, 0.0 }
 0x451   : > { %v3887_v46 = vpop.eup %3886  ;;  %3906 = vtanh.f32 %v6172_v45  ;;  %2651 = vst [vmem:[%s5415_s28 + $0x180] sm:$0xff] %v2587_v7  ;;  %v2397_v52 = vmul.f32 %v3885_v32, %v6173_v49  ;;  %v2269_v3 = vpop.xlane.xlu1 %2268  ;;  %v6185_v7 = vld [vmem:[#allocation74_spill] sm:$0xff] }
 0x452   : > { %v3889_v23 = vpop.eup %3888  ;;  %v2396_v43 = vmul.f32 %v3887_v46, %v6174_v4  ;;  %3908 = vrcp.f32 %v2269_v3  ;;  %v2267_v16 = vpop.xlane.xlu0 %2266 }
 0x453   : > { %v3891_v53 = vpop.eup %3890  ;;  %v2590_v40 = vsel %vm1769_vm1, %v2397_v52, %v2526_v18  ;;  %3910 = vrcp.f32 %v2267_v16  ;;  %v2528_v41 = vsel %vm2474_vm2, %v3889_v23, 0.0  ;;  %v6186_v52 = vld [vmem:[#allocation77_spill] sm:$0xff] }
 0x454   : > { %v3893_v57 = vpop.eup %3892  ;;  %3912 = vtanh.f32 %v6175_v17  ;;  %2654 = vst [vmem:[%s5415_s28 + $0x198] sm:$0xff] %v2590_v40  ;;  %v2589_v21 = vsel %vm1769_vm1, %v2396_v43, %v2525_v37  ;;  %v2527_v42 = vsel %vm2474_vm2, %v3891_v53, 0.0  ;;  %v6187_v37 = vld [vmem:[#allocation78_spill] sm:$0xff] }
 0x455   : > { %v3895_v63 = vpop.eup %3894  ;;  %3914 = vtanh.f32 %v6176_v31  ;;  %2653 = vst [vmem:[%s5415_s28 + $0x190] sm:$0xff] %v2589_v21  ;;  %v2399_v2 = vmul.f32 %v3893_v57, %v6177_v55  ;;  %v2273_v13 = vpop.xlane.xlu1 %2272  ;;  %v6188_v21 = vld [vmem:[#allocation81_spill] sm:$0xff] }
 0x456   : > { %v3897_v6 = vpop.eup %3896  ;;  %v2398_v15 = vmul.f32 %v3895_v63, %v5362_v14  ;;  %3916 = vrcp.f32 %v2273_v13  ;;  %v2271_v19 = vpop.xlane.xlu0 %2270 }
 0x457   : > { %v3899_v51 = vpop.eup %3898  ;;  %v2592_v62 = vsel %vm1769_vm1, %v2399_v2, %v2528_v41  ;;  %3918 = vrcp.f32 %v2271_v19  ;;  %v2530_v36 = vsel %vm2474_vm2, %v3897_v6, 0.0 }
 0x458   : > { %v3901_v44 = vpop.eup %3900  ;;  %3920 = vtanh.f32 %v6178_v58  ;;  %2656 = vst [vmem:[%s5415_s28 + $0x1a8] sm:$0xff] %v2592_v62  ;;  %v2591_v26 = vsel %vm1769_vm1, %v2398_v15, %v2527_v42  ;;  %v2529_v10 = vsel %vm2474_vm2, %v3899_v51, 0.0  ;;  %v6189_v15 = vld [vmem:[#allocation82_spill] sm:$0xff]  ;;  %v6190_v42 = vld [vmem:[#allocation83_spill] sm:$0xff] }
 0x459   : > { %v3903_v56 = vpop.eup %3902  ;;  %3922 = vtanh.f32 %v6179_v30  ;;  %2655 = vst [vmem:[%s5415_s28 + $0x1a0] sm:$0xff] %v2591_v26  ;;  %v2401_v14 = vmul.f32 %v3901_v44, %v5368_v34  ;;  %v2277_v29 = vpop.xlane.xlu1 %2276  ;;  %v6181_v34 = vld [vmem:[#allocation80_spill] sm:$0xff] }
 0x45a   : > { %v3905_v11 = vpop.eup %3904  ;;  %v2400_v12 = vmul.f32 %v3903_v56, %v6180_v39  ;;  %3924 = vrcp.f32 %v2277_v29  ;;  %v2275_v50 = vpop.xlane.xlu0 %2274 }
 0x45b   : > { %v3907_v60 = vpop.eup %3906  ;;  %v2594_v47 = vsel %vm1769_vm1, %v2401_v14, %v2530_v36  ;;  %3926 = vrcp.f32 %v2275_v50  ;;  %v2532_v33 = vsel %vm2474_vm2, %v3905_v11, 0.0 }
 0x45c   : > { %v3909_v24 = vpop.eup %3908  ;;  %3928 = vtanh.f32 %v6181_v34  ;;  %2658 = vst [vmem:[%s5415_s28 + $0x1b8] sm:$0xff] %v2594_v47  ;;  %v2593_v28 = vsel %vm1769_vm1, %v2400_v12, %v2529_v10  ;;  %v2531_v22 = vsel %vm2474_vm2, %v3907_v60, 0.0 }
 0x45d   : > { %v3911_v61 = vpop.eup %3910  ;;  %3930 = vtanh.f32 %v6182_v35  ;;  %2657 = vst [vmem:[%s5415_s28 + $0x1b0] sm:$0xff] %v2593_v28  ;;  %v2403_v8 = vmul.f32 %v3909_v24, %v6183_v59  ;;  %v2281_v25 = vpop.xlane.xlu1 %2280 }
 0x45e   : > { %v3913_v27 = vpop.eup %3912  ;;  %v2402_v5 = vmul.f32 %v3911_v61, %v6184_v20  ;;  %3932 = vrcp.f32 %v2281_v25  ;;  %v2279_v54 = vpop.xlane.xlu0 %2278 }
 0x45f   : > { %v3915_v0 = vpop.eup %3914  ;;  %v2596_v9 = vsel %vm1769_vm1, %v2403_v8, %v2532_v33  ;;  %3934 = vrcp.f32 %v2279_v54  ;;  %v2534_v49 = vsel %vm2474_vm2, %v3913_v27, 0.0 }
 0x460   : > { %v3917_v48 = vpop.eup %3916  ;;  %2660 = vst [vmem:[%s5415_s28 + $0x1c8] sm:$0xff] %v2596_v9  ;;  %v2595_v32 = vsel %vm1769_vm1, %v2402_v5, %v2531_v22  ;;  %v2533_v18 = vsel %vm2474_vm2, %v3915_v0, 0.0 }
 0x461   : > { %v3919_v38 = vpop.eup %3918  ;;  %2659 = vst [vmem:[%s5415_s28 + $0x1c0] sm:$0xff] %v2595_v32  ;;  %v2405_v46 = vmul.f32 %v3917_v48, %v6185_v7 }
 0x462   : > { %v3921_v45 = vpop.eup %3920  ;;  %v2404_v3 = vmul.f32 %v3919_v38, %v6186_v52 }
 0x463   : > { %v3923_v23 = vpop.eup %3922  ;;  %v2598_v4 = vsel %vm1769_vm1, %v2405_v46, %v2534_v49  ;;  %v2536_v17 = vsel %vm2474_vm2, %v3921_v45, 0.0 }
 0x464   : > { %v3925_v43 = vpop.eup %3924  ;;  %2662 = vst [vmem:[%s5415_s28 + $0x1d8] sm:$0xff] %v2598_v4  ;;  %v2597_v16 = vsel %vm1769_vm1, %v2404_v3, %v2533_v18  ;;  %v2535_v55 = vsel %vm2474_vm2, %v3923_v23, 0.0 }
 0x465   : > { %v3927_v53 = vpop.eup %3926  ;;  %2661 = vst [vmem:[%s5415_s28 + $0x1d0] sm:$0xff] %v2597_v16  ;;  %v2407_v40 = vmul.f32 %v3925_v43, %v6187_v37 }
 0x466   : > { %v3929_v57 = vpop.eup %3928  ;;  %v2406_v63 = vmul.f32 %v3927_v53, %v6188_v21 }
 0x467   : > { %v3931_v31 = vpop.eup %3930  ;;  %v2600_v2 = vsel %vm1769_vm1, %v2407_v40, %v2536_v17  ;;  %v2538_v51 = vsel %vm2474_vm2, %v3929_v57, 0.0 }
 0x468   : > { %v3933_v13 = vpop.eup %3932  ;;  %2664 = vst [vmem:[%s5415_s28 + $0x1e8] sm:$0xff] %v2600_v2  ;;  %v2599_v6 = vsel %vm1769_vm1, %v2406_v63, %v2535_v55  ;;  %v2537_v44 = vsel %vm2474_vm2, %v3931_v31, 0.0 }
 0x469   : > { %v3935_v41 = vpop.eup %3934  ;;  %2663 = vst [vmem:[%s5415_s28 + $0x1e0] sm:$0xff] %v2599_v6  ;;  %v2409_v19 = vmul.f32 %v3933_v13, %v6189_v15 }
 0x46a   : > { %v2408_v62 = vmul.f32 %v3935_v41, %v6190_v42 }
 0x46b   : > { %v2602_v58 = vsel %vm1769_vm1, %v2409_v19, %v2538_v51 }
 0x46c   : > { %2666 = vst [vmem:[%s5415_s28 + $0x1f8] sm:$0xff] %v2602_v58  ;;  %v2601_v26 = vsel %vm1769_vm1, %v2408_v62, %v2537_v44 }
 0x46d   : > { %2665 = vst [vmem:[%s5415_s28 + $0x1f0] sm:$0xff] %v2601_v26 }
 0x46e   : > { %3949 = shalt.err (!%p3946_p3)
}
 0x46f   : > { %s3950_s11 = scalar_lea.hbm %s5850_s5, 8192  ;;  %s3954_s20 = scalar_lea.hbm %s5908_s3, 32768 }
 0x470   : > { %p3951_p4 = scmp.ne.s32.totalorder %s5850_s5, %s3950_s11  ;;  %p3955_p9 = scmp.lt.u32.totalorder %s5850_s5, %s5908_s3 }
 0x471   : > { %p3956_p10 = scmp.lt.u32.totalorder %s3954_s20, %s3950_s11  ;;  %p3958_p12 = scmp.lt.u32.totalorder %s3950_s11, %s5850_s5 }
 0x472   : > { %p3952_p7 = pnand %p3951_p4, %p4061_p5 }
 0x473   : > { %p3957_p11 = por %p3956_p10, %p3955_p9 }
 0x474   : > { %p3953_p8 = pneg %p3952_p7 }
 0x475   : > { %p3959_p13 = por %p3958_p12, %p3957_p11 }
 0x477   : > { %p3960_p0 = pnand %p3959_p13, %p3953_p8 }
 0x479   : > { %3963 = shalt.err (!%p3960_p0)
}
 0x47a   : > { %s4001_s26 = smov 128   ;;  %s4002_s27 = smov 8  }
 0x47b   : > { %3511 = dma.vmem_to_hbm [thread:$0]  (%p4061_p5), %s5852_s30, 8192, %s5850_s5, %s5864_s6, %s4001_s26, %s4001_s26, %s4002_s27  }
 0x47c PF: > { %p3517_p1 = scmp.ge.s32.totalorder %s3998_s15, 2  ;;  %s2696_s28 = sand.u32 1, %s3986_s12  }
 0x47d   : > { %s2697_s29 = scalar_lea.sflag [#allocation3], %s2696_s28 }
 0x47e   : > { %p3514_p2 = pnand %p3517_p1, %p4065_p6 }
 0x480   : > { %3981 = dma.done.wait (!%p3514_p2), %s2697_s29, 8192  }
 0x481   : > { %3983 = vsyncadd (!%p3514_p2), %s2697_s29, 4294959104  ;;  %p13_p3 = scmp.ge.s32.totalorder %s4048_s18, 6   ;;  %s6191_s12 = smov %s3990_s13 }
 0x482   : > { %s6192_s13 = smov %s3994_s14  ;;  %s6193_s14 = smov %s4059_s21 }
 0x483   : > { %s6194_s15 = smov %s4048_s18  ;;  %15 = sbr.rel (!%p13_p3) target bundleno = 3 (0x3), region = 67 }
 0x48a   :  { %2702 = vsyncpa [#allocation3], 1 }
 0x48b   :  { %2704 = vsyncpa [#allocation3 + $0x1], 1 }

</bundles_post_ra>
